<compile_context>
chip_gen: v6e
topology: v6e:2x2x1
jax: 0.10.0
libtpu: 0.0.40
codegen_flags: <defaults>
</compile_context>

<pallas_src>
import jax
import jax.numpy as jnp
from jax.experimental import pallas as pl
from jax.experimental.pallas import tpu as pltpu


# ----------------------------- fused Pallas kernel ---------------------------

def _lenet_kernel(x_ref, w1b_ref, b1_ref, pv28_ref, ph1_ref,
                  w2b_ref, b2_ref, pv10_ref, ph2_ref,
                  w1fc_ref, fc1b_ref, fc2w_ref, fc2b_ref, fc3w_ref, fc3b_ref,
                  out_ref, h1_s, p2_s):
    """Entire LeNet forward; all operands are full-array VMEM refs.

    Layout convention for conv activations: rows = output height, lanes =
    (channel, output width) flattened as c*W + w, so every conv is a sum of 5
    banded matmuls and every pool is a (left, right) pair of pooling matmuls.
    """
    f32 = jnp.float32
    batch = x_ref.shape[0]

    for b in range(batch):
        # ---- conv1 (1->6, 5x5 VALID) as 5 banded MXU matmuls + bias + ReLU ----
        z1 = jnp.zeros((28, 6 * 28), f32)
        for ky in range(5):
            band = x_ref[b, pl.ds(ky, 28), :]                       # (28, 32)
            z1 = z1 + jnp.dot(band, w1b_ref[ky], preferred_element_type=f32)
        z1 = jnp.maximum(z1 + b1_ref[...], 0.0)                     # (28, 168)

        # ---- 2x2 avg-pool -> (14, 6*14); stored to scratch so conv2's row
        #      bands are plain pl.ds reads ----
        h1_s[b, :, :] = jnp.dot(
            jnp.dot(pv28_ref[...], z1, preferred_element_type=f32),
            ph1_ref[...], preferred_element_type=f32)               # (14, 84)

        # ---- conv2 (6->16, 5x5 VALID) as 5 banded MXU matmuls + bias + ReLU ----
        z2 = jnp.zeros((10, 16 * 10), f32)
        for ky in range(5):
            band = h1_s[b, pl.ds(ky, 10), :]                        # (10, 84)
            z2 = z2 + jnp.dot(band, w2b_ref[ky], preferred_element_type=f32)
        z2 = jnp.maximum(z2 + b2_ref[...], 0.0)                     # (10, 160)

        # ---- 2x2 avg-pool -> (5, 16*5): rows = pooled H, lanes = (c, pooled W) ----
        p2_s[b, :, :] = jnp.dot(
            jnp.dot(pv10_ref[...], z2, preferred_element_type=f32),
            ph2_ref[...], preferred_element_type=f32)               # (5, 80)

        # ---- fc1 (400->120): PyTorch (c,h,w) flatten order lives in w1fc's
        #      layout; contraction split over the 5 pooled rows ----
        a = fc1b_ref[...]                                           # (1, 120)
        for i in range(5):
            a = a + jnp.dot(p2_s[b, pl.ds(i, 1), :], w1fc_ref[i],
                            preferred_element_type=f32)
        a = jnp.maximum(a, 0.0)

        # ---- fc2 -> ReLU -> fc3 ----
        a = jnp.maximum(
            jnp.dot(a, fc2w_ref[...], preferred_element_type=f32) + fc2b_ref[...],
            0.0)                                                    # (1, 84)
        a = jnp.dot(a, fc3w_ref[...], preferred_element_type=f32) + fc3b_ref[...]
        out_ref[pl.ds(b, 1), :] = a.astype(out_ref.dtype)


@jax.jit
def lenet_forward(p, x):
    B = x.shape[0]
    assert x.shape[1:] == (1, 32, 32), "LeNet classifier (5*5*16) needs 1x32x32 input"
    out_dim = p["fc3wT"].shape[1]
    return pl.pallas_call(
        _lenet_kernel,
        out_shape=jax.ShapeDtypeStruct((B, out_dim), jnp.float32),
        scratch_shapes=[pltpu.VMEM((B, 14, 84), jnp.float32),   # pooled conv1
                        pltpu.VMEM((B, 5, 80), jnp.float32)],   # pooled conv2
    )(x.reshape(B, 32, 32),
      p["w1band"], p["b1row"], p["pv28"], p["ph1"],
      p["w2band"], p["b2row"], p["pv10"], p["ph2"],
      p["w1fc"], p["fc1b"], p["fc2wT"], p["fc2b"], p["fc3wT"], p["fc3b"])


# -------------------- one-time parameter repacking (host/XLA) ----------------

def _banded_conv_weights(w, in_w, out_w):
    """OIHW conv weight -> (KH, C*in_w, O*out_w) banded matmul weights.

    band[ky, c*in_w + x, o*out_w + j] = w[o, c, ky, x - j] if 0 <= x - j < KW else 0,
    so  out[i, o*out_w + j] = sum_ky  inp_rows[i+ky, :] @ band[ky]  is the VALID
    cross-correlation computed by nn.Conv2d.
    """
    O, C, KH, KW = w.shape
    kx = jnp.arange(in_w)[:, None] - jnp.arange(out_w)[None, :]      # (in_w, out_w)
    mask = (kx >= 0) & (kx < KW)
    wk = w[:, :, :, jnp.clip(kx, 0, KW - 1)]                         # (O,C,KH,in_w,out_w)
    wk = jnp.where(mask[None, None, None], wk, 0.0)
    wk = wk.transpose(2, 1, 3, 0, 4)                                 # (KH,C,in_w,O,out_w)
    return wk.reshape(KH, C * in_w, O * out_w).astype(jnp.float32)


def _pair_pool(n):
    """(2n, n) column-pairing matrix: P[i, i2] = 1 if i // 2 == i2."""
    return (jnp.arange(2 * n)[:, None] // 2 == jnp.arange(n)[None, :]).astype(jnp.float32)


def init_params(key, output_dim):
    shapes = {
        "conv1_w": (6, 1, 5, 5), "conv1_b": (6,),
        "conv2_w": (16, 6, 5, 5), "conv2_b": (16,),
        "fc1_w": (120, 5 * 5 * 16), "fc1_b": (120,),
        "fc2_w": (84, 120), "fc2_b": (84,),
        "fc3_w": (output_dim, 84), "fc3_b": (output_dim,),
    }
    params = {}
    keys = jax.random.split(key, len(shapes))
    for k_, (name, shp) in zip(keys, sorted(shapes.items())):
        params[name] = 0.1 * jax.random.normal(k_, shp, jnp.float32)
    return params


def prepare_params(params):
    """One-time repack of PyTorch-layout weights into the fused kernel's layouts."""
    w1fc = (params["fc1_w"].T                    # (400, 120), rows ordered (c, h, w)
            .reshape(16, 5, 5, 120)              # (c, h, w, n)
            .transpose(1, 0, 2, 3)               # (h, c, w, n)
            .reshape(5, 80, 120))                # per pooled row h: lanes (c*5 + w)
    return {
        "w1band": _banded_conv_weights(params["conv1_w"], 32, 28),     # (5, 32, 168)
        "b1row": jnp.repeat(params["conv1_b"], 28)[None, :],           # (1, 168)
        "pv28": _pair_pool(14).T,                                      # (14, 28)
        "ph1": jnp.kron(jnp.eye(6, dtype=jnp.float32), _pair_pool(14)) * 0.25,   # (168, 84)
        "w2band": _banded_conv_weights(params["conv2_w"], 14, 10),     # (5, 84, 160)
        "b2row": jnp.repeat(params["conv2_b"], 10)[None, :],           # (1, 160)
        "pv10": _pair_pool(5).T,                                       # (5, 10)
        "ph2": jnp.kron(jnp.eye(16, dtype=jnp.float32), _pair_pool(5)) * 0.25,   # (160, 80)
        "w1fc": w1fc,                                                  # (5, 80, 120)
        "fc1b": params["fc1_b"][None, :],
        "fc2wT": params["fc2_w"].T,                                    # (120, 84)
        "fc2b": params["fc2_b"][None, :],
        "fc3wT": params["fc3_w"].T,                                    # (84, out)
        "fc3b": params["fc3_b"][None, :],
    }


# ------------------------ pure-JAX reference (checking) ----------------------

def lenet_reference(params, x):
    dn = ("NCHW", "OIHW", "NCHW")
    prec = jax.lax.Precision.HIGHEST

    def conv(x, w, b):
        y = jax.lax.conv_general_dilated(x, w, (1, 1), "VALID",
                                         dimension_numbers=dn, precision=prec)
        return jnp.maximum(y + b[None, :, None, None], 0.0)

    def pool(x):
        B, C, H, W = x.shape
        return x.reshape(B, C, H // 2, 2, W // 2, 2).mean(axis=(3, 5))

    x = pool(conv(x, params["conv1_w"], params["conv1_b"]))
    x = pool(conv(x, params["conv2_w"], params["conv2_b"]))
    x = x.reshape(x.shape[0], -1)
    x = jnp.maximum(jnp.dot(x, params["fc1_w"].T, precision=prec) + params["fc1_b"], 0.0)
    x = jnp.maximum(jnp.dot(x, params["fc2_w"].T, precision=prec) + params["fc2_b"], 0.0)
    return jnp.dot(x, params["fc3_w"].T, precision=prec) + params["fc3_b"]


if __name__ == "__main__":
    key = jax.random.PRNGKey(0)
    kx, kp = jax.random.split(key)

    output_dim = 10
    # LeNet's classifier (5*5*16 input) requires 32x32 single-channel images.
    x = jax.random.normal(kx, (2, 1, 32, 32), jnp.float32)
    params = init_params(kp, output_dim)
    prepped = prepare_params(params)

    y = jax.block_until_ready(lenet_forward(prepped, x))
    assert y.shape == (2, output_dim) and y.dtype == jnp.float32

    y_ref = lenet_reference(params, x)
    assert jnp.allclose(y, y_ref, rtol=1e-4, atol=1e-4), "mismatch vs JAX reference"

    print("KERNEL_OK")
</pallas_src>

<mosaic_0001>
module attributes {stable_mosaic.version = 11 : i64} {
  func.func @_lenet_kernel(%arg0: memref<2x32x32xf32, #tpu.memory_space<vmem>>, %arg1: memref<5x32x168xf32, #tpu.memory_space<vmem>>, %arg2: memref<1x168xf32, #tpu.memory_space<vmem>>, %arg3: memref<14x28xf32, #tpu.memory_space<vmem>>, %arg4: memref<168x84xf32, #tpu.memory_space<vmem>>, %arg5: memref<5x84x160xf32, #tpu.memory_space<vmem>>, %arg6: memref<1x160xf32, #tpu.memory_space<vmem>>, %arg7: memref<5x10xf32, #tpu.memory_space<vmem>>, %arg8: memref<160x80xf32, #tpu.memory_space<vmem>>, %arg9: memref<5x80x120xf32, #tpu.memory_space<vmem>>, %arg10: memref<1x120xf32, #tpu.memory_space<vmem>>, %arg11: memref<120x84xf32, #tpu.memory_space<vmem>>, %arg12: memref<1x84xf32, #tpu.memory_space<vmem>>, %arg13: memref<84x10xf32, #tpu.memory_space<vmem>>, %arg14: memref<1x10xf32, #tpu.memory_space<vmem>>, %arg15: memref<2x10xf32, #tpu.memory_space<vmem>>, %arg16: memref<2x14x84xf32, #tpu.memory_space<vmem>>, %arg17: memref<2x5x80xf32, #tpu.memory_space<vmem>>) attributes {dimension_semantics = [], scalar_prefetch = 0 : i64, scratch_operands = 2 : i64, tpu.core_type = #tpu.core_type<tc>} {
    %cst = arith.constant 0.000000e+00 : f32
    %0 = vector.broadcast %cst : f32 to vector<28x168xf32>
    %c0 = arith.constant 0 : index
    %c0_0 = arith.constant 0 : index
    %c0_1 = arith.constant 0 : index
    %1 = vector.load %arg0[%c0, %c0_0, %c0_1] : memref<2x32x32xf32, #tpu.memory_space<vmem>>, vector<1x28x32xf32>
    %2 = vector.shape_cast %1 : vector<1x28x32xf32> to vector<28x32xf32>
    %c0_2 = arith.constant 0 : index
    %c0_3 = arith.constant 0 : index
    %c0_4 = arith.constant 0 : index
    %3 = vector.load %arg1[%c0_2, %c0_3, %c0_4] : memref<5x32x168xf32, #tpu.memory_space<vmem>>, vector<1x32x168xf32>
    %4 = vector.shape_cast %3 : vector<1x32x168xf32> to vector<32x168xf32>
    %cst_5 = arith.constant dense<0.000000e+00> : vector<28x168xf32>
    %5 = tpu.matmul %2, %4, %cst_5 {dimension_numbers = #tpu.dot_dimension_numbers<[1], [0], [0], [1], [0, 0, 1, 1], [], []>} : vector<28x32xf32>, vector<32x168xf32>, vector<28x168xf32> -> vector<28x168xf32>
    %6 = arith.addf %0, %5 : vector<28x168xf32>
    %c0_6 = arith.constant 0 : index
    %c1 = arith.constant 1 : index
    %c0_7 = arith.constant 0 : index
    %7 = vector.load %arg0[%c0_6, %c1, %c0_7] : memref<2x32x32xf32, #tpu.memory_space<vmem>>, vector<1x28x32xf32>
    %8 = vector.shape_cast %7 : vector<1x28x32xf32> to vector<28x32xf32>
    %c1_8 = arith.constant 1 : index
    %c0_9 = arith.constant 0 : index
    %c0_10 = arith.constant 0 : index
    %9 = vector.load %arg1[%c1_8, %c0_9, %c0_10] : memref<5x32x168xf32, #tpu.memory_space<vmem>>, vector<1x32x168xf32>
    %10 = vector.shape_cast %9 : vector<1x32x168xf32> to vector<32x168xf32>
    %cst_11 = arith.constant dense<0.000000e+00> : vector<28x168xf32>
    %11 = tpu.matmul %8, %10, %cst_11 {dimension_numbers = #tpu.dot_dimension_numbers<[1], [0], [0], [1], [0, 0, 1, 1], [], []>} : vector<28x32xf32>, vector<32x168xf32>, vector<28x168xf32> -> vector<28x168xf32>
    %12 = arith.addf %6, %11 : vector<28x168xf32>
    %c0_12 = arith.constant 0 : index
    %c2 = arith.constant 2 : index
    %c0_13 = arith.constant 0 : index
    %13 = vector.load %arg0[%c0_12, %c2, %c0_13] : memref<2x32x32xf32, #tpu.memory_space<vmem>>, vector<1x28x32xf32>
    %14 = vector.shape_cast %13 : vector<1x28x32xf32> to vector<28x32xf32>
    %c2_14 = arith.constant 2 : index
    %c0_15 = arith.constant 0 : index
    %c0_16 = arith.constant 0 : index
    %15 = vector.load %arg1[%c2_14, %c0_15, %c0_16] : memref<5x32x168xf32, #tpu.memory_space<vmem>>, vector<1x32x168xf32>
    %16 = vector.shape_cast %15 : vector<1x32x168xf32> to vector<32x168xf32>
    %cst_17 = arith.constant dense<0.000000e+00> : vector<28x168xf32>
    %17 = tpu.matmul %14, %16, %cst_17 {dimension_numbers = #tpu.dot_dimension_numbers<[1], [0], [0], [1], [0, 0, 1, 1], [], []>} : vector<28x32xf32>, vector<32x168xf32>, vector<28x168xf32> -> vector<28x168xf32>
    %18 = arith.addf %12, %17 : vector<28x168xf32>
    %c0_18 = arith.constant 0 : index
    %c3 = arith.constant 3 : index
    %c0_19 = arith.constant 0 : index
    %19 = vector.load %arg0[%c0_18, %c3, %c0_19] : memref<2x32x32xf32, #tpu.memory_space<vmem>>, vector<1x28x32xf32>
    %20 = vector.shape_cast %19 : vector<1x28x32xf32> to vector<28x32xf32>
    %c3_20 = arith.constant 3 : index
    %c0_21 = arith.constant 0 : index
    %c0_22 = arith.constant 0 : index
    %21 = vector.load %arg1[%c3_20, %c0_21, %c0_22] : memref<5x32x168xf32, #tpu.memory_space<vmem>>, vector<1x32x168xf32>
    %22 = vector.shape_cast %21 : vector<1x32x168xf32> to vector<32x168xf32>
    %cst_23 = arith.constant dense<0.000000e+00> : vector<28x168xf32>
    %23 = tpu.matmul %20, %22, %cst_23 {dimension_numbers = #tpu.dot_dimension_numbers<[1], [0], [0], [1], [0, 0, 1, 1], [], []>} : vector<28x32xf32>, vector<32x168xf32>, vector<28x168xf32> -> vector<28x168xf32>
    %24 = arith.addf %18, %23 : vector<28x168xf32>
    %c0_24 = arith.constant 0 : index
    %c4 = arith.constant 4 : index
    %c0_25 = arith.constant 0 : index
    %25 = vector.load %arg0[%c0_24, %c4, %c0_25] : memref<2x32x32xf32, #tpu.memory_space<vmem>>, vector<1x28x32xf32>
    %26 = vector.shape_cast %25 : vector<1x28x32xf32> to vector<28x32xf32>
    %c4_26 = arith.constant 4 : index
    %c0_27 = arith.constant 0 : index
    %c0_28 = arith.constant 0 : index
    %27 = vector.load %arg1[%c4_26, %c0_27, %c0_28] : memref<5x32x168xf32, #tpu.memory_space<vmem>>, vector<1x32x168xf32>
    %28 = vector.shape_cast %27 : vector<1x32x168xf32> to vector<32x168xf32>
    %cst_29 = arith.constant dense<0.000000e+00> : vector<28x168xf32>
    %29 = tpu.matmul %26, %28, %cst_29 {dimension_numbers = #tpu.dot_dimension_numbers<[1], [0], [0], [1], [0, 0, 1, 1], [], []>} : vector<28x32xf32>, vector<32x168xf32>, vector<28x168xf32> -> vector<28x168xf32>
    %30 = arith.addf %24, %29 : vector<28x168xf32>
    %c0_30 = arith.constant 0 : index
    %c0_31 = arith.constant 0 : index
    %31 = vector.load %arg2[%c0_30, %c0_31] : memref<1x168xf32, #tpu.memory_space<vmem>>, vector<1x168xf32>
    %32 = vector.broadcast %31 : vector<1x168xf32> to vector<28x168xf32>
    %33 = arith.addf %30, %32 : vector<28x168xf32>
    %cst_32 = arith.constant 0.000000e+00 : f32
    %34 = vector.broadcast %cst_32 : f32 to vector<28x168xf32>
    %35 = arith.maximumf %33, %34 : vector<28x168xf32>
    %c0_33 = arith.constant 0 : index
    %c0_34 = arith.constant 0 : index
    %36 = vector.load %arg3[%c0_33, %c0_34] : memref<14x28xf32, #tpu.memory_space<vmem>>, vector<14x28xf32>
    %cst_35 = arith.constant dense<0.000000e+00> : vector<14x168xf32>
    %37 = tpu.matmul %36, %35, %cst_35 {dimension_numbers = #tpu.dot_dimension_numbers<[1], [0], [0], [1], [0, 0, 1, 1], [], []>} : vector<14x28xf32>, vector<28x168xf32>, vector<14x168xf32> -> vector<14x168xf32>
    %c0_36 = arith.constant 0 : index
    %c0_37 = arith.constant 0 : index
    %38 = vector.load %arg4[%c0_36, %c0_37] : memref<168x84xf32, #tpu.memory_space<vmem>>, vector<168x84xf32>
    %cst_38 = arith.constant dense<0.000000e+00> : vector<14x84xf32>
    %39 = tpu.matmul %37, %38, %cst_38 {dimension_numbers = #tpu.dot_dimension_numbers<[1], [0], [0], [1], [0, 0, 1, 1], [], []>} : vector<14x168xf32>, vector<168x84xf32>, vector<14x84xf32> -> vector<14x84xf32>
    %c0_39 = arith.constant 0 : index
    %c0_40 = arith.constant 0 : index
    %c0_41 = arith.constant 0 : index
    %40 = vector.load %arg16[%c0_39, %c0_40, %c0_41] : memref<2x14x84xf32, #tpu.memory_space<vmem>>, vector<1x14x84xf32>
    %41 = vector.shape_cast %40 : vector<1x14x84xf32> to vector<14x84xf32>
    %42 = vector.shape_cast %39 : vector<14x84xf32> to vector<1x14x84xf32>
    tpu.vector_store %arg16[%c0_39, %c0_40, %c0_41], %42 {strides = array<i32>} : memref<2x14x84xf32, #tpu.memory_space<vmem>>, vector<1x14x84xf32>,
    %cst_42 = arith.constant 0.000000e+00 : f32
    %43 = vector.broadcast %cst_42 : f32 to vector<10x160xf32>
    %c0_43 = arith.constant 0 : index
    %c0_44 = arith.constant 0 : index
    %c0_45 = arith.constant 0 : index
    %44 = vector.load %arg16[%c0_43, %c0_44, %c0_45] : memref<2x14x84xf32, #tpu.memory_space<vmem>>, vector<1x10x84xf32>
    %45 = vector.shape_cast %44 : vector<1x10x84xf32> to vector<10x84xf32>
    %c0_46 = arith.constant 0 : index
    %c0_47 = arith.constant 0 : index
    %c0_48 = arith.constant 0 : index
    %46 = vector.load %arg5[%c0_46, %c0_47, %c0_48] : memref<5x84x160xf32, #tpu.memory_space<vmem>>, vector<1x84x160xf32>
    %47 = vector.shape_cast %46 : vector<1x84x160xf32> to vector<84x160xf32>
    %cst_49 = arith.constant dense<0.000000e+00> : vector<10x160xf32>
    %48 = tpu.matmul %45, %47, %cst_49 {dimension_numbers = #tpu.dot_dimension_numbers<[1], [0], [0], [1], [0, 0, 1, 1], [], []>} : vector<10x84xf32>, vector<84x160xf32>, vector<10x160xf32> -> vector<10x160xf32>
    %49 = arith.addf %43, %48 : vector<10x160xf32>
    %c0_50 = arith.constant 0 : index
    %c1_51 = arith.constant 1 : index
    %c0_52 = arith.constant 0 : index
    %50 = vector.load %arg16[%c0_50, %c1_51, %c0_52] : memref<2x14x84xf32, #tpu.memory_space<vmem>>, vector<1x10x84xf32>
    %51 = vector.shape_cast %50 : vector<1x10x84xf32> to vector<10x84xf32>
    %c1_53 = arith.constant 1 : index
    %c0_54 = arith.constant 0 : index
    %c0_55 = arith.constant 0 : index
    %52 = vector.load %arg5[%c1_53, %c0_54, %c0_55] : memref<5x84x160xf32, #tpu.memory_space<vmem>>, vector<1x84x160xf32>
    %53 = vector.shape_cast %52 : vector<1x84x160xf32> to vector<84x160xf32>
    %cst_56 = arith.constant dense<0.000000e+00> : vector<10x160xf32>
    %54 = tpu.matmul %51, %53, %cst_56 {dimension_numbers = #tpu.dot_dimension_numbers<[1], [0], [0], [1], [0, 0, 1, 1], [], []>} : vector<10x84xf32>, vector<84x160xf32>, vector<10x160xf32> -> vector<10x160xf32>
    %55 = arith.addf %49, %54 : vector<10x160xf32>
    %c0_57 = arith.constant 0 : index
    %c2_58 = arith.constant 2 : index
    %c0_59 = arith.constant 0 : index
    %56 = vector.load %arg16[%c0_57, %c2_58, %c0_59] : memref<2x14x84xf32, #tpu.memory_space<vmem>>, vector<1x10x84xf32>
    %57 = vector.shape_cast %56 : vector<1x10x84xf32> to vector<10x84xf32>
    %c2_60 = arith.constant 2 : index
    %c0_61 = arith.constant 0 : index
    %c0_62 = arith.constant 0 : index
    %58 = vector.load %arg5[%c2_60, %c0_61, %c0_62] : memref<5x84x160xf32, #tpu.memory_space<vmem>>, vector<1x84x160xf32>
    %59 = vector.shape_cast %58 : vector<1x84x160xf32> to vector<84x160xf32>
    %cst_63 = arith.constant dense<0.000000e+00> : vector<10x160xf32>
    %60 = tpu.matmul %57, %59, %cst_63 {dimension_numbers = #tpu.dot_dimension_numbers<[1], [0], [0], [1], [0, 0, 1, 1], [], []>} : vector<10x84xf32>, vector<84x160xf32>, vector<10x160xf32> -> vector<10x160xf32>
    %61 = arith.addf %55, %60 : vector<10x160xf32>
    %c0_64 = arith.constant 0 : index
    %c3_65 = arith.constant 3 : index
    %c0_66 = arith.constant 0 : index
    %62 = vector.load %arg16[%c0_64, %c3_65, %c0_66] : memref<2x14x84xf32, #tpu.memory_space<vmem>>, vector<1x10x84xf32>
    %63 = vector.shape_cast %62 : vector<1x10x84xf32> to vector<10x84xf32>
    %c3_67 = arith.constant 3 : index
    %c0_68 = arith.constant 0 : index
    %c0_69 = arith.constant 0 : index
    %64 = vector.load %arg5[%c3_67, %c0_68, %c0_69] : memref<5x84x160xf32, #tpu.memory_space<vmem>>, vector<1x84x160xf32>
    %65 = vector.shape_cast %64 : vector<1x84x160xf32> to vector<84x160xf32>
    %cst_70 = arith.constant dense<0.000000e+00> : vector<10x160xf32>
    %66 = tpu.matmul %63, %65, %cst_70 {dimension_numbers = #tpu.dot_dimension_numbers<[1], [0], [0], [1], [0, 0, 1, 1], [], []>} : vector<10x84xf32>, vector<84x160xf32>, vector<10x160xf32> -> vector<10x160xf32>
    %67 = arith.addf %61, %66 : vector<10x160xf32>
    %c0_71 = arith.constant 0 : index
    %c4_72 = arith.constant 4 : index
    %c0_73 = arith.constant 0 : index
    %68 = vector.load %arg16[%c0_71, %c4_72, %c0_73] : memref<2x14x84xf32, #tpu.memory_space<vmem>>, vector<1x10x84xf32>
    %69 = vector.shape_cast %68 : vector<1x10x84xf32> to vector<10x84xf32>
    %c4_74 = arith.constant 4 : index
    %c0_75 = arith.constant 0 : index
    %c0_76 = arith.constant 0 : index
    %70 = vector.load %arg5[%c4_74, %c0_75, %c0_76] : memref<5x84x160xf32, #tpu.memory_space<vmem>>, vector<1x84x160xf32>
    %71 = vector.shape_cast %70 : vector<1x84x160xf32> to vector<84x160xf32>
    %cst_77 = arith.constant dense<0.000000e+00> : vector<10x160xf32>
    %72 = tpu.matmul %69, %71, %cst_77 {dimension_numbers = #tpu.dot_dimension_numbers<[1], [0], [0], [1], [0, 0, 1, 1], [], []>} : vector<10x84xf32>, vector<84x160xf32>, vector<10x160xf32> -> vector<10x160xf32>
    %73 = arith.addf %67, %72 : vector<10x160xf32>
    %c0_78 = arith.constant 0 : index
    %c0_79 = arith.constant 0 : index
    %74 = vector.load %arg6[%c0_78, %c0_79] : memref<1x160xf32, #tpu.memory_space<vmem>>, vector<1x160xf32>
    %75 = vector.broadcast %74 : vector<1x160xf32> to vector<10x160xf32>
    %76 = arith.addf %73, %75 : vector<10x160xf32>
    %cst_80 = arith.constant 0.000000e+00 : f32
    %77 = vector.broadcast %cst_80 : f32 to vector<10x160xf32>
    %78 = arith.maximumf %76, %77 : vector<10x160xf32>
    %c0_81 = arith.constant 0 : index
    %c0_82 = arith.constant 0 : index
    %79 = vector.load %arg7[%c0_81, %c0_82] : memref<5x10xf32, #tpu.memory_space<vmem>>, vector<5x10xf32>
    %cst_83 = arith.constant dense<0.000000e+00> : vector<5x160xf32>
    %80 = tpu.matmul %79, %78, %cst_83 {dimension_numbers = #tpu.dot_dimension_numbers<[1], [0], [0], [1], [0, 0, 1, 1], [], []>} : vector<5x10xf32>, vector<10x160xf32>, vector<5x160xf32> -> vector<5x160xf32>
    %c0_84 = arith.constant 0 : index
    %c0_85 = arith.constant 0 : index
    %81 = vector.load %arg8[%c0_84, %c0_85] : memref<160x80xf32, #tpu.memory_space<vmem>>, vector<160x80xf32>
    %cst_86 = arith.constant dense<0.000000e+00> : vector<5x80xf32>
    %82 = tpu.matmul %80, %81, %cst_86 {dimension_numbers = #tpu.dot_dimension_numbers<[1], [0], [0], [1], [0, 0, 1, 1], [], []>} : vector<5x160xf32>, vector<160x80xf32>, vector<5x80xf32> -> vector<5x80xf32>
    %c0_87 = arith.constant 0 : index
    %c0_88 = arith.constant 0 : index
    %c0_89 = arith.constant 0 : index
    %83 = vector.load %arg17[%c0_87, %c0_88, %c0_89] : memref<2x5x80xf32, #tpu.memory_space<vmem>>, vector<1x5x80xf32>
    %84 = vector.shape_cast %83 : vector<1x5x80xf32> to vector<5x80xf32>
    %85 = vector.shape_cast %82 : vector<5x80xf32> to vector<1x5x80xf32>
    tpu.vector_store %arg17[%c0_87, %c0_88, %c0_89], %85 {strides = array<i32>} : memref<2x5x80xf32, #tpu.memory_space<vmem>>, vector<1x5x80xf32>,
    %c0_90 = arith.constant 0 : index
    %c0_91 = arith.constant 0 : index
    %86 = vector.load %arg10[%c0_90, %c0_91] : memref<1x120xf32, #tpu.memory_space<vmem>>, vector<1x120xf32>
    %c0_92 = arith.constant 0 : index
    %c0_93 = arith.constant 0 : index
    %c0_94 = arith.constant 0 : index
    %87 = vector.load %arg17[%c0_92, %c0_93, %c0_94] : memref<2x5x80xf32, #tpu.memory_space<vmem>>, vector<1x1x80xf32>
    %88 = vector.shape_cast %87 : vector<1x1x80xf32> to vector<1x80xf32>
    %c0_95 = arith.constant 0 : index
    %c0_96 = arith.constant 0 : index
    %c0_97 = arith.constant 0 : index
    %89 = vector.load %arg9[%c0_95, %c0_96, %c0_97] : memref<5x80x120xf32, #tpu.memory_space<vmem>>, vector<1x80x120xf32>
    %90 = vector.shape_cast %89 : vector<1x80x120xf32> to vector<80x120xf32>
    %cst_98 = arith.constant dense<0.000000e+00> : vector<1x120xf32>
    %91 = tpu.matmul %88, %90, %cst_98 {dimension_numbers = #tpu.dot_dimension_numbers<[1], [0], [0], [1], [0, 0, 1, 1], [], []>} : vector<1x80xf32>, vector<80x120xf32>, vector<1x120xf32> -> vector<1x120xf32>
    %92 = arith.addf %86, %91 : vector<1x120xf32>
    %c0_99 = arith.constant 0 : index
    %c1_100 = arith.constant 1 : index
    %c0_101 = arith.constant 0 : index
    %93 = vector.load %arg17[%c0_99, %c1_100, %c0_101] : memref<2x5x80xf32, #tpu.memory_space<vmem>>, vector<1x1x80xf32>
    %94 = vector.shape_cast %93 : vector<1x1x80xf32> to vector<1x80xf32>
    %c1_102 = arith.constant 1 : index
    %c0_103 = arith.constant 0 : index
    %c0_104 = arith.constant 0 : index
    %95 = vector.load %arg9[%c1_102, %c0_103, %c0_104] : memref<5x80x120xf32, #tpu.memory_space<vmem>>, vector<1x80x120xf32>
    %96 = vector.shape_cast %95 : vector<1x80x120xf32> to vector<80x120xf32>
    %cst_105 = arith.constant dense<0.000000e+00> : vector<1x120xf32>
    %97 = tpu.matmul %94, %96, %cst_105 {dimension_numbers = #tpu.dot_dimension_numbers<[1], [0], [0], [1], [0, 0, 1, 1], [], []>} : vector<1x80xf32>, vector<80x120xf32>, vector<1x120xf32> -> vector<1x120xf32>
    %98 = arith.addf %92, %97 : vector<1x120xf32>
    %c0_106 = arith.constant 0 : index
    %c2_107 = arith.constant 2 : index
    %c0_108 = arith.constant 0 : index
    %99 = vector.load %arg17[%c0_106, %c2_107, %c0_108] : memref<2x5x80xf32, #tpu.memory_space<vmem>>, vector<1x1x80xf32>
    %100 = vector.shape_cast %99 : vector<1x1x80xf32> to vector<1x80xf32>
    %c2_109 = arith.constant 2 : index
    %c0_110 = arith.constant 0 : index
    %c0_111 = arith.constant 0 : index
    %101 = vector.load %arg9[%c2_109, %c0_110, %c0_111] : memref<5x80x120xf32, #tpu.memory_space<vmem>>, vector<1x80x120xf32>
    %102 = vector.shape_cast %101 : vector<1x80x120xf32> to vector<80x120xf32>
    %cst_112 = arith.constant dense<0.000000e+00> : vector<1x120xf32>
    %103 = tpu.matmul %100, %102, %cst_112 {dimension_numbers = #tpu.dot_dimension_numbers<[1], [0], [0], [1], [0, 0, 1, 1], [], []>} : vector<1x80xf32>, vector<80x120xf32>, vector<1x120xf32> -> vector<1x120xf32>
    %104 = arith.addf %98, %103 : vector<1x120xf32>
    %c0_113 = arith.constant 0 : index
    %c3_114 = arith.constant 3 : index
    %c0_115 = arith.constant 0 : index
    %105 = vector.load %arg17[%c0_113, %c3_114, %c0_115] : memref<2x5x80xf32, #tpu.memory_space<vmem>>, vector<1x1x80xf32>
    %106 = vector.shape_cast %105 : vector<1x1x80xf32> to vector<1x80xf32>
    %c3_116 = arith.constant 3 : index
    %c0_117 = arith.constant 0 : index
    %c0_118 = arith.constant 0 : index
    %107 = vector.load %arg9[%c3_116, %c0_117, %c0_118] : memref<5x80x120xf32, #tpu.memory_space<vmem>>, vector<1x80x120xf32>
    %108 = vector.shape_cast %107 : vector<1x80x120xf32> to vector<80x120xf32>
    %cst_119 = arith.constant dense<0.000000e+00> : vector<1x120xf32>
    %109 = tpu.matmul %106, %108, %cst_119 {dimension_numbers = #tpu.dot_dimension_numbers<[1], [0], [0], [1], [0, 0, 1, 1], [], []>} : vector<1x80xf32>, vector<80x120xf32>, vector<1x120xf32> -> vector<1x120xf32>
    %110 = arith.addf %104, %109 : vector<1x120xf32>
    %c0_120 = arith.constant 0 : index
    %c4_121 = arith.constant 4 : index
    %c0_122 = arith.constant 0 : index
    %111 = vector.load %arg17[%c0_120, %c4_121, %c0_122] : memref<2x5x80xf32, #tpu.memory_space<vmem>>, vector<1x1x80xf32>
    %112 = vector.shape_cast %111 : vector<1x1x80xf32> to vector<1x80xf32>
    %c4_123 = arith.constant 4 : index
    %c0_124 = arith.constant 0 : index
    %c0_125 = arith.constant 0 : index
    %113 = vector.load %arg9[%c4_123, %c0_124, %c0_125] : memref<5x80x120xf32, #tpu.memory_space<vmem>>, vector<1x80x120xf32>
    %114 = vector.shape_cast %113 : vector<1x80x120xf32> to vector<80x120xf32>
    %cst_126 = arith.constant dense<0.000000e+00> : vector<1x120xf32>
    %115 = tpu.matmul %112, %114, %cst_126 {dimension_numbers = #tpu.dot_dimension_numbers<[1], [0], [0], [1], [0, 0, 1, 1], [], []>} : vector<1x80xf32>, vector<80x120xf32>, vector<1x120xf32> -> vector<1x120xf32>
    %116 = arith.addf %110, %115 : vector<1x120xf32>
    %cst_127 = arith.constant 0.000000e+00 : f32
    %117 = vector.broadcast %cst_127 : f32 to vector<1x120xf32>
    %118 = arith.maximumf %116, %117 : vector<1x120xf32>
    %c0_128 = arith.constant 0 : index
    %c0_129 = arith.constant 0 : index
    %119 = vector.load %arg11[%c0_128, %c0_129] : memref<120x84xf32, #tpu.memory_space<vmem>>, vector<120x84xf32>
    %cst_130 = arith.constant dense<0.000000e+00> : vector<1x84xf32>
    %120 = tpu.matmul %118, %119, %cst_130 {dimension_numbers = #tpu.dot_dimension_numbers<[1], [0], [0], [1], [0, 0, 1, 1], [], []>} : vector<1x120xf32>, vector<120x84xf32>, vector<1x84xf32> -> vector<1x84xf32>
    %c0_131 = arith.constant 0 : index
    %c0_132 = arith.constant 0 : index
    %121 = vector.load %arg12[%c0_131, %c0_132] : memref<1x84xf32, #tpu.memory_space<vmem>>, vector<1x84xf32>
    %122 = arith.addf %120, %121 : vector<1x84xf32>
    %cst_133 = arith.constant 0.000000e+00 : f32
    %123 = vector.broadcast %cst_133 : f32 to vector<1x84xf32>
    %124 = arith.maximumf %122, %123 : vector<1x84xf32>
    %c0_134 = arith.constant 0 : index
    %c0_135 = arith.constant 0 : index
    %125 = vector.load %arg13[%c0_134, %c0_135] : memref<84x10xf32, #tpu.memory_space<vmem>>, vector<84x10xf32>
    %cst_136 = arith.constant dense<0.000000e+00> : vector<1x10xf32>
    %126 = tpu.matmul %124, %125, %cst_136 {dimension_numbers = #tpu.dot_dimension_numbers<[1], [0], [0], [1], [0, 0, 1, 1], [], []>} : vector<1x84xf32>, vector<84x10xf32>, vector<1x10xf32> -> vector<1x10xf32>
    %c0_137 = arith.constant 0 : index
    %c0_138 = arith.constant 0 : index
    %127 = vector.load %arg14[%c0_137, %c0_138] : memref<1x10xf32, #tpu.memory_space<vmem>>, vector<1x10xf32>
    %128 = arith.addf %126, %127 : vector<1x10xf32>
    %c0_139 = arith.constant 0 : index
    %c0_140 = arith.constant 0 : index
    %129 = vector.load %arg15[%c0_139, %c0_140] : memref<2x10xf32, #tpu.memory_space<vmem>>, vector<1x10xf32>
    tpu.vector_store %arg15[%c0_139, %c0_140], %128 {strides = array<i32>} : memref<2x10xf32, #tpu.memory_space<vmem>>, vector<1x10xf32>,
    %cst_141 = arith.constant 0.000000e+00 : f32
    %130 = vector.broadcast %cst_141 : f32 to vector<28x168xf32>
    %c1_142 = arith.constant 1 : index
    %c0_143 = arith.constant 0 : index
    %c0_144 = arith.constant 0 : index
    %131 = vector.load %arg0[%c1_142, %c0_143, %c0_144] : memref<2x32x32xf32, #tpu.memory_space<vmem>>, vector<1x28x32xf32>
    %132 = vector.shape_cast %131 : vector<1x28x32xf32> to vector<28x32xf32>
    %c0_145 = arith.constant 0 : index
    %c0_146 = arith.constant 0 : index
    %c0_147 = arith.constant 0 : index
    %133 = vector.load %arg1[%c0_145, %c0_146, %c0_147] : memref<5x32x168xf32, #tpu.memory_space<vmem>>, vector<1x32x168xf32>
    %134 = vector.shape_cast %133 : vector<1x32x168xf32> to vector<32x168xf32>
    %cst_148 = arith.constant dense<0.000000e+00> : vector<28x168xf32>
    %135 = tpu.matmul %132, %134, %cst_148 {dimension_numbers = #tpu.dot_dimension_numbers<[1], [0], [0], [1], [0, 0, 1, 1], [], []>} : vector<28x32xf32>, vector<32x168xf32>, vector<28x168xf32> -> vector<28x168xf32>
    %136 = arith.addf %130, %135 : vector<28x168xf32>
    %c1_149 = arith.constant 1 : index
    %c1_150 = arith.constant 1 : index
    %c0_151 = arith.constant 0 : index
    %137 = vector.load %arg0[%c1_149, %c1_150, %c0_151] : memref<2x32x32xf32, #tpu.memory_space<vmem>>, vector<1x28x32xf32>
    %138 = vector.shape_cast %137 : vector<1x28x32xf32> to vector<28x32xf32>
    %c1_152 = arith.constant 1 : index
    %c0_153 = arith.constant 0 : index
    %c0_154 = arith.constant 0 : index
    %139 = vector.load %arg1[%c1_152, %c0_153, %c0_154] : memref<5x32x168xf32, #tpu.memory_space<vmem>>, vector<1x32x168xf32>
    %140 = vector.shape_cast %139 : vector<1x32x168xf32> to vector<32x168xf32>
    %cst_155 = arith.constant dense<0.000000e+00> : vector<28x168xf32>
    %141 = tpu.matmul %138, %140, %cst_155 {dimension_numbers = #tpu.dot_dimension_numbers<[1], [0], [0], [1], [0, 0, 1, 1], [], []>} : vector<28x32xf32>, vector<32x168xf32>, vector<28x168xf32> -> vector<28x168xf32>
    %142 = arith.addf %136, %141 : vector<28x168xf32>
    %c1_156 = arith.constant 1 : index
    %c2_157 = arith.constant 2 : index
    %c0_158 = arith.constant 0 : index
    %143 = vector.load %arg0[%c1_156, %c2_157, %c0_158] : memref<2x32x32xf32, #tpu.memory_space<vmem>>, vector<1x28x32xf32>
    %144 = vector.shape_cast %143 : vector<1x28x32xf32> to vector<28x32xf32>
    %c2_159 = arith.constant 2 : index
    %c0_160 = arith.constant 0 : index
    %c0_161 = arith.constant 0 : index
    %145 = vector.load %arg1[%c2_159, %c0_160, %c0_161] : memref<5x32x168xf32, #tpu.memory_space<vmem>>, vector<1x32x168xf32>
    %146 = vector.shape_cast %145 : vector<1x32x168xf32> to vector<32x168xf32>
    %cst_162 = arith.constant dense<0.000000e+00> : vector<28x168xf32>
    %147 = tpu.matmul %144, %146, %cst_162 {dimension_numbers = #tpu.dot_dimension_numbers<[1], [0], [0], [1], [0, 0, 1, 1], [], []>} : vector<28x32xf32>, vector<32x168xf32>, vector<28x168xf32> -> vector<28x168xf32>
    %148 = arith.addf %142, %147 : vector<28x168xf32>
    %c1_163 = arith.constant 1 : index
    %c3_164 = arith.constant 3 : index
    %c0_165 = arith.constant 0 : index
    %149 = vector.load %arg0[%c1_163, %c3_164, %c0_165] : memref<2x32x32xf32, #tpu.memory_space<vmem>>, vector<1x28x32xf32>
    %150 = vector.shape_cast %149 : vector<1x28x32xf32> to vector<28x32xf32>
    %c3_166 = arith.constant 3 : index
    %c0_167 = arith.constant 0 : index
    %c0_168 = arith.constant 0 : index
    %151 = vector.load %arg1[%c3_166, %c0_167, %c0_168] : memref<5x32x168xf32, #tpu.memory_space<vmem>>, vector<1x32x168xf32>
    %152 = vector.shape_cast %151 : vector<1x32x168xf32> to vector<32x168xf32>
    %cst_169 = arith.constant dense<0.000000e+00> : vector<28x168xf32>
    %153 = tpu.matmul %150, %152, %cst_169 {dimension_numbers = #tpu.dot_dimension_numbers<[1], [0], [0], [1], [0, 0, 1, 1], [], []>} : vector<28x32xf32>, vector<32x168xf32>, vector<28x168xf32> -> vector<28x168xf32>
    %154 = arith.addf %148, %153 : vector<28x168xf32>
    %c1_170 = arith.constant 1 : index
    %c4_171 = arith.constant 4 : index
    %c0_172 = arith.constant 0 : index
    %155 = vector.load %arg0[%c1_170, %c4_171, %c0_172] : memref<2x32x32xf32, #tpu.memory_space<vmem>>, vector<1x28x32xf32>
    %156 = vector.shape_cast %155 : vector<1x28x32xf32> to vector<28x32xf32>
    %c4_173 = arith.constant 4 : index
    %c0_174 = arith.constant 0 : index
    %c0_175 = arith.constant 0 : index
    %157 = vector.load %arg1[%c4_173, %c0_174, %c0_175] : memref<5x32x168xf32, #tpu.memory_space<vmem>>, vector<1x32x168xf32>
    %158 = vector.shape_cast %157 : vector<1x32x168xf32> to vector<32x168xf32>
    %cst_176 = arith.constant dense<0.000000e+00> : vector<28x168xf32>
    %159 = tpu.matmul %156, %158, %cst_176 {dimension_numbers = #tpu.dot_dimension_numbers<[1], [0], [0], [1], [0, 0, 1, 1], [], []>} : vector<28x32xf32>, vector<32x168xf32>, vector<28x168xf32> -> vector<28x168xf32>
    %160 = arith.addf %154, %159 : vector<28x168xf32>
    %c0_177 = arith.constant 0 : index
    %c0_178 = arith.constant 0 : index
    %161 = vector.load %arg2[%c0_177, %c0_178] : memref<1x168xf32, #tpu.memory_space<vmem>>, vector<1x168xf32>
    %162 = vector.broadcast %161 : vector<1x168xf32> to vector<28x168xf32>
    %163 = arith.addf %160, %162 : vector<28x168xf32>
    %cst_179 = arith.constant 0.000000e+00 : f32
    %164 = vector.broadcast %cst_179 : f32 to vector<28x168xf32>
    %165 = arith.maximumf %163, %164 : vector<28x168xf32>
    %c0_180 = arith.constant 0 : index
    %c0_181 = arith.constant 0 : index
    %166 = vector.load %arg3[%c0_180, %c0_181] : memref<14x28xf32, #tpu.memory_space<vmem>>, vector<14x28xf32>
    %cst_182 = arith.constant dense<0.000000e+00> : vector<14x168xf32>
    %167 = tpu.matmul %166, %165, %cst_182 {dimension_numbers = #tpu.dot_dimension_numbers<[1], [0], [0], [1], [0, 0, 1, 1], [], []>} : vector<14x28xf32>, vector<28x168xf32>, vector<14x168xf32> -> vector<14x168xf32>
    %c0_183 = arith.constant 0 : index
    %c0_184 = arith.constant 0 : index
    %168 = vector.load %arg4[%c0_183, %c0_184] : memref<168x84xf32, #tpu.memory_space<vmem>>, vector<168x84xf32>
    %cst_185 = arith.constant dense<0.000000e+00> : vector<14x84xf32>
    %169 = tpu.matmul %167, %168, %cst_185 {dimension_numbers = #tpu.dot_dimension_numbers<[1], [0], [0], [1], [0, 0, 1, 1], [], []>} : vector<14x168xf32>, vector<168x84xf32>, vector<14x84xf32> -> vector<14x84xf32>
    %c1_186 = arith.constant 1 : index
    %c0_187 = arith.constant 0 : index
    %c0_188 = arith.constant 0 : index
    %170 = vector.load %arg16[%c1_186, %c0_187, %c0_188] : memref<2x14x84xf32, #tpu.memory_space<vmem>>, vector<1x14x84xf32>
    %171 = vector.shape_cast %170 : vector<1x14x84xf32> to vector<14x84xf32>
    %172 = vector.shape_cast %169 : vector<14x84xf32> to vector<1x14x84xf32>
    tpu.vector_store %arg16[%c1_186, %c0_187, %c0_188], %172 {strides = array<i32>} : memref<2x14x84xf32, #tpu.memory_space<vmem>>, vector<1x14x84xf32>,
    %cst_189 = arith.constant 0.000000e+00 : f32
    %173 = vector.broadcast %cst_189 : f32 to vector<10x160xf32>
    %c1_190 = arith.constant 1 : index
    %c0_191 = arith.constant 0 : index
    %c0_192 = arith.constant 0 : index
    %174 = vector.load %arg16[%c1_190, %c0_191, %c0_192] : memref<2x14x84xf32, #tpu.memory_space<vmem>>, vector<1x10x84xf32>
    %175 = vector.shape_cast %174 : vector<1x10x84xf32> to vector<10x84xf32>
    %c0_193 = arith.constant 0 : index
    %c0_194 = arith.constant 0 : index
    %c0_195 = arith.constant 0 : index
    %176 = vector.load %arg5[%c0_193, %c0_194, %c0_195] : memref<5x84x160xf32, #tpu.memory_space<vmem>>, vector<1x84x160xf32>
    %177 = vector.shape_cast %176 : vector<1x84x160xf32> to vector<84x160xf32>
    %cst_196 = arith.constant dense<0.000000e+00> : vector<10x160xf32>
    %178 = tpu.matmul %175, %177, %cst_196 {dimension_numbers = #tpu.dot_dimension_numbers<[1], [0], [0], [1], [0, 0, 1, 1], [], []>} : vector<10x84xf32>, vector<84x160xf32>, vector<10x160xf32> -> vector<10x160xf32>
    %179 = arith.addf %173, %178 : vector<10x160xf32>
    %c1_197 = arith.constant 1 : index
    %c1_198 = arith.constant 1 : index
    %c0_199 = arith.constant 0 : index
    %180 = vector.load %arg16[%c1_197, %c1_198, %c0_199] : memref<2x14x84xf32, #tpu.memory_space<vmem>>, vector<1x10x84xf32>
    %181 = vector.shape_cast %180 : vector<1x10x84xf32> to vector<10x84xf32>
    %c1_200 = arith.constant 1 : index
    %c0_201 = arith.constant 0 : index
    %c0_202 = arith.constant 0 : index
    %182 = vector.load %arg5[%c1_200, %c0_201, %c0_202] : memref<5x84x160xf32, #tpu.memory_space<vmem>>, vector<1x84x160xf32>
    %183 = vector.shape_cast %182 : vector<1x84x160xf32> to vector<84x160xf32>
    %cst_203 = arith.constant dense<0.000000e+00> : vector<10x160xf32>
    %184 = tpu.matmul %181, %183, %cst_203 {dimension_numbers = #tpu.dot_dimension_numbers<[1], [0], [0], [1], [0, 0, 1, 1], [], []>} : vector<10x84xf32>, vector<84x160xf32>, vector<10x160xf32> -> vector<10x160xf32>
    %185 = arith.addf %179, %184 : vector<10x160xf32>
    %c1_204 = arith.constant 1 : index
    %c2_205 = arith.constant 2 : index
    %c0_206 = arith.constant 0 : index
    %186 = vector.load %arg16[%c1_204, %c2_205, %c0_206] : memref<2x14x84xf32, #tpu.memory_space<vmem>>, vector<1x10x84xf32>
    %187 = vector.shape_cast %186 : vector<1x10x84xf32> to vector<10x84xf32>
    %c2_207 = arith.constant 2 : index
    %c0_208 = arith.constant 0 : index
    %c0_209 = arith.constant 0 : index
    %188 = vector.load %arg5[%c2_207, %c0_208, %c0_209] : memref<5x84x160xf32, #tpu.memory_space<vmem>>, vector<1x84x160xf32>
    %189 = vector.shape_cast %188 : vector<1x84x160xf32> to vector<84x160xf32>
    %cst_210 = arith.constant dense<0.000000e+00> : vector<10x160xf32>
    %190 = tpu.matmul %187, %189, %cst_210 {dimension_numbers = #tpu.dot_dimension_numbers<[1], [0], [0], [1], [0, 0, 1, 1], [], []>} : vector<10x84xf32>, vector<84x160xf32>, vector<10x160xf32> -> vector<10x160xf32>
    %191 = arith.addf %185, %190 : vector<10x160xf32>
    %c1_211 = arith.constant 1 : index
    %c3_212 = arith.constant 3 : index
    %c0_213 = arith.constant 0 : index
    %192 = vector.load %arg16[%c1_211, %c3_212, %c0_213] : memref<2x14x84xf32, #tpu.memory_space<vmem>>, vector<1x10x84xf32>
    %193 = vector.shape_cast %192 : vector<1x10x84xf32> to vector<10x84xf32>
    %c3_214 = arith.constant 3 : index
    %c0_215 = arith.constant 0 : index
    %c0_216 = arith.constant 0 : index
    %194 = vector.load %arg5[%c3_214, %c0_215, %c0_216] : memref<5x84x160xf32, #tpu.memory_space<vmem>>, vector<1x84x160xf32>
    %195 = vector.shape_cast %194 : vector<1x84x160xf32> to vector<84x160xf32>
    %cst_217 = arith.constant dense<0.000000e+00> : vector<10x160xf32>
    %196 = tpu.matmul %193, %195, %cst_217 {dimension_numbers = #tpu.dot_dimension_numbers<[1], [0], [0], [1], [0, 0, 1, 1], [], []>} : vector<10x84xf32>, vector<84x160xf32>, vector<10x160xf32> -> vector<10x160xf32>
    %197 = arith.addf %191, %196 : vector<10x160xf32>
    %c1_218 = arith.constant 1 : index
    %c4_219 = arith.constant 4 : index
    %c0_220 = arith.constant 0 : index
    %198 = vector.load %arg16[%c1_218, %c4_219, %c0_220] : memref<2x14x84xf32, #tpu.memory_space<vmem>>, vector<1x10x84xf32>
    %199 = vector.shape_cast %198 : vector<1x10x84xf32> to vector<10x84xf32>
    %c4_221 = arith.constant 4 : index
    %c0_222 = arith.constant 0 : index
    %c0_223 = arith.constant 0 : index
    %200 = vector.load %arg5[%c4_221, %c0_222, %c0_223] : memref<5x84x160xf32, #tpu.memory_space<vmem>>, vector<1x84x160xf32>
    %201 = vector.shape_cast %200 : vector<1x84x160xf32> to vector<84x160xf32>
    %cst_224 = arith.constant dense<0.000000e+00> : vector<10x160xf32>
    %202 = tpu.matmul %199, %201, %cst_224 {dimension_numbers = #tpu.dot_dimension_numbers<[1], [0], [0], [1], [0, 0, 1, 1], [], []>} : vector<10x84xf32>, vector<84x160xf32>, vector<10x160xf32> -> vector<10x160xf32>
    %203 = arith.addf %197, %202 : vector<10x160xf32>
    %c0_225 = arith.constant 0 : index
    %c0_226 = arith.constant 0 : index
    %204 = vector.load %arg6[%c0_225, %c0_226] : memref<1x160xf32, #tpu.memory_space<vmem>>, vector<1x160xf32>
    %205 = vector.broadcast %204 : vector<1x160xf32> to vector<10x160xf32>
    %206 = arith.addf %203, %205 : vector<10x160xf32>
    %cst_227 = arith.constant 0.000000e+00 : f32
    %207 = vector.broadcast %cst_227 : f32 to vector<10x160xf32>
    %208 = arith.maximumf %206, %207 : vector<10x160xf32>
    %c0_228 = arith.constant 0 : index
    %c0_229 = arith.constant 0 : index
    %209 = vector.load %arg7[%c0_228, %c0_229] : memref<5x10xf32, #tpu.memory_space<vmem>>, vector<5x10xf32>
    %cst_230 = arith.constant dense<0.000000e+00> : vector<5x160xf32>
    %210 = tpu.matmul %209, %208, %cst_230 {dimension_numbers = #tpu.dot_dimension_numbers<[1], [0], [0], [1], [0, 0, 1, 1], [], []>} : vector<5x10xf32>, vector<10x160xf32>, vector<5x160xf32> -> vector<5x160xf32>
    %c0_231 = arith.constant 0 : index
    %c0_232 = arith.constant 0 : index
    %211 = vector.load %arg8[%c0_231, %c0_232] : memref<160x80xf32, #tpu.memory_space<vmem>>, vector<160x80xf32>
    %cst_233 = arith.constant dense<0.000000e+00> : vector<5x80xf32>
    %212 = tpu.matmul %210, %211, %cst_233 {dimension_numbers = #tpu.dot_dimension_numbers<[1], [0], [0], [1], [0, 0, 1, 1], [], []>} : vector<5x160xf32>, vector<160x80xf32>, vector<5x80xf32> -> vector<5x80xf32>
    %c1_234 = arith.constant 1 : index
    %c0_235 = arith.constant 0 : index
    %c0_236 = arith.constant 0 : index
    %213 = vector.load %arg17[%c1_234, %c0_235, %c0_236] : memref<2x5x80xf32, #tpu.memory_space<vmem>>, vector<1x5x80xf32>
    %214 = vector.shape_cast %213 : vector<1x5x80xf32> to vector<5x80xf32>
    %215 = vector.shape_cast %212 : vector<5x80xf32> to vector<1x5x80xf32>
    tpu.vector_store %arg17[%c1_234, %c0_235, %c0_236], %215 {strides = array<i32>} : memref<2x5x80xf32, #tpu.memory_space<vmem>>, vector<1x5x80xf32>,
    %c0_237 = arith.constant 0 : index
    %c0_238 = arith.constant 0 : index
    %216 = vector.load %arg10[%c0_237, %c0_238] : memref<1x120xf32, #tpu.memory_space<vmem>>, vector<1x120xf32>
    %c1_239 = arith.constant 1 : index
    %c0_240 = arith.constant 0 : index
    %c0_241 = arith.constant 0 : index
    %217 = vector.load %arg17[%c1_239, %c0_240, %c0_241] : memref<2x5x80xf32, #tpu.memory_space<vmem>>, vector<1x1x80xf32>
    %218 = vector.shape_cast %217 : vector<1x1x80xf32> to vector<1x80xf32>
    %c0_242 = arith.constant 0 : index
    %c0_243 = arith.constant 0 : index
    %c0_244 = arith.constant 0 : index
    %219 = vector.load %arg9[%c0_242, %c0_243, %c0_244] : memref<5x80x120xf32, #tpu.memory_space<vmem>>, vector<1x80x120xf32>
    %220 = vector.shape_cast %219 : vector<1x80x120xf32> to vector<80x120xf32>
    %cst_245 = arith.constant dense<0.000000e+00> : vector<1x120xf32>
    %221 = tpu.matmul %218, %220, %cst_245 {dimension_numbers = #tpu.dot_dimension_numbers<[1], [0], [0], [1], [0, 0, 1, 1], [], []>} : vector<1x80xf32>, vector<80x120xf32>, vector<1x120xf32> -> vector<1x120xf32>
    %222 = arith.addf %216, %221 : vector<1x120xf32>
    %c1_246 = arith.constant 1 : index
    %c1_247 = arith.constant 1 : index
    %c0_248 = arith.constant 0 : index
    %223 = vector.load %arg17[%c1_246, %c1_247, %c0_248] : memref<2x5x80xf32, #tpu.memory_space<vmem>>, vector<1x1x80xf32>
    %224 = vector.shape_cast %223 : vector<1x1x80xf32> to vector<1x80xf32>
    %c1_249 = arith.constant 1 : index
    %c0_250 = arith.constant 0 : index
    %c0_251 = arith.constant 0 : index
    %225 = vector.load %arg9[%c1_249, %c0_250, %c0_251] : memref<5x80x120xf32, #tpu.memory_space<vmem>>, vector<1x80x120xf32>
    %226 = vector.shape_cast %225 : vector<1x80x120xf32> to vector<80x120xf32>
    %cst_252 = arith.constant dense<0.000000e+00> : vector<1x120xf32>
    %227 = tpu.matmul %224, %226, %cst_252 {dimension_numbers = #tpu.dot_dimension_numbers<[1], [0], [0], [1], [0, 0, 1, 1], [], []>} : vector<1x80xf32>, vector<80x120xf32>, vector<1x120xf32> -> vector<1x120xf32>
    %228 = arith.addf %222, %227 : vector<1x120xf32>
    %c1_253 = arith.constant 1 : index
    %c2_254 = arith.constant 2 : index
    %c0_255 = arith.constant 0 : index
    %229 = vector.load %arg17[%c1_253, %c2_254, %c0_255] : memref<2x5x80xf32, #tpu.memory_space<vmem>>, vector<1x1x80xf32>
    %230 = vector.shape_cast %229 : vector<1x1x80xf32> to vector<1x80xf32>
    %c2_256 = arith.constant 2 : index
    %c0_257 = arith.constant 0 : index
    %c0_258 = arith.constant 0 : index
    %231 = vector.load %arg9[%c2_256, %c0_257, %c0_258] : memref<5x80x120xf32, #tpu.memory_space<vmem>>, vector<1x80x120xf32>
    %232 = vector.shape_cast %231 : vector<1x80x120xf32> to vector<80x120xf32>
    %cst_259 = arith.constant dense<0.000000e+00> : vector<1x120xf32>
    %233 = tpu.matmul %230, %232, %cst_259 {dimension_numbers = #tpu.dot_dimension_numbers<[1], [0], [0], [1], [0, 0, 1, 1], [], []>} : vector<1x80xf32>, vector<80x120xf32>, vector<1x120xf32> -> vector<1x120xf32>
    %234 = arith.addf %228, %233 : vector<1x120xf32>
    %c1_260 = arith.constant 1 : index
    %c3_261 = arith.constant 3 : index
    %c0_262 = arith.constant 0 : index
    %235 = vector.load %arg17[%c1_260, %c3_261, %c0_262] : memref<2x5x80xf32, #tpu.memory_space<vmem>>, vector<1x1x80xf32>
    %236 = vector.shape_cast %235 : vector<1x1x80xf32> to vector<1x80xf32>
    %c3_263 = arith.constant 3 : index
    %c0_264 = arith.constant 0 : index
    %c0_265 = arith.constant 0 : index
    %237 = vector.load %arg9[%c3_263, %c0_264, %c0_265] : memref<5x80x120xf32, #tpu.memory_space<vmem>>, vector<1x80x120xf32>
    %238 = vector.shape_cast %237 : vector<1x80x120xf32> to vector<80x120xf32>
    %cst_266 = arith.constant dense<0.000000e+00> : vector<1x120xf32>
    %239 = tpu.matmul %236, %238, %cst_266 {dimension_numbers = #tpu.dot_dimension_numbers<[1], [0], [0], [1], [0, 0, 1, 1], [], []>} : vector<1x80xf32>, vector<80x120xf32>, vector<1x120xf32> -> vector<1x120xf32>
    %240 = arith.addf %234, %239 : vector<1x120xf32>
    %c1_267 = arith.constant 1 : index
    %c4_268 = arith.constant 4 : index
    %c0_269 = arith.constant 0 : index
    %241 = vector.load %arg17[%c1_267, %c4_268, %c0_269] : memref<2x5x80xf32, #tpu.memory_space<vmem>>, vector<1x1x80xf32>
    %242 = vector.shape_cast %241 : vector<1x1x80xf32> to vector<1x80xf32>
    %c4_270 = arith.constant 4 : index
    %c0_271 = arith.constant 0 : index
    %c0_272 = arith.constant 0 : index
    %243 = vector.load %arg9[%c4_270, %c0_271, %c0_272] : memref<5x80x120xf32, #tpu.memory_space<vmem>>, vector<1x80x120xf32>
    %244 = vector.shape_cast %243 : vector<1x80x120xf32> to vector<80x120xf32>
    %cst_273 = arith.constant dense<0.000000e+00> : vector<1x120xf32>
    %245 = tpu.matmul %242, %244, %cst_273 {dimension_numbers = #tpu.dot_dimension_numbers<[1], [0], [0], [1], [0, 0, 1, 1], [], []>} : vector<1x80xf32>, vector<80x120xf32>, vector<1x120xf32> -> vector<1x120xf32>
    %246 = arith.addf %240, %245 : vector<1x120xf32>
    %cst_274 = arith.constant 0.000000e+00 : f32
    %247 = vector.broadcast %cst_274 : f32 to vector<1x120xf32>
    %248 = arith.maximumf %246, %247 : vector<1x120xf32>
    %c0_275 = arith.constant 0 : index
    %c0_276 = arith.constant 0 : index
    %249 = vector.load %arg11[%c0_275, %c0_276] : memref<120x84xf32, #tpu.memory_space<vmem>>, vector<120x84xf32>
    %cst_277 = arith.constant dense<0.000000e+00> : vector<1x84xf32>
    %250 = tpu.matmul %248, %249, %cst_277 {dimension_numbers = #tpu.dot_dimension_numbers<[1], [0], [0], [1], [0, 0, 1, 1], [], []>} : vector<1x120xf32>, vector<120x84xf32>, vector<1x84xf32> -> vector<1x84xf32>
    %c0_278 = arith.constant 0 : index
    %c0_279 = arith.constant 0 : index
    %251 = vector.load %arg12[%c0_278, %c0_279] : memref<1x84xf32, #tpu.memory_space<vmem>>, vector<1x84xf32>
    %252 = arith.addf %250, %251 : vector<1x84xf32>
    %cst_280 = arith.constant 0.000000e+00 : f32
    %253 = vector.broadcast %cst_280 : f32 to vector<1x84xf32>
    %254 = arith.maximumf %252, %253 : vector<1x84xf32>
    %c0_281 = arith.constant 0 : index
    %c0_282 = arith.constant 0 : index
    %255 = vector.load %arg13[%c0_281, %c0_282] : memref<84x10xf32, #tpu.memory_space<vmem>>, vector<84x10xf32>
    %cst_283 = arith.constant dense<0.000000e+00> : vector<1x10xf32>
    %256 = tpu.matmul %254, %255, %cst_283 {dimension_numbers = #tpu.dot_dimension_numbers<[1], [0], [0], [1], [0, 0, 1, 1], [], []>} : vector<1x84xf32>, vector<84x10xf32>, vector<1x10xf32> -> vector<1x10xf32>
    %c0_284 = arith.constant 0 : index
    %c0_285 = arith.constant 0 : index
    %257 = vector.load %arg14[%c0_284, %c0_285] : memref<1x10xf32, #tpu.memory_space<vmem>>, vector<1x10xf32>
    %258 = arith.addf %256, %257 : vector<1x10xf32>
    %c1_286 = arith.constant 1 : index
    %c0_287 = arith.constant 0 : index
    %259 = vector.load %arg15[%c1_286, %c0_287] : memref<2x10xf32, #tpu.memory_space<vmem>>, vector<1x10xf32>
    tpu.vector_store %arg15[%c1_286, %c0_287], %258 {strides = array<i32>} : memref<2x10xf32, #tpu.memory_space<vmem>>, vector<1x10xf32>,
    return
  }
}

</mosaic_0001>

<bundles_post_ra>
// kernel: lenet_forward.1
= control target key start
LH: loop header
LB: loop body
LE: loop exit
PB: predicated region body
PF: predicated region fallthrough
CT: control target
= control target key end

     0   :  { %vm76_vm0 = vcmask 261120   ;;  %v5465_v18 = vmov 0.0   ;;  %s7791_s0 = inlined_call_operand.vmem [shape: f32[2,32,32], index: 0, kind: input, shape index: {}]   ;;  %s7792_s1 = inlined_call_operand.vmem [shape: f32[5,32,168], index: 1, kind: input, shape index: {}]   ;;  %s7793_s2 = inlined_call_operand.vmem [shape: f32[1,168], index: 2, kind: input, shape index: {}]   ;;  %s7794_s3 = inlined_call_operand.vmem [shape: f32[14,28], index: 3, kind: input, shape index: {}]   ;;  %s7795_s4 = inlined_call_operand.vmem [shape: f32[168,84], index: 4, kind: input, shape index: {}]   ;;  %s7796_s5 = inlined_call_operand.vmem [shape: f32[5,84,160], index: 5, kind: input, shape index: {}]   ;;  %s7797_s6 = inlined_call_operand.vmem [shape: f32[1,160], index: 6, kind: input, shape index: {}]   ;;  %s7798_s7 = inlined_call_operand.vmem [shape: f32[5,10], index: 7, kind: input, shape index: {}]   ;;  %s7799_s8 = inlined_call_operand.vmem [shape: f32[160,80], index: 8, kind: input, shape index: {}]   ;;  %s7800_s9 = inlined_call_operand.vmem [shape: f32[5,80,120], index: 9, kind: input, shape index: {}]   ;;  %s7801_s10 = inlined_call_operand.vmem [shape: f32[1,120], index: 10, kind: input, shape index: {}]   ;;  %s7802_s11 = inlined_call_operand.vmem [shape: f32[120,84], index: 11, kind: input, shape index: {}]   ;;  %s7803_s12 = inlined_call_operand.vmem [shape: f32[1,84], index: 12, kind: input, shape index: {}]   ;;  %s7804_s13 = inlined_call_operand.vmem [shape: f32[84,10], index: 13, kind: input, shape index: {}]   ;;  %s7805_s14 = inlined_call_operand.vmem [shape: f32[1,10], index: 14, kind: input, shape index: {}]   ;;  %s7806_s15 = inlined_call_operand.hbm [shape: f32[2,10], index: 15, kind: output, shape index: {}]  }
   0x1   :  { %v4479_v0 = vld [vmem:[%s7792_s1 + $0x78] sm:$0xff]  ;;  %v4478_v2 = vld [vmem:[%s7792_s1 + $0x70] sm:$0xff]  ;;  %v4477_v4 = vld [vmem:[%s7792_s1 + $0x68] sm:$0xff]  ;;  %153 = vmatprep.mubr.f32.mxu0 %v5465_v18  ;;  %254 = vmatprep.mubr.f32.mxu1 %v5465_v18 }
   0x2   :  { %v62_v1 = vld [vmem:[%s7792_s1 + $0x38] sm:$0xff]  ;;  %113 = vmatprep.subr.mxu0 %v4479_v0  ;;  %v61_v3 = vld [vmem:[%s7792_s1 + $0x30] sm:$0xff]  ;;  %v60_v5 = vld [vmem:[%s7792_s1 + $0x28] sm:$0xff] }
   0x3   :  { %214 = vmatprep.subr.mxu1 %v62_v1  ;;  %114 = vmatpush1.msra.mxu0 %v4478_v2  ;;  %v4476_v6 = vld [vmem:[%s7792_s1 + $0x60] sm:$0xff]  ;;  %v4475_v8 = vld [vmem:[%s7792_s1 + $0x58] sm:$0xff]  ;;  %v4474_v10 = vld [vmem:[%s7792_s1 + $0x50] sm:$0xff] }
   0x4   :  { %215 = vmatpush1.msra.mxu1 %v61_v3  ;;  %v59_v7 = vld [vmem:[%s7792_s1 + $0x20] sm:$0xff]  ;;  %115 = vmatprep.subr.mxu0 %v4477_v4  ;;  %v58_v9 = vld [vmem:[%s7792_s1 + $0x18] sm:$0xff]  ;;  %v57_v11 = vld [vmem:[%s7792_s1 + $0x10] sm:$0xff] }
   0x5   :  { %216 = vmatprep.subr.mxu1 %v60_v5  ;;  %116 = vmatpush1.msra.mxu0 %v4476_v6  ;;  %v4473_v12 = vld [vmem:[%s7792_s1 + $0x48] sm:$0xff]  ;;  %v4472_v14 = vld [vmem:[%s7792_s1 + $0x40] sm:$0xff]  ;;  %v4495_v19 = vld [vmem:[%s7792_s1 + $0xb8] sm:$0xff] }
   0x6   :  { %217 = vmatpush1.msra.mxu1 %v59_v7  ;;  %v56_v13 = vld [vmem:[%s7792_s1 + $0x8] sm:$0xff]  ;;  %117 = vmatprep.subr.mxu0 %v4475_v8  ;;  %v55_v15 = vld [vmem:[%s7792_s1] sm:$0xff]  ;;  %v4507_v20 = vld [vmem:[%s7792_s1 + $0xf8] sm:$0xff] }
   0x7   :  { %218 = vmatprep.subr.mxu1 %v58_v9  ;;  %118 = vmatpush1.msra.mxu0 %v4474_v10  ;;  %v63_v16 = vld [vmem:[%s7791_s0 + $0x1] sm:$0xff]  ;;  %v4494_v21 = vld [vmem:[%s7792_s1 + $0xb0] sm:$0xff]  ;;  %v4491_v31 = vld [vmem:[%s7792_s1 + $0x98] sm:$0xff] }
   0x8   :  { %219 = vmatpush1.msra.mxu1 %v57_v11  ;;  %119 = vmatprep.subr.mxu0 %v4473_v12  ;;  %v51_v17 = vld [vmem:[%s7791_s0] sm:$0xff]  ;;  %v4506_v22 = vld [vmem:[%s7792_s1 + $0xf0] sm:$0xff]  ;;  %v52_v24 = vld [vmem:[%s7791_s0 + $0x8] sm:$0xff] }
   0x9   :  { %220 = vmatprep.subr.mxu1 %v56_v13  ;;  %120 = vmatpush1.msra.mxu0 %v4472_v14  ;;  %v64_v23 = vld [vmem:[%s7791_s0 + $0x9] sm:$0xff]  ;;  %v4492_v27 = vld [vmem:[%s7792_s1 + $0xa0] sm:$0xff]  ;;  %v65_v29 = vld [vmem:[%s7791_s0 + $0x11] sm:$0xff] }
   0xa   :  { %221 = vmatpush1.msra.mxu1 %v55_v15  ;;  %4480 = vmatmul.mubr.msk.f32.vlgmr.msra.gmra.mxu0 %vm76_vm0, %v63_v16  ;;  %v4493_v25 = vld [vmem:[%s7792_s1 + $0xa8] sm:$0xff]  ;;  %v4504_v28 = vld [vmem:[%s7792_s1 + $0xe0] sm:$0xff]  ;;  %v53_v30 = vld [vmem:[%s7791_s0 + $0x10] sm:$0xff] }
   0xb   :  { %4484 = vmatmul.mubr.msk.f32.vlgmr.msra.gmra.mxu1 %vm76_vm0, %v51_v17  ;;  %159 = vmatprep.mubr.f32.mxu0 %v5465_v18  ;;  %v4505_v26 = vld [vmem:[%s7792_s1 + $0xe8] sm:$0xff]  ;;  %v4503_v32 = vld [vmem:[%s7792_s1 + $0xd8] sm:$0xff]  ;;  %v4490_v33 = vld [vmem:[%s7792_s1 + $0x90] sm:$0xff] }
   0xc   :  { %260 = vmatprep.mubr.f32.mxu1 %v5465_v18  ;;  %328 = vmatprep.subr.mxu0 %v4495_v19  ;;  %v4502_v34 = vld [vmem:[%s7792_s1 + $0xd0] sm:$0xff]  ;;  %v66_v35 = vld [vmem:[%s7791_s0 + $0x19] sm:$0xf]  ;;  %v4489_v37 = vld [vmem:[%s7792_s1 + $0x88] sm:$0xff] }
   0xd   :  { %450 = vmatprep.subr.mxu1 %v4507_v20  ;;  %329 = vmatpush1.msra.mxu0 %v4494_v21  ;;  %v54_v36 = vld [vmem:[%s7791_s0 + $0x18] sm:$0xf] }
   0xe   :  { %451 = vmatpush1.msra.mxu1 %v4506_v22  ;;  %4481 = vmatmul.mubr.msk.f32.gmra.mxu0 %vm76_vm0, %v64_v23 }
   0xf   :  { %4485 = vmatmul.mubr.msk.f32.gmra.mxu1 %vm76_vm0, %v52_v24  ;;  %165 = vmatprep.mubr.f32.mxu0 %v5465_v18 }
  0x10   :  { %266 = vmatprep.mubr.f32.mxu1 %v5465_v18  ;;  %330 = vmatprep.subr.mxu0 %v4493_v25 }
  0x11   :  { %452 = vmatprep.subr.mxu1 %v4505_v26  ;;  %331 = vmatpush1.msra.mxu0 %v4492_v27 }
  0x12   :  { %453 = vmatpush1.msra.mxu1 %v4504_v28  ;;  %4482 = vmatmul.mubr.msk.f32.gmra.mxu0 %vm76_vm0, %v65_v29 }
  0x13   :  { %4486 = vmatmul.mubr.msk.f32.gmra.mxu1 %vm76_vm0, %v53_v30  ;;  %171 = vmatprep.mubr.f32.mxu0 %v5465_v18 }
  0x14   :  { %272 = vmatprep.mubr.f32.mxu1 %v5465_v18  ;;  %332 = vmatprep.subr.mxu0 %v4491_v31 }
  0x15   :  { %454 = vmatprep.subr.mxu1 %v4503_v32 }
  0x16   :  { %20 = vsyncpa [#allocation5], 0  ;;  %333 = vmatpush1.msra.mxu0 %v4490_v33  ;;  %v4488_v38 = vld [vmem:[%s7792_s1 + $0x80] sm:$0xff]  ;;  %455 = vmatpush1.msra.mxu1 %v4502_v34  ;;  %v4501_v39 = vld [vmem:[%s7792_s1 + $0xc8] sm:$0xff]  ;;  %vm682_vm1 = vcmask 1043456   ;;  %vm675_vm2 = vcmask 228352  }
  0x17   :  { %4483 = vmatmul.mubr.msk.f32.gmra.mxu0 %vm76_vm0, %v66_v35  ;;  %4487 = vmatmul.mubr.msk.f32.gmra.mxu1 %vm76_vm0, %v54_v36  ;;  %v4500_v40 = vld [vmem:[%s7792_s1 + $0xc0] sm:$0xff]  ;;  %v4519_v43 = vld [vmem:[%s7792_s1 + $0x138] sm:$0xff]  ;;  %v4518_v44 = vld [vmem:[%s7792_s1 + $0x130] sm:$0xff]  ;;  %vm787_vm3 = vcmask 326656   ;;  %vm869_vm4 = vcmask 687104   ;;  %vm871_vm5 = vcmask 685056  }
  0x18   :  { %334 = vmatprep.subr.mxu0 %v4489_v37  ;;  %368 = vmatprep.mubr.f32.mxu0 %v5465_v18  ;;  %v279_v41 = vld [vmem:[%s7791_s0 + $0x2] sm:$0xff]  ;;  %v280_v45 = vld [vmem:[%s7791_s0 + $0xa] sm:$0xff]  ;;  %v281_v49 = vld [vmem:[%s7791_s0 + $0x12] sm:$0xff]  ;;  %vm1479_vm6 = vcmask 1041408   ;;  %vm1475_vm7 = vcmask 80896   ;;  %vm5466_vm8 = vmmov 0  }
  0x19   :  { %v401_v42 = vld [vmem:[%s7791_s0 + $0x3] sm:$0xff]  ;;  %335 = vmatpush1.msra.mxu0 %v4488_v38  ;;  %456 = vmatprep.subr.mxu1 %v4501_v39  ;;  %v402_v46 = vld [vmem:[%s7791_s0 + $0xb] sm:$0xff]  ;;  %v403_v50 = vld [vmem:[%s7791_s0 + $0x13] sm:$0xff]  ;;  %vm1650_vm9 = vcmask 651264   ;;  %vm1664_vm10 = vcmask 654336   ;;  %vm2100_vm11 = vcmask 982016  }
  0x1a   :  { %457 = vmatpush1.msra.mxu1 %v4500_v40  ;;  %490 = vmatprep.mubr.f32.mxu1 %v5465_v18  ;;  %v4517_v47 = vld [vmem:[%s7792_s1 + $0x128] sm:$0xff]  ;;  %v4516_v48 = vld [vmem:[%s7792_s1 + $0x120] sm:$0xff]  ;;  %v4515_v51 = vld [vmem:[%s7792_s1 + $0x118] sm:$0xff]  ;;  %vm2263_vm12 = vcmask 73728   ;;  %s5467_s21 = smov [#allocation4]  }
  0x1b   :  { %4496 = vmatmul.mubr.msk.f32.vlgmr.msra.gmra.mxu0 %vm76_vm0, %v279_v41  ;;  %4508 = vmatmul.mubr.msk.f32.vlgmr.msra.gmra.mxu1 %vm76_vm0, %v401_v42  ;;  %v4514_v52 = vld [vmem:[%s7792_s1 + $0x110] sm:$0xff]  ;;  %v4513_v53 = vld [vmem:[%s7792_s1 + $0x108] sm:$0xff]  ;;  %v282_v54 = vld [vmem:[%s7791_s0 + $0x1a] sm:$0xf]  ;;  %s4464_s22 = sshll.u32 %s5467_s21, 4  ;;  %s4465_s22 = int_to_ptr.vmem [resolvable:$true] %s4464_s22 }
  0x1c   :  { %374 = vmatprep.mubr.f32.mxu0 %v5465_v18  ;;  %496 = vmatprep.mubr.f32.mxu1 %v5465_v18  ;;  %v404_v55 = vld [vmem:[%s7791_s0 + $0x1b] sm:$0xf]  ;;  %v4512_v56 = vld [vmem:[%s7792_s1 + $0x100] sm:$0xff]  ;;  %v524_v58 = vld [vmem:[%s7791_s0 + $0xc] sm:$0xff]  ;;  %p5448_p1 = scmp.lt.s32.totalorder %s4465_s22, %s4465_s22 }
  0x1d   :  { %572 = vmatprep.subr.mxu0 %v4519_v43  ;;  %v523_v57 = vld [vmem:[%s7791_s0 + $0x4] sm:$0xff]  ;;  %v525_v59 = vld [vmem:[%s7791_s0 + $0x14] sm:$0xff]  ;;  %v526_v60 = vld [vmem:[%s7791_s0 + $0x1c] sm:$0xf] }
  0x1e   :  { %573 = vmatpush1.msra.mxu0 %v4518_v44  ;;  %v781_v61 = vld [vmem:[%s7795_s4 + $0x78] sm:$0xff]  ;;  %v780_v62 = vld [vmem:[%s7795_s4 + $0x70] sm:$0xff]  ;;  %v779_v63 = vld [vmem:[%s7795_s4 + $0x68] sm:$0xff] }
  0x1f   :  { %4497 = vmatmul.mubr.msk.f32.gmra.mxu0 %vm76_vm0, %v280_v45  ;;  %4509 = vmatmul.mubr.msk.f32.gmra.mxu1 %vm76_vm0, %v402_v46  ;;  %v778_v0 = vld [vmem:[%s7795_s4 + $0x60] sm:$0xff]  ;;  %v777_v1 = vld [vmem:[%s7795_s4 + $0x58] sm:$0xff]  ;;  %v776_v2 = vld [vmem:[%s7795_s4 + $0x50] sm:$0xff] }
  0x20   :  { %380 = vmatprep.mubr.f32.mxu0 %v5465_v18  ;;  %502 = vmatprep.mubr.f32.mxu1 %v5465_v18  ;;  %v775_v3 = vld [vmem:[%s7795_s4 + $0x48] sm:$0xff]  ;;  %v774_v4 = vld [vmem:[%s7795_s4 + $0x40] sm:$0xff]  ;;  %v773_v5 = vld [vmem:[%s7795_s4 + $0x38] sm:$0xff] }
  0x21   :  { %574 = vmatprep.subr.mxu0 %v4517_v47  ;;  %v772_v6 = vld [vmem:[%s7795_s4 + $0x30] sm:$0xff]  ;;  %v771_v7 = vld [vmem:[%s7795_s4 + $0x28] sm:$0xff]  ;;  %v770_v8 = vld [vmem:[%s7795_s4 + $0x20] sm:$0xff] }
  0x22   :  { %575 = vmatpush1.msra.mxu0 %v4516_v48  ;;  %v769_v9 = vld [vmem:[%s7795_s4 + $0x18] sm:$0xff]  ;;  %v768_v10 = vld [vmem:[%s7795_s4 + $0x10] sm:$0xff]  ;;  %v767_v11 = vld [vmem:[%s7795_s4 + $0x8] sm:$0xff]  ;;  %v647_v48 = vlaneseq }
  0x23   :  { %4498 = vmatmul.mubr.msk.f32.gmra.mxu0 %vm76_vm0, %v281_v49  ;;  %4510 = vmatmul.mubr.msk.f32.gmra.mxu1 %vm76_vm0, %v403_v50  ;;  %v766_v12 = vld [vmem:[%s7795_s4] sm:$0xff]  ;;  %v785_v14 = vld [vmem:[%s7795_s4 + $0x98] sm:$0xff]  ;;  %v784_v15 = vld [vmem:[%s7795_s4 + $0x90] sm:$0xff] }
  0x24   :  { %386 = vmatprep.mubr.f32.mxu0 %v5465_v18  ;;  %576 = vmatprep.subr.mxu0 %v4515_v51  ;;  %v786_v13 = vld [vmem:[%s7795_s4 + $0xa0] sm:$0xff] }
  0x25   :  { %508 = vmatprep.mubr.f32.mxu1 %v5465_v18  ;;  %577 = vmatpush1.msra.mxu0 %v4514_v52 }
  0x26   :  { %578 = vmatprep.subr.mxu0 %v4513_v53 }
  0x27   :  { %4499 = vmatmul.mubr.msk.f32.gmra.mxu0 %vm76_vm0, %v282_v54  ;;  %4511 = vmatmul.mubr.msk.f32.gmra.mxu1 %vm76_vm0, %v404_v55  ;;  %v648_v55 = vshrl.u32 %v647_v48, 7 }
  0x28   :  { %579 = vmatpush1.msra.mxu0 %v4512_v56  ;;  %612 = vmatprep.mubr.f32.mxu0 %v5465_v18 }
  0x29   :  { %753 = vmatprep.mubr.f32.mxu1 %v5465_v18  ;;  %794 = vmatprep.subr.mxu0 %v5465_v18 }
  0x2b   :  { %4520 = vmatmul.mubr.msk.f32.vlgmr.msra.gmra.mxu0 %vm76_vm0, %v523_v57 }
  0x2c   :  { %618 = vmatprep.mubr.f32.mxu0 %v5465_v18  ;;  %795 = vmatpush1.msra.mxu0 %v781_v61 }
  0x2d   :  { %796 = vmatprep.subr.mxu0 %v5465_v18 }
  0x2e   :  { %797 = vmatpush1.msra.mxu0 %v780_v62 }
  0x2f   :  { %4521 = vmatmul.mubr.msk.f32.gmra.mxu0 %vm76_vm0, %v524_v58  ;;  %798 = vmatprep.subr.mxu0 %v5465_v18 }
  0x30   :  { %624 = vmatprep.mubr.f32.mxu0 %v5465_v18  ;;  %799 = vmatpush1.msra.mxu0 %v779_v63 }
  0x31   :  { %800 = vmatprep.subr.mxu0 %v5465_v18 }
  0x32   :  { %801 = vmatpush1.msra.mxu0 %v778_v0 }
  0x33   :  { %4522 = vmatmul.mubr.msk.f32.gmra.mxu0 %vm76_vm0, %v525_v59  ;;  %802 = vmatprep.subr.mxu0 %v5465_v18 }
  0x34   :  { %630 = vmatprep.mubr.f32.mxu0 %v5465_v18  ;;  %803 = vmatpush1.msra.mxu0 %v777_v1 }
  0x35   :  { %804 = vmatprep.subr.mxu0 %v5465_v18 }
  0x36   :  { %805 = vmatpush1.msra.mxu0 %v776_v2 }
  0x37   :  { %4523 = vmatmul.mubr.msk.f32.gmra.mxu0 %vm76_vm0, %v526_v60  ;;  %806 = vmatprep.subr.mxu0 %v5465_v18 }
  0x38   :  { %807 = vmatpush1.msra.mxu0 %v775_v3 }
  0x39   :  { %808 = vmatprep.subr.mxu0 %v5465_v18 }
  0x3a   :  { %809 = vmatpush1.msra.mxu0 %v774_v4 }
  0x3b   :  { %810 = vmatprep.subr.mxu0 %v5465_v18 }
  0x3c   :  { %811 = vmatpush1.msra.mxu0 %v773_v5 }
  0x3d   :  { %812 = vmatprep.subr.mxu0 %v5465_v18 }
  0x3e   :  { %813 = vmatpush1.msra.mxu0 %v772_v6  ;;  %v5846_v6 = vsub.s32 0, %v648_v55 }
  0x3f   :  { %814 = vmatprep.subr.mxu0 %v5465_v18 }
  0x40   :  { %815 = vmatpush1.msra.mxu0 %v771_v7 }
  0x41   :  { %816 = vmatprep.subr.mxu0 %v5465_v18 }
  0x42   :  { %817 = vmatpush1.msra.mxu0 %v770_v8 }
  0x43   :  { %818 = vmatprep.subr.mxu0 %v5465_v18 }
  0x44   :  { %819 = vmatpush1.msra.mxu0 %v769_v9 }
  0x45   :  { %820 = vmatprep.subr.mxu0 %v5465_v18 }
  0x46   :  { %821 = vmatpush1.msra.mxu0 %v768_v10 }
  0x47   :  { %822 = vmatprep.subr.mxu0 %v5465_v18 }
  0x48   :  { %823 = vmatpush1.msra.mxu0 %v767_v11  ;;  %v645_v11 = vld [vmem:[%s7793_s2] sm:$0x3] }
  0x49   :  { %824 = vmatprep.subr.mxu0 %v5465_v18 }
  0x4a   :  { %825 = vmatpush1.msra.mxu0 %v766_v12  ;;  %v5851_v12 = vsub.s32 1, %v648_v55  ;;  %v4550_v55 = vld [vmem:[%s7796_s5 + $0x150] sm:$0xf] }
  0x4b   :  { %848 = vmatprep.subr.mxu0 %v5465_v18 }
  0x4c   :  { %849 = vmatpush2.msra.mxu0 %v786_v13 }
  0x4d   :  { %850 = vmatprep.subr.mxu0 %v5465_v18 }
  0x4e   :  { %851 = vmatpush2.msra.mxu0 %v785_v14 }
  0x4f   :  { %852 = vmatprep.subr.mxu0 %v5465_v18 }
  0x50   :  { %853 = vmatpush2.msra.mxu0 %v784_v15 }
  0x51   :  { %854 = vmatprep.subr.mxu0 %v5465_v18 }
  0xca   :  { %v155_v16 = vpop.f32.mrf.mxu0 }
  0xcb   :  { %v256_v17 = vpop.f32.mrf.mxu1 }
  0xcc   :  { %v157_v19 = vpop.f32.mrf.mxu0  ;;  %v257_v3 = vadd.f32 %v256_v17, %v155_v16 }
  0xcd   :  { %v258_v20 = vpop.f32.mrf.mxu1 }
  0xce   :  { %v161_v21 = vpop.f32.mrf.mxu0  ;;  %v259_v0 = vadd.f32 %v258_v20, %v157_v19 }
  0xcf   :  { %v262_v22 = vpop.f32.mrf.mxu1 }
  0xd0   :  { %v163_v23 = vpop.f32.mrf.mxu0  ;;  %v263_v61 = vadd.f32 %v262_v22, %v161_v21  ;;  %v650_v22 = vrot.slane %v645_v11, %v5846_v6 }
  0xd1   :  { %v264_v24 = vpop.f32.mrf.mxu1 }
  0xd2   :  { %v167_v25 = vpop.f32.mrf.mxu0  ;;  %v265_v57 = vadd.f32 %v264_v24, %v163_v23 }
  0xd3   :  { %v268_v26 = vpop.f32.mrf.mxu1 }
  0xd4   :  { %v169_v27 = vpop.f32.mrf.mxu0  ;;  %v269_v53 = vadd.f32 %v268_v26, %v167_v25  ;;  %v654_v26 = vrot.slane %v645_v11, %v5851_v12  ;;  %v4574_v11 = vld [vmem:[%s7796_s5 + $0x1d0] sm:$0xff] }
  0xd5   :  { %v270_v28 = vpop.f32.mrf.mxu1 }
  0xd6   :  { %v271_v51 = vadd.f32 %v270_v28, %v169_v27 }
  0xd7   :  { %v173_v29 = vpop.f32.mrf.mxu0  ;;  %v274_v30 = vpop.f32.mrf.mxu1 }
  0xd8   :  { %v275_v52 = vadd.f32 %v274_v30, %v173_v29 }
  0xd9   :  { %v175_v31 = vpop.f32.mrf.mxu0  ;;  %v276_v32 = vpop.f32.mrf.mxu1 }
  0xda   :  { %v277_v58 = vadd.f32 %v276_v32, %v175_v31 }
  0xdb   :  { %v370_v33 = vpop.f32.mrf.mxu0  ;;  %v492_v34 = vpop.f32.mrf.mxu1 }
  0xdc   :  { %v393_v13 = vadd.f32 %v370_v33, %v257_v3  ;;  %v4579_v3 = vld [vmem:[%s7796_s5 + $0x1f8] sm:$0xff] }
  0xdd   :  { %v372_v35 = vpop.f32.mrf.mxu0  ;;  %v494_v36 = vpop.f32.mrf.mxu1 }
  0xde   :  { %v394_v8 = vadd.f32 %v372_v35, %v259_v0  ;;  %v515_v29 = vadd.f32 %v492_v34, %v393_v13  ;;  %v4573_v13 = vld [vmem:[%s7796_s5 + $0x1c8] sm:$0xff] }
  0xdf   :  { %v376_v37 = vpop.f32.mrf.mxu0  ;;  %v498_v39 = vpop.f32.mrf.mxu1 }
  0xe0   :  { %v395_v4 = vadd.f32 %v376_v37, %v263_v61  ;;  %v516_v25 = vadd.f32 %v494_v36, %v394_v8  ;;  %v4544_v61 = vld [vmem:[%s7796_s5 + $0x120] sm:$0xff] }
  0xe1   :  { %v378_v38 = vpop.f32.mrf.mxu0  ;;  %v500_v41 = vpop.f32.mrf.mxu1 }
  0xe2   :  { %v396_v1 = vadd.f32 %v378_v38, %v265_v57  ;;  %v517_v21 = vadd.f32 %v498_v39, %v395_v4  ;;  %v4548_v57 = vld [vmem:[%s7796_s5 + $0x140] sm:$0xff] }
  0xe3   :  { %v382_v40 = vpop.f32.mrf.mxu0  ;;  %v504_v44 = vpop.f32.mrf.mxu1 }
  0xe4   :  { %v397_v62 = vadd.f32 %v382_v40, %v269_v53  ;;  %v518_v19 = vadd.f32 %v500_v41, %v396_v1  ;;  %v4551_v53 = vld [vmem:[%s7796_s5 + $0x158] sm:$0xf] }
  0xe5   :  { %v384_v42 = vpop.f32.mrf.mxu0  ;;  %v506_v47 = vpop.f32.mrf.mxu1 }
  0xe6   :  { %v398_v59 = vadd.f32 %v384_v42, %v271_v51  ;;  %v519_v14 = vadd.f32 %v504_v44, %v397_v62  ;;  %v783_v51 = vld [vmem:[%s7795_s4 + $0x88] sm:$0xff]  ;;  %v4543_v62 = vld [vmem:[%s7796_s5 + $0x118] sm:$0xff] }
  0xe7   :  { %v388_v43 = vpop.f32.mrf.mxu0  ;;  %v510_v54 = vpop.f32.mrf.mxu1  ;;  %855 = vmatpush2.msra.mxu0 %v783_v51  ;;  %v4631_v51 = vld [vmem:[%s7796_s5 + $0x358] sm:$0xff] }
  0xe8   :  { %v399_v60 = vadd.f32 %v388_v43, %v275_v52  ;;  %v520_v9 = vadd.f32 %v506_v47, %v398_v59  ;;  %856 = vmatprep.subr.mxu0 %v5465_v18  ;;  %v782_v52 = vld [vmem:[%s7795_s4 + $0x80] sm:$0xff]  ;;  %v4546_v59 = vld [vmem:[%s7796_s5 + $0x130] sm:$0xff] }
  0xe9   :  { %v390_v45 = vpop.f32.mrf.mxu0  ;;  %v512_v5 = vpop.f32.mrf.mxu1  ;;  %857 = vmatpush2.msra.mxu0 %v782_v52  ;;  %v893_v52 = vld [vmem:[%s7796_s5 + $0x90] sm:$0xff] }
  0xea   :  { %v400_v2 = vadd.f32 %v390_v45, %v277_v58  ;;  %v521_v10 = vadd.f32 %v510_v54, %v399_v60  ;;  %v4581_v54 = vld [vmem:[%s7796_s5 + $0x208] sm:$0xf]  ;;  %v4547_v58 = vld [vmem:[%s7796_s5 + $0x138] sm:$0xff] }
  0xeb   :  { %v614_v46 = vpop.f32.mrf.mxu0  ;;  %4582 = vmatprep.subr.msk.mxu0 %vm682_vm1, %v4581_v54  ;;  %v4545_v60 = vld [vmem:[%s7796_s5 + $0x128] sm:$0xff] }
  0xec   :  { %v522_v20 = vadd.f32 %v512_v5, %v400_v2  ;;  %v637_v37 = vadd.f32 %v614_v46, %v515_v29  ;;  %v4580_v2 = vld [vmem:[%s7796_s5 + $0x200] sm:$0xf]  ;;  %v4578_v5 = vld [vmem:[%s7796_s5 + $0x1f0] sm:$0xff]  ;;  %v4565_v29 = vld [vmem:[%s7796_s5 + $0x188] sm:$0xff] }
  0xed   :  { %v616_v49 = vpop.f32.mrf.mxu0  ;;  %v892_v54 = vld [vmem:[%s7796_s5 + $0x88] sm:$0xff] }
  0xee   :  { %v638_v32 = vadd.f32 %v616_v49, %v516_v25  ;;  %v657_v36 = vadd.f32 %v650_v22, %v637_v37  ;;  %v673_v49 = vld [vmem:[%s7794_s3] sm:$0xff]  ;;  %v4567_v25 = vld [vmem:[%s7796_s5 + $0x198] sm:$0xff]  ;;  %v4562_v37 = vld [vmem:[%s7796_s5 + $0x170] sm:$0xff] }
  0xef   :  { %v620_v50 = vpop.f32.mrf.mxu0 }
  0xf0   :  { %v639_v30 = vadd.f32 %v620_v50, %v517_v21  ;;  %v658_v43 = vadd.f32 %v654_v26, %v638_v32  ;;  %v665_v46 = vmax.f32 %v657_v36, 0.0  ;;  %v674_v50 = vld [vmem:[%s7794_s3 + $0x8] sm:$0x3f] }
  0xf1   :  { %v622_v56 = vpop.f32.mrf.mxu0  ;;  %v4569_v21 = vld [vmem:[%s7796_s5 + $0x1a8] sm:$0xff] }
  0xf2   :  { %v640_v27 = vadd.f32 %v622_v56, %v518_v19  ;;  %v659_v41 = vadd.f32 %v650_v22, %v639_v30  ;;  %v666_v48 = vmax.f32 %v658_v43, 0.0  ;;  %v4549_v56 = vld [vmem:[%s7796_s5 + $0x148] sm:$0xff]  ;;  %v4571_v19 = vld [vmem:[%s7796_s5 + $0x1b8] sm:$0xff]  ;;  %v4534_v30 = vld [vmem:[%s7796_s5 + $0xd0] sm:$0xff] }
  0xf3   :  { %v626_v63 = vpop.f32.mrf.mxu0  ;;  %v4533_v32 = vld [vmem:[%s7796_s5 + $0xc8] sm:$0xff] }
  0xf4   :  { %v641_v23 = vadd.f32 %v626_v63, %v519_v14  ;;  %v660_v40 = vadd.f32 %v654_v26, %v640_v27  ;;  %v667_v47 = vmax.f32 %v659_v41, 0.0  ;;  %v4542_v63 = vld [vmem:[%s7796_s5 + $0x110] sm:$0xff]  ;;  %v4572_v14 = vld [vmem:[%s7796_s5 + $0x1c0] sm:$0xff]  ;;  %v4633_v43 = vld [vmem:[%s7796_s5 + $0x368] sm:$0xf] }
  0xf5   :  { %v628_v7 = vpop.f32.mrf.mxu0  ;;  %v4566_v27 = vld [vmem:[%s7796_s5 + $0x190] sm:$0xff]  ;;  %v4560_v41 = vld [vmem:[%s7796_s5 + $0x160] sm:$0xff] }
  0xf6   :  { %v642_v16 = vadd.f32 %v628_v7, %v520_v9  ;;  %v661_v38 = vadd.f32 %v650_v22, %v641_v23  ;;  %v668_v34 = vmax.f32 %v660_v40, 0.0  ;;  %v4577_v7 = vld [vmem:[%s7796_s5 + $0x1e8] sm:$0xff]  ;;  %v4576_v9 = vld [vmem:[%s7796_s5 + $0x1e0] sm:$0xff] }
  0xf7   :  { %v632_v15 = vpop.f32.mrf.mxu0  ;;  %v4568_v23 = vld [vmem:[%s7796_s5 + $0x1a0] sm:$0xff]  ;;  %v4561_v40 = vld [vmem:[%s7796_s5 + $0x168] sm:$0xff] }
  0xf8   :  { %v643_v17 = vadd.f32 %v632_v15, %v521_v10  ;;  %v662_v33 = vadd.f32 %v654_v26, %v642_v16  ;;  %v669_v45 = vmax.f32 %v661_v38, 0.0  ;;  %v4575_v10 = vld [vmem:[%s7796_s5 + $0x1d8] sm:$0xff]  ;;  %v4541_v15 = vld [vmem:[%s7796_s5 + $0x108] sm:$0xff]  ;;  %v4570_v16 = vld [vmem:[%s7796_s5 + $0x1b0] sm:$0xff] }
  0xf9   :  { %v634_v24 = vpop.f32.mrf.mxu0  ;;  %v4531_v38 = vld [vmem:[%s7796_s5 + $0xb8] sm:$0xff] }
  0xfa   :  { %v644_v28 = vadd.f32 %v634_v24, %v522_v20  ;;  %v663_v31 = vadd.f32 %v650_v22, %v643_v17  ;;  %v670_v44 = vmax.f32 %v662_v33, 0.0  ;;  %v4540_v20 = vld [vmem:[%s7796_s5 + $0x100] sm:$0xff]  ;;  %v4539_v17 = vld [vmem:[%s7796_s5 + $0xf8] sm:$0xff]  ;;  %v4538_v22 = vld [vmem:[%s7796_s5 + $0xf0] sm:$0xff] }
  0xfb   :  { %v4537_v24 = vld [vmem:[%s7796_s5 + $0xe8] sm:$0xff]  ;;  %v4563_v33 = vld [vmem:[%s7796_s5 + $0x178] sm:$0xff] }
  0xfc   :  { %v664_v35 = vadd.f32 %v654_v26, %v644_v28  ;;  %v671_v42 = vmax.f32 %v663_v31, 0.0  ;;  %v4536_v26 = vld [vmem:[%s7796_s5 + $0xe0] sm:$0xff]  ;;  %v4535_v28 = vld [vmem:[%s7796_s5 + $0xd8] sm:$0xff] }
  0xfd   :  { %v4564_v31 = vld [vmem:[%s7796_s5 + $0x180] sm:$0xff] }
  0xfe   :  { %v672_v39 = vmax.f32 %v664_v35, 0.0  ;;  %v4532_v35 = vld [vmem:[%s7796_s5 + $0xc0] sm:$0xff] }
 0x100   :  { %4524 = vmatprep.subr.msk.mxu1 %vm682_vm1, %v672_v39  ;;  %v4530_v39 = vld [vmem:[%s7796_s5 + $0xb0] sm:$0xff] }
 0x101   :  { %4525 = vmatpush1.msk.msra.mxu1 %vm682_vm1, %v671_v42  ;;  %v896_v42 = vld [vmem:[%s7796_s5 + $0xa8] sm:$0xf] }
 0x102   :  { %715 = vmatprep.subr.mxu1 %v670_v44 }
 0x103   :  { %716 = vmatpush1.msra.mxu1 %v669_v45 }
 0x104   :  { %717 = vmatprep.subr.mxu1 %v668_v34 }
 0x105   :  { %718 = vmatpush1.msra.mxu1 %v667_v47  ;;  %v895_v47 = vld [vmem:[%s7796_s5 + $0xa0] sm:$0xf] }
 0x106   :  { %719 = vmatprep.subr.mxu1 %v666_v48  ;;  %v4632_v48 = vld [vmem:[%s7796_s5 + $0x360] sm:$0xf] }
 0x107   :  { %720 = vmatpush1.msra.mxu1 %v665_v46  ;;  %v894_v46 = vld [vmem:[%s7796_s5 + $0x98] sm:$0xff] }
 0x108   :  { %4526 = vmatmul.mubr.msk.f32.vlgmr.msra.gmra.mxu1 %vm675_vm2, %v673_v49  ;;  %4552 = vmatprep.subr.msk.mxu1 %vm682_vm1, %v4551_v53  ;;  %v4630_v53 = vld [vmem:[%s7796_s5 + $0x350] sm:$0xff] }
 0x109   :  { %759 = vmatprep.mubr.f32.mxu1 %v5465_v18  ;;  %4553 = vmatpush1.msk.msra.mxu1 %vm682_vm1, %v4550_v55  ;;  %v4629_v55 = vld [vmem:[%s7796_s5 + $0x348] sm:$0xff] }
 0x10a   :  { %946 = vmatprep.subr.mxu1 %v4549_v56  ;;  %v891_v56 = vld [vmem:[%s7796_s5 + $0x80] sm:$0xff] }
 0x10b   :  { %947 = vmatpush1.msra.mxu1 %v4548_v57  ;;  %v4628_v57 = vld [vmem:[%s7796_s5 + $0x340] sm:$0xff] }
 0x10c   :  { %4527 = vmatmul.mubr.msk.f32.gmra.mxu1 %vm675_vm2, %v674_v50  ;;  %948 = vmatprep.subr.mxu1 %v4547_v58  ;;  %v890_v58 = vld [vmem:[%s7796_s5 + $0x78] sm:$0xff] }
 0x10d   :  { %998 = vmatprep.mubr.f32.mxu1 %v5465_v18  ;;  %949 = vmatpush1.msra.mxu1 %v4546_v59 }
 0x10e   :  { %950 = vmatprep.subr.mxu1 %v4545_v60 }
 0x10f   :  { %951 = vmatpush1.msra.mxu1 %v4544_v61  ;;  %v4627_v61 = vld [vmem:[%s7796_s5 + $0x338] sm:$0xff] }
 0x110   :  { %952 = vmatprep.subr.mxu1 %v4543_v62  ;;  %v889_v62 = vld [vmem:[%s7796_s5 + $0x70] sm:$0xff] }
 0x111   :  { %953 = vmatpush1.msra.mxu1 %v4542_v63  ;;  %v4626_v63 = vld [vmem:[%s7796_s5 + $0x330] sm:$0xff] }
 0x112   :  { %954 = vmatprep.subr.mxu1 %v4541_v15  ;;  %v4619_v15 = vld [vmem:[%s7796_s5 + $0x2f8] sm:$0xff] }
 0x113   :  { %955 = vmatpush1.msra.mxu1 %v4540_v20  ;;  %v4618_v20 = vld [vmem:[%s7796_s5 + $0x2f0] sm:$0xff] }
 0x114   :  { %956 = vmatprep.subr.mxu1 %v4539_v17  ;;  %v4617_v17 = vld [vmem:[%s7796_s5 + $0x2e8] sm:$0xff] }
 0x115   :  { %957 = vmatpush1.msra.mxu1 %v4538_v22  ;;  %v4616_v22 = vld [vmem:[%s7796_s5 + $0x2e0] sm:$0xff] }
 0x116   :  { %958 = vmatprep.subr.mxu1 %v4537_v24  ;;  %v4615_v24 = vld [vmem:[%s7796_s5 + $0x2d8] sm:$0xff] }
 0x117   :  { %959 = vmatpush1.msra.mxu1 %v4536_v26  ;;  %v4614_v26 = vld [vmem:[%s7796_s5 + $0x2d0] sm:$0xff] }
 0x118   :  { %960 = vmatprep.subr.mxu1 %v4535_v28  ;;  %v4613_v28 = vld [vmem:[%s7796_s5 + $0x2c8] sm:$0xff] }
 0x119   :  { %961 = vmatpush1.msra.mxu1 %v4534_v30  ;;  %v4612_v30 = vld [vmem:[%s7796_s5 + $0x2c0] sm:$0xff] }
 0x11a   :  { %962 = vmatprep.subr.mxu1 %v4533_v32  ;;  %v4606_v32 = vld [vmem:[%s7796_s5 + $0x2b0] sm:$0xf] }
 0x11b   :  { %963 = vmatpush1.msra.mxu1 %v4532_v35  ;;  %v4605_v35 = vld [vmem:[%s7796_s5 + $0x2a8] sm:$0xff] }
 0x11c   :  { %964 = vmatprep.subr.mxu1 %v4531_v38  ;;  %v4604_v38 = vld [vmem:[%s7796_s5 + $0x2a0] sm:$0xff] }
 0x11d   :  { %965 = vmatpush1.msra.mxu1 %v4530_v39  ;;  %v4602_v39 = vld [vmem:[%s7796_s5 + $0x290] sm:$0xff] }
 0x11e   :  { %4556 = vmatprep.subr.msk.mxu1 %vm682_vm1, %v896_v42  ;;  %v4601_v42 = vld [vmem:[%s7796_s5 + $0x288] sm:$0xff] }
 0x1c8   :  { %v755_v0 = vpop.f32.mrf.mxu1 }
 0x1ca   :  { %v757_v1 = vpop.f32.mrf.mxu1 }
 0x1cb   :  { %4528 = vmatprep.mubr.msk.f32.mxu0 %vm787_vm3, %v757_v1  ;;  %v4625_v1 = vld [vmem:[%s7796_s5 + $0x328] sm:$0xff] }
 0x1cc   :  { %v761_v4 = vpop.f32.mrf.mxu1  ;;  %859 = vmatmul.mubr.f32.vlgmr.msra.gmra.mxu0 %v755_v0  ;;  %v888_v0 = vld [vmem:[%s7796_s5 + $0x68] sm:$0xff] }
 0x1cd   :  { %4583 = vmatpush1.msk.msra.mxu0 %vm682_vm1, %v4580_v2  ;;  %v887_v2 = vld [vmem:[%s7796_s5 + $0x60] sm:$0xff] }
 0x1ce   :  { %v763_v8 = vpop.f32.mrf.mxu1  ;;  %1149 = vmatprep.subr.mxu0 %v4579_v3  ;;  %v4624_v3 = vld [vmem:[%s7796_s5 + $0x320] sm:$0xff] }
 0x1cf   :  { %4529 = vmatprep.mubr.msk.f32.mxu0 %vm787_vm3, %v763_v8  ;;  %1150 = vmatpush1.msra.mxu0 %v4578_v5  ;;  %v4623_v5 = vld [vmem:[%s7796_s5 + $0x318] sm:$0xff]  ;;  %v4622_v8 = vld [vmem:[%s7796_s5 + $0x310] sm:$0xff] }
 0x1d0   :  { %864 = vmatmul.mubr.f32.gmra.mxu0 %v761_v4  ;;  %1151 = vmatprep.subr.mxu0 %v4577_v7  ;;  %v886_v4 = vld [vmem:[%s7796_s5 + $0x58] sm:$0xff]  ;;  %v885_v7 = vld [vmem:[%s7796_s5 + $0x50] sm:$0xff] }
 0x1d1   :  { %1152 = vmatpush1.msra.mxu0 %v4576_v9  ;;  %1201 = vmatprep.mubr.f32.mxu0 %v5465_v18  ;;  %v884_v9 = vld [vmem:[%s7796_s5 + $0x48] sm:$0xff] }
 0x1d2   :  { %1153 = vmatprep.subr.mxu0 %v4575_v10  ;;  %v4621_v10 = vld [vmem:[%s7796_s5 + $0x308] sm:$0xff] }
 0x1d3   :  { %1154 = vmatpush1.msra.mxu0 %v4574_v11  ;;  %v883_v11 = vld [vmem:[%s7796_s5 + $0x40] sm:$0xff] }
 0x1d4   :  { %1155 = vmatprep.subr.mxu0 %v4573_v13  ;;  %v4620_v13 = vld [vmem:[%s7796_s5 + $0x300] sm:$0xff] }
 0x1d5   :  { %1156 = vmatpush1.msra.mxu0 %v4572_v14  ;;  %v882_v14 = vld [vmem:[%s7796_s5 + $0x38] sm:$0xff] }
 0x1d6   :  { %1157 = vmatprep.subr.mxu0 %v4571_v19  ;;  %v881_v19 = vld [vmem:[%s7796_s5 + $0x30] sm:$0xff] }
 0x1d7   :  { %1158 = vmatpush1.msra.mxu0 %v4570_v16  ;;  %v880_v16 = vld [vmem:[%s7796_s5 + $0x28] sm:$0xff] }
 0x1d8   :  { %1159 = vmatprep.subr.mxu0 %v4569_v21  ;;  %v879_v21 = vld [vmem:[%s7796_s5 + $0x20] sm:$0xff] }
 0x1d9   :  { %1160 = vmatpush1.msra.mxu0 %v4568_v23  ;;  %v878_v23 = vld [vmem:[%s7796_s5 + $0x18] sm:$0xff] }
 0x1da   :  { %1161 = vmatprep.subr.mxu0 %v4567_v25  ;;  %v877_v25 = vld [vmem:[%s7796_s5 + $0x10] sm:$0xff] }
 0x1db   :  { %1162 = vmatpush1.msra.mxu0 %v4566_v27  ;;  %v876_v27 = vld [vmem:[%s7796_s5 + $0x8] sm:$0xff] }
 0x1dc   :  { %1163 = vmatprep.subr.mxu0 %v4565_v29  ;;  %v875_v29 = vld [vmem:[%s7796_s5] sm:$0xff] }
 0x1dd   :  { %1164 = vmatpush1.msra.mxu0 %v4564_v31  ;;  %v4607_v31 = vld [vmem:[%s7796_s5 + $0x2b8] sm:$0xf] }
 0x1de   :  { %1165 = vmatprep.subr.mxu0 %v4563_v33 }
 0x1df   :  { %1166 = vmatpush1.msra.mxu0 %v4562_v37 }
 0x1e0   :  { %1167 = vmatprep.subr.mxu0 %v4561_v40  ;;  %v4603_v40 = vld [vmem:[%s7796_s5 + $0x298] sm:$0xff] }
 0x1e1   :  { %1168 = vmatpush1.msra.mxu0 %v4560_v41 }
 0x1e2   :  { %4634 = vmatprep.subr.msk.mxu0 %vm682_vm1, %v4633_v43 }
 0x28c   :  { %v860_v44 = vpop.f32.mrf.mxu0 }
 0x28d   :  { %870 = vst.msk [vmem:[#allocation2] sm:$0xff] %vm869_vm4, %v860_v44  ;;  %v4600_v44 = vld [vmem:[%s7796_s5 + $0x280] sm:$0xff] }
 0x28e   :  { %v862_v36 = vpop.f32.mrf.mxu0 }
 0x28f   :  { %v4599_v36 = vld [vmem:[%s7796_s5 + $0x278] sm:$0xff] }
 0x290   :  { %v865_v45 = vpop.f32.mrf.mxu0 }
 0x291   :  { %872 = vst.msk [vmem:[#allocation2 + $0x8] sm:$0x3f] %vm871_vm5, %v865_v45  ;;  %v4598_v45 = vld [vmem:[%s7796_s5 + $0x270] sm:$0xff] }
 0x292   :  { %v867_v34 = vpop.f32.mrf.mxu0 }
 0x293   :  { %v4597_v34 = vld [vmem:[%s7796_s5 + $0x268] sm:$0xff] }
 0x294   :  { %v873_v33 = vld [vmem:[#allocation2] sm:$0xff] }
 0x298   :  { %v897_v49 = vld [vmem:[#allocation2 + $0x1] sm:$0xff]  ;;  %v898_v59 = vld [vmem:[#allocation2 + $0x9] sm:$0x3]  ;;  %v1337_v43 = vld [vmem:[#allocation2 + $0xc] sm:$0x3] }
 0x299   :  { %v1100_v50 = vld [vmem:[#allocation2 + $0x2] sm:$0xff]  ;;  %4554 = vmatmul.mubr.msk.f32.vlgmr.msra.gmra.mxu1 %vm869_vm4, %v897_v49  ;;  %v1101_v60 = vld [vmem:[#allocation2 + $0xa] sm:$0x3] }
 0x29a   :  { %4584 = vmatmul.mubr.msk.f32.vlgmr.msra.gmra.mxu0 %vm869_vm4, %v1100_v50  ;;  %4557 = vmatpush1.msk.msra.mxu1 %vm682_vm1, %v895_v47  ;;  %v1336_v37 = vld [vmem:[#allocation2 + $0x4] sm:$0xff] }
 0x29b   :  { %4635 = vmatpush1.msk.msra.mxu0 %vm682_vm1, %v4632_v48  ;;  %1035 = vmatprep.subr.mxu1 %v894_v46  ;;  %v874_v41 = vld [vmem:[#allocation2 + $0x8] sm:$0x3]  ;;  %v4596_v47 = vld [vmem:[%s7796_s5 + $0x260] sm:$0xff]  ;;  %v4595_v48 = vld [vmem:[%s7796_s5 + $0x258] sm:$0xff] }
 0x29c   :  { %1385 = vmatprep.subr.mxu0 %v4631_v51  ;;  %1036 = vmatpush1.msra.mxu1 %v893_v52  ;;  %v4594_v46 = vld [vmem:[%s7796_s5 + $0x250] sm:$0xff]  ;;  %v4593_v49 = vld [vmem:[%s7796_s5 + $0x248] sm:$0xff]  ;;  %v4592_v50 = vld [vmem:[%s7796_s5 + $0x240] sm:$0xff] }
 0x29d   :  { %1386 = vmatpush1.msra.mxu0 %v4630_v53  ;;  %1004 = vmatprep.mubr.f32.mxu1 %v5465_v18  ;;  %v4591_v51 = vld [vmem:[%s7796_s5 + $0x238] sm:$0xff]  ;;  %v4590_v52 = vld [vmem:[%s7796_s5 + $0x230] sm:$0xff]  ;;  %v4589_v53 = vld [vmem:[%s7796_s5 + $0x228] sm:$0xff] }
 0x29e   :  { %1037 = vmatprep.subr.mxu1 %v892_v54  ;;  %1207 = vmatprep.mubr.f32.mxu0 %v5465_v18  ;;  %v4588_v54 = vld [vmem:[%s7796_s5 + $0x220] sm:$0xff] }
 0x29f   :  { %1387 = vmatprep.subr.mxu0 %v4629_v55  ;;  %4555 = vmatmul.mubr.msk.f32.gmra.mxu1 %vm869_vm4, %v898_v59  ;;  %v4587_v55 = vld [vmem:[%s7796_s5 + $0x218] sm:$0xff] }
 0x2a0   :  { %4585 = vmatmul.mubr.msk.f32.gmra.mxu0 %vm869_vm4, %v1101_v60  ;;  %1038 = vmatpush1.msra.mxu1 %v891_v56  ;;  %v4586_v56 = vld [vmem:[%s7796_s5 + $0x210] sm:$0xff] }
 0x2a1   :  { %1388 = vmatpush1.msra.mxu0 %v4628_v57  ;;  %1039 = vmatprep.subr.mxu1 %v890_v58  ;;  %v1218_v57 = vld [vmem:[#allocation2 + $0x3] sm:$0xff]  ;;  %v1219_v58 = vld [vmem:[#allocation2 + $0xb] sm:$0x3] }
 0x2a2   :  { %1389 = vmatprep.subr.mxu0 %v4627_v61  ;;  %1040 = vmatpush1.msra.mxu1 %v889_v62 }
 0x2a3   :  { %1390 = vmatpush1.msra.mxu0 %v4626_v63  ;;  %1041 = vmatprep.subr.mxu1 %v888_v0 }
 0x2a4   :  { %1391 = vmatprep.subr.mxu0 %v4625_v1  ;;  %1042 = vmatpush1.msra.mxu1 %v887_v2 }
 0x2a5   :  { %1392 = vmatpush1.msra.mxu0 %v4624_v3  ;;  %1043 = vmatprep.subr.mxu1 %v886_v4 }
 0x2a6   :  { %1393 = vmatprep.subr.mxu0 %v4623_v5  ;;  %1044 = vmatpush1.msra.mxu1 %v885_v7 }
 0x2a7   :  { %1394 = vmatpush1.msra.mxu0 %v4622_v8  ;;  %1045 = vmatprep.subr.mxu1 %v884_v9 }
 0x2a8   :  { %1395 = vmatprep.subr.mxu0 %v4621_v10  ;;  %1046 = vmatpush1.msra.mxu1 %v883_v11 }
 0x2a9   :  { %1396 = vmatpush1.msra.mxu0 %v4620_v13  ;;  %1047 = vmatprep.subr.mxu1 %v882_v14 }
 0x2aa   :  { %1397 = vmatprep.subr.mxu0 %v4619_v15  ;;  %1048 = vmatpush1.msra.mxu1 %v881_v19 }
 0x2ab   :  { %1398 = vmatpush1.msra.mxu0 %v4618_v20  ;;  %1049 = vmatprep.subr.mxu1 %v880_v16 }
 0x2ac   :  { %1399 = vmatprep.subr.mxu0 %v4617_v17  ;;  %1050 = vmatpush1.msra.mxu1 %v879_v21 }
 0x2ad   :  { %1400 = vmatpush1.msra.mxu0 %v4616_v22  ;;  %1051 = vmatprep.subr.mxu1 %v878_v23 }
 0x2ae   :  { %1401 = vmatprep.subr.mxu0 %v4615_v24  ;;  %1052 = vmatpush1.msra.mxu1 %v877_v25  ;;  %v1454_v25 = vld [vmem:[%s7797_s6] sm:$0x3] }
 0x2af   :  { %1402 = vmatpush1.msra.mxu0 %v4614_v26  ;;  %1053 = vmatprep.subr.mxu1 %v876_v27 }
 0x2b0   :  { %1403 = vmatprep.subr.mxu0 %v4613_v28  ;;  %1054 = vmatpush1.msra.mxu1 %v875_v29 }
 0x2b1   :  { %1087 = vmatprep.mubr.f32.mxu1 %v5465_v18  ;;  %1404 = vmatpush1.msra.mxu0 %v4612_v30 }
 0x2b2   :  { %1437 = vmatprep.mubr.f32.mxu0 %v5465_v18  ;;  %4558 = vmatmul.mubr.msk.f32.vlgmr.msra.gmra.mxu1 %vm869_vm4, %v873_v33 }
 0x2b3   :  { %4608 = vmatprep.subr.msk.mxu1 %vm682_vm1, %v4607_v31  ;;  %4636 = vmatmul.mubr.msk.f32.vlgmr.msra.gmra.mxu0 %vm869_vm4, %v1336_v37  ;;  %v1459_v37 = vrot.slane %v1454_v25, %v5846_v6 }
 0x2b4   :  { %4609 = vmatpush1.msk.msra.mxu1 %vm682_vm1, %v4606_v32  ;;  %1093 = vmatprep.mubr.f32.mxu1 %v5465_v18  ;;  %v1463_v32 = vrot.slane %v1454_v25, %v5851_v12  ;;  %v1654_v25 = vld [vmem:[%s7800_s9] sm:$0xff] }
 0x2b5   :  { %1267 = vmatprep.subr.mxu1 %v4605_v35  ;;  %1443 = vmatprep.mubr.f32.mxu0 %v5465_v18 }
 0x2b6   :  { %1268 = vmatpush1.msra.mxu1 %v4604_v38  ;;  %5094 = vmatprep.subr.mxu0 %v5465_v18 }
 0x2b7   :  { %4559 = vmatmul.mubr.msk.f32.gmra.mxu1 %vm869_vm4, %v874_v41  ;;  %1269 = vmatprep.subr.mxu1 %v4603_v40 }
 0x2b8   :  { %4637 = vmatmul.mubr.msk.f32.gmra.mxu0 %vm869_vm4, %v1337_v43  ;;  %1270 = vmatpush1.msra.mxu1 %v4602_v39 }
 0x2b9   :  { %1271 = vmatprep.subr.mxu1 %v4601_v42  ;;  %1319 = vmatprep.mubr.f32.mxu1 %v5465_v18 }
 0x2ba   :  { %1272 = vmatpush1.msra.mxu1 %v4600_v44  ;;  %5114 = vmatprep.mubr.msk.f32.mxu0 %vm5466_vm8, %v5465_v18 }
 0x2bb   :  { %1273 = vmatprep.subr.mxu1 %v4599_v36 }
 0x2bc   :  { %1274 = vmatpush1.msra.mxu1 %v4598_v45 }
 0x2bd   :  { %1275 = vmatprep.subr.mxu1 %v4597_v34  ;;  %v1474_v34 = vld [vmem:[%s7798_s7] sm:$0x1f] }
 0x2be   :  { %1276 = vmatpush1.msra.mxu1 %v4596_v47  ;;  %v1572_v47 = vld [vmem:[%s7799_s8 + $0x78] sm:$0xff] }
 0x2bf   :  { %1277 = vmatprep.subr.mxu1 %v4595_v48  ;;  %v1571_v48 = vld [vmem:[%s7799_s8 + $0x70] sm:$0xff] }
 0x2c0   :  { %1278 = vmatpush1.msra.mxu1 %v4594_v46  ;;  %v1570_v46 = vld [vmem:[%s7799_s8 + $0x68] sm:$0xff] }
 0x2c1   :  { %1279 = vmatprep.subr.mxu1 %v4593_v49  ;;  %v1569_v49 = vld [vmem:[%s7799_s8 + $0x60] sm:$0xff] }
 0x2c2   :  { %1280 = vmatpush1.msra.mxu1 %v4592_v50  ;;  %v1568_v50 = vld [vmem:[%s7799_s8 + $0x58] sm:$0xff] }
 0x2c3   :  { %1281 = vmatprep.subr.mxu1 %v4591_v51  ;;  %v1567_v51 = vld [vmem:[%s7799_s8 + $0x50] sm:$0xff] }
 0x2c4   :  { %1282 = vmatpush1.msra.mxu1 %v4590_v52  ;;  %v1566_v52 = vld [vmem:[%s7799_s8 + $0x48] sm:$0xff] }
 0x2c5   :  { %1283 = vmatprep.subr.mxu1 %v4589_v53  ;;  %v1565_v53 = vld [vmem:[%s7799_s8 + $0x40] sm:$0xff] }
 0x2c6   :  { %1284 = vmatpush1.msra.mxu1 %v4588_v54  ;;  %v1564_v54 = vld [vmem:[%s7799_s8 + $0x38] sm:$0xff] }
 0x2c7   :  { %1285 = vmatprep.subr.mxu1 %v4587_v55  ;;  %v1563_v55 = vld [vmem:[%s7799_s8 + $0x30] sm:$0xff] }
 0x2c8   :  { %1286 = vmatpush1.msra.mxu1 %v4586_v56  ;;  %v1562_v56 = vld [vmem:[%s7799_s8 + $0x28] sm:$0xff] }
 0x2c9   :  { %4610 = vmatmul.mubr.msk.f32.vlgmr.msra.gmra.mxu1 %vm869_vm4, %v1218_v57  ;;  %v1561_v57 = vld [vmem:[%s7799_s8 + $0x20] sm:$0xff] }
 0x2ca   :  { %1325 = vmatprep.mubr.f32.mxu1 %v5465_v18 }
 0x2cd   :  { %4611 = vmatmul.mubr.msk.f32.gmra.mxu1 %vm869_vm4, %v1219_v58  ;;  %v1560_v58 = vld [vmem:[%s7799_s8 + $0x18] sm:$0xff] }
 0x2ce   :  { %1550 = vmatprep.mubr.f32.mxu1 %v5465_v18 }
 0x359   :  { %v1000_v59 = vpop.f32.mrf.mxu1 }
 0x35a   :  { %v1203_v62 = vpop.f32.mrf.mxu0 }
 0x35b   :  { %v1002_v60 = vpop.f32.mrf.mxu1 }
 0x35c   :  { %v1205_v0 = vpop.f32.mrf.mxu0 }
 0x35f   :  { %v1006_v61 = vpop.f32.mrf.mxu1 }
 0x360   :  { %v1209_v2 = vpop.f32.mrf.mxu0 }
 0x361   :  { %v1008_v63 = vpop.f32.mrf.mxu1 }
 0x362   :  { %v1211_v4 = vpop.f32.mrf.mxu0 }
 0x372   :  { %v1089_v1 = vpop.f32.mrf.mxu1 }
 0x373   :  { %v1439_v7 = vpop.f32.mrf.mxu0  ;;  %v1090_v9 = vadd.f32 %v1089_v1, %v1000_v59  ;;  %v1559_v59 = vld [vmem:[%s7799_s8 + $0x10] sm:$0xff]  ;;  %v1573_v1 = vld [vmem:[%s7799_s8 + $0x80] sm:$0xff] }
 0x374   :  { %v1091_v3 = vpop.f32.mrf.mxu1 }
 0x375   :  { %v1092_v8 = vadd.f32 %v1091_v3, %v1002_v60  ;;  %v1441_v13 = vpop.f32.mrf.mxu0  ;;  %v1214_v20 = vadd.f32 %v1203_v62, %v1090_v9  ;;  %v1558_v60 = vld [vmem:[%s7799_s8 + $0x8] sm:$0xff]  ;;  %v1576_v62 = vld [vmem:[%s7799_s8 + $0x98] sm:$0xff]  ;;  %v1662_v3 = vld [vmem:[%s7800_s9 + $0x40] sm:$0xff] }
 0x377   :  { %v1095_v5 = vpop.f32.mrf.mxu1  ;;  %v1215_v19 = vadd.f32 %v1205_v0, %v1092_v8  ;;  %v1574_v0 = vld [vmem:[%s7799_s8 + $0x88] sm:$0xff]  ;;  %v1658_v8 = vld [vmem:[%s7800_s9 + $0x20] sm:$0xff] }
 0x378   :  { %v1096_v11 = vadd.f32 %v1095_v5, %v1006_v61  ;;  %v1445_v22 = vpop.f32.mrf.mxu0  ;;  %v1557_v61 = vld [vmem:[%s7799_s8] sm:$0xff]  ;;  %v1660_v5 = vld [vmem:[%s7800_s9 + $0x30] sm:$0xff] }
 0x379   :  { %v1097_v10 = vpop.f32.mrf.mxu1 }
 0x37a   :  { %v1098_v15 = vadd.f32 %v1097_v10, %v1008_v63  ;;  %v1216_v21 = vadd.f32 %v1209_v2, %v1096_v11  ;;  %v1447_v33 = vpop.f32.mrf.mxu0  ;;  %v1575_v63 = vld [vmem:[%s7799_s8 + $0x90] sm:$0xff]  ;;  %v1663_v2 = vld [vmem:[%s7800_s9 + $0x48] sm:$0xff] }
 0x37b   :  { %5095 = vmatpush3.msra.mxu0 %v1663_v2  ;;  %v4663_v11 = vld [vmem:[%s7800_s9 + $0xe8] sm:$0xff]  ;;  %v2096_v2 = vld [vmem:[%s7802_s11 + $0x60] sm:$0xff] }
 0x37c   :  { %v1217_v27 = vadd.f32 %v1211_v4, %v1098_v15  ;;  %5096 = vmatprep.subr.mxu0 %v5465_v18  ;;  %v1661_v4 = vld [vmem:[%s7800_s9 + $0x38] sm:$0xff]  ;;  %v4660_v15 = vld [vmem:[%s7800_s9 + $0xd0] sm:$0xff] }
 0x37d   :  { %5097 = vmatpush3.msra.mxu0 %v1662_v3  ;;  %v2095_v3 = vld [vmem:[%s7802_s11 + $0x58] sm:$0xff] }
 0x37e   :  { %5098 = vmatprep.subr.mxu0 %v5465_v18 }
 0x37f   :  { %5099 = vmatpush3.msra.mxu0 %v1661_v4  ;;  %v2094_v4 = vld [vmem:[%s7802_s11 + $0x50] sm:$0xff] }
 0x380   :  { %5100 = vmatprep.subr.mxu0 %v5465_v18 }
 0x381   :  { %5101 = vmatpush3.msra.mxu0 %v1660_v5  ;;  %v2093_v5 = vld [vmem:[%s7802_s11 + $0x48] sm:$0xff] }
 0x382   :  { %5102 = vmatprep.subr.mxu0 %v5465_v18 }
 0x389   :  { %v1321_v14 = vpop.f32.mrf.mxu1 }
 0x38a   :  { %v1332_v23 = vadd.f32 %v1321_v14, %v1214_v20  ;;  %v4661_v14 = vld [vmem:[%s7800_s9 + $0xd8] sm:$0xff]  ;;  %v4658_v20 = vld [vmem:[%s7800_s9 + $0xc0] sm:$0xff] }
 0x38b   :  { %v1323_v16 = vpop.f32.mrf.mxu1 }
 0x38c   :  { %v1333_v17 = vadd.f32 %v1323_v16, %v1215_v19  ;;  %v1450_v35 = vadd.f32 %v1439_v7, %v1332_v23  ;;  %v1659_v7 = vld [vmem:[%s7800_s9 + $0x28] sm:$0xff]  ;;  %v1657_v16 = vld [vmem:[%s7800_s9 + $0x18] sm:$0xff] }
 0x38d   :  { %v1327_v24 = vpop.f32.mrf.mxu1  ;;  %5103 = vmatpush3.msra.mxu0 %v1659_v7  ;;  %v4659_v19 = vld [vmem:[%s7800_s9 + $0xc8] sm:$0xff]  ;;  %v2092_v7 = vld [vmem:[%s7802_s11 + $0x40] sm:$0xff] }
 0x38e   :  { %v1334_v26 = vadd.f32 %v1327_v24, %v1216_v21  ;;  %v1451_v29 = vadd.f32 %v1441_v13, %v1333_v17  ;;  %v1466_v42 = vadd.f32 %v1459_v37, %v1450_v35  ;;  %5104 = vmatprep.subr.mxu0 %v5465_v18  ;;  %v4662_v13 = vld [vmem:[%s7800_s9 + $0xe0] sm:$0xff]  ;;  %v4657_v17 = vld [vmem:[%s7800_s9 + $0xb8] sm:$0xff]  ;;  %v1656_v21 = vld [vmem:[%s7800_s9 + $0x10] sm:$0xff] }
 0x38f   :  { %v1329_v28 = vpop.f32.mrf.mxu1  ;;  %5105 = vmatpush3.msra.mxu0 %v1658_v8  ;;  %v1655_v23 = vld [vmem:[%s7800_s9 + $0x8] sm:$0xff]  ;;  %v4684_v35 = vld [vmem:[%s7800_s9 + $0x180] sm:$0xff]  ;;  %v2091_v8 = vld [vmem:[%s7802_s11 + $0x38] sm:$0xff] }
 0x390   :  { %v1452_v30 = vadd.f32 %v1445_v22, %v1334_v26  ;;  %v1335_v31 = vadd.f32 %v1329_v28, %v1217_v27  ;;  %v1467_v41 = vadd.f32 %v1463_v32, %v1451_v29  ;;  %v1470_v45 = vmax.f32 %v1466_v42, 0.0  ;;  %5106 = vmatprep.subr.mxu0 %v5465_v18  ;;  %v4656_v22 = vld [vmem:[%s7800_s9 + $0xb0] sm:$0xff]  ;;  %v4655_v24 = vld [vmem:[%s7800_s9 + $0xa8] sm:$0xff]  ;;  %v4654_v26 = vld [vmem:[%s7800_s9 + $0xa0] sm:$0xff] }
 0x391   :  { %5107 = vmatpush3.msra.mxu0 %v1657_v16  ;;  %v4652_v29 = vld [vmem:[%s7800_s9 + $0x98] sm:$0xff]  ;;  %v4681_v42 = vld [vmem:[%s7800_s9 + $0x168] sm:$0xff] }
 0x392   :  { %v1453_v38 = vadd.f32 %v1447_v33, %v1335_v31  ;;  %v1468_v40 = vadd.f32 %v1459_v37, %v1452_v30  ;;  %v1471_v36 = vmax.f32 %v1467_v41, 0.0  ;;  %5108 = vmatprep.subr.mxu0 %v5465_v18  ;;  %v4685_v30 = vld [vmem:[%s7800_s9 + $0x188] sm:$0xff]  ;;  %v4651_v33 = vld [vmem:[%s7800_s9 + $0x90] sm:$0xff]  ;;  %v4648_v41 = vld [vmem:[%s7800_s9 + $0x78] sm:$0xff] }
 0x393   :  { %5109 = vmatpush3.msra.mxu0 %v1656_v21  ;;  %v4650_v37 = vld [vmem:[%s7800_s9 + $0x88] sm:$0xff]  ;;  %v2183_v21 = vld [vmem:[%s7804_s13 + $0x40] sm:$0xff] }
 0x394   :  { %v1469_v39 = vadd.f32 %v1463_v32, %v1453_v38  ;;  %v1472_v44 = vmax.f32 %v1468_v40, 0.0  ;;  %5110 = vmatprep.subr.mxu0 %v5465_v18  ;;  %v4683_v38 = vld [vmem:[%s7800_s9 + $0x178] sm:$0xff]  ;;  %v4649_v40 = vld [vmem:[%s7800_s9 + $0x80] sm:$0xff]  ;;  %v2184_v16 = vld [vmem:[%s7804_s13 + $0x48] sm:$0xff] }
 0x395   :  { %5111 = vmatpush3.msra.mxu0 %v1655_v23  ;;  %v2181_v23 = vld [vmem:[%s7804_s13 + $0x30] sm:$0xff] }
 0x396   :  { %v1473_v43 = vmax.f32 %v1469_v39, 0.0  ;;  %5112 = vmatprep.subr.mxu0 %v5465_v18  ;;  %v4682_v39 = vld [vmem:[%s7800_s9 + $0x170] sm:$0xff] }
 0x397   :  { %5113 = vmatpush3.msra.mxu0 %v1654_v25  ;;  %v2179_v25 = vld [vmem:[%s7804_s13 + $0x20] sm:$0xff] }
 0x398   :  { %4638 = vmatprep.subr.msk.mxu1 %vm1479_vm6, %v1473_v43  ;;  %5117 = vmatprep.subr.mxu0 %v5465_v18  ;;  %v4647_v43 = vld [vmem:[%s7800_s9 + $0x70] sm:$0xff] }
 0x399   :  { %4639 = vmatpush1.msk.msra.mxu1 %vm1479_vm6, %v1472_v44  ;;  %v4680_v44 = vld [vmem:[%s7800_s9 + $0x160] sm:$0xff] }
 0x39a   :  { %1516 = vmatprep.subr.mxu1 %v1471_v36  ;;  %v4646_v36 = vld [vmem:[%s7800_s9 + $0x68] sm:$0xff] }
 0x39b   :  { %1517 = vmatpush1.msra.mxu1 %v1470_v45  ;;  %v4679_v45 = vld [vmem:[%s7800_s9 + $0x158] sm:$0xff] }
 0x39c   :  { %4640 = vmatmul.mubr.msk.f32.vlgmr.msra.gmra.mxu1 %vm1475_vm7, %v1474_v34  ;;  %1580 = vmatprep.subr.mxu1 %v5465_v18  ;;  %v4645_v34 = vld [vmem:[%s7800_s9 + $0x60] sm:$0xff] }
 0x39d   :  { %1581 = vmatpush1.msra.mxu1 %v1572_v47  ;;  %v4678_v47 = vld [vmem:[%s7800_s9 + $0x150] sm:$0xff] }
 0x39e   :  { %1582 = vmatprep.subr.mxu1 %v5465_v18 }
 0x39f   :  { %1583 = vmatpush1.msra.mxu1 %v1571_v48  ;;  %v4644_v48 = vld [vmem:[%s7800_s9 + $0x58] sm:$0xff] }
 0x3a0   :  { %1584 = vmatprep.subr.mxu1 %v5465_v18 }
 0x3a1   :  { %1585 = vmatpush1.msra.mxu1 %v1570_v46  ;;  %v4677_v46 = vld [vmem:[%s7800_s9 + $0x148] sm:$0xff] }
 0x3a2   :  { %1586 = vmatprep.subr.mxu1 %v5465_v18 }
 0x3a3   :  { %1587 = vmatpush1.msra.mxu1 %v1569_v49  ;;  %v4643_v49 = vld [vmem:[%s7800_s9 + $0x50] sm:$0xff] }
 0x3a4   :  { %1588 = vmatprep.subr.mxu1 %v5465_v18 }
 0x3a5   :  { %1589 = vmatpush1.msra.mxu1 %v1568_v50  ;;  %v4676_v50 = vld [vmem:[%s7800_s9 + $0x140] sm:$0xff] }
 0x3a6   :  { %1590 = vmatprep.subr.mxu1 %v5465_v18 }
 0x3a7   :  { %1591 = vmatpush1.msra.mxu1 %v1567_v51  ;;  %v4674_v51 = vld [vmem:[%s7800_s9 + $0x138] sm:$0xff] }
 0x3a8   :  { %1592 = vmatprep.subr.mxu1 %v5465_v18 }
 0x3a9   :  { %1593 = vmatpush1.msra.mxu1 %v1566_v52 }
 0x3aa   :  { %1594 = vmatprep.subr.mxu1 %v5465_v18 }
 0x3ab   :  { %1595 = vmatpush1.msra.mxu1 %v1565_v53 }
 0x3ac   :  { %1596 = vmatprep.subr.mxu1 %v5465_v18 }
 0x3ad   :  { %1597 = vmatpush1.msra.mxu1 %v1564_v54  ;;  %v4673_v54 = vld [vmem:[%s7800_s9 + $0x130] sm:$0xff] }
 0x3ae   :  { %1598 = vmatprep.subr.mxu1 %v5465_v18 }
 0x3af   :  { %1599 = vmatpush1.msra.mxu1 %v1563_v55  ;;  %v4672_v55 = vld [vmem:[%s7800_s9 + $0x128] sm:$0xff] }
 0x3b0   :  { %1600 = vmatprep.subr.mxu1 %v5465_v18 }
 0x3b1   :  { %1601 = vmatpush1.msra.mxu1 %v1562_v56  ;;  %v4671_v56 = vld [vmem:[%s7800_s9 + $0x120] sm:$0xff] }
 0x3b2   :  { %1602 = vmatprep.subr.mxu1 %v5465_v18 }
 0x3b3   :  { %1603 = vmatpush1.msra.mxu1 %v1561_v57  ;;  %v4670_v57 = vld [vmem:[%s7800_s9 + $0x118] sm:$0xff] }
 0x3b4   :  { %1604 = vmatprep.subr.mxu1 %v5465_v18 }
 0x3b5   :  { %1605 = vmatpush1.msra.mxu1 %v1560_v58  ;;  %v4669_v58 = vld [vmem:[%s7800_s9 + $0x110] sm:$0xff] }
 0x3b6   :  { %1606 = vmatprep.subr.mxu1 %v5465_v18 }
 0x3b7   :  { %1607 = vmatpush1.msra.mxu1 %v1559_v59  ;;  %v4668_v59 = vld [vmem:[%s7800_s9 + $0x108] sm:$0xff] }
 0x3b8   :  { %1608 = vmatprep.subr.mxu1 %v5465_v18 }
 0x3b9   :  { %1609 = vmatpush1.msra.mxu1 %v1558_v60  ;;  %v4667_v60 = vld [vmem:[%s7800_s9 + $0x100] sm:$0xff] }
 0x3ba   :  { %1610 = vmatprep.subr.mxu1 %v5465_v18 }
 0x3bb   :  { %1611 = vmatpush1.msra.mxu1 %v1557_v61  ;;  %v4666_v61 = vld [vmem:[%s7800_s9 + $0xf8] sm:$0xff] }
 0x3bc   :  { %1636 = vmatprep.subr.mxu1 %v5465_v18 }
 0x3bd   :  { %1637 = vmatpush2.msra.mxu1 %v1576_v62  ;;  %v4665_v62 = vld [vmem:[%s7800_s9 + $0xf0] sm:$0xff] }
 0x3be   :  { %1638 = vmatprep.subr.mxu1 %v5465_v18 }
 0x3bf   :  { %1639 = vmatpush2.msra.mxu1 %v1575_v63 }
 0x3c0   :  { %1640 = vmatprep.subr.mxu1 %v5465_v18 }
 0x3c1   :  { %1641 = vmatpush2.msra.mxu1 %v1574_v0  ;;  %v2098_v0 = vld [vmem:[%s7802_s11 + $0x70] sm:$0xff] }
 0x3c2   :  { %1642 = vmatprep.subr.mxu1 %v5465_v18 }
 0x3c3   :  { %1643 = vmatpush2.msra.mxu1 %v1573_v1  ;;  %v2097_v1 = vld [vmem:[%s7802_s11 + $0x68] sm:$0xff] }
 0x3c4   :  { %5140 = vmatprep.subr.mxu1 %v5465_v18 }
 0x45c   :  { %v1552_v9 = vpop.f32.mrf.mxu1 }
 0x45e   :  { %v1554_v10 = vpop.f32.mrf.mxu1 }
 0x45f   :  { %4641 = vmatprep.mubr.msk.f32.mxu1 %vm76_vm0, %v1554_v10  ;;  %v2089_v10 = vld [vmem:[%s7802_s11 + $0x28] sm:$0xff] }
 0x460   :  { %1645 = vmatmul.mubr.f32.vlgmr.msra.gmra.mxu1 %v1552_v9  ;;  %v2090_v9 = vld [vmem:[%s7802_s11 + $0x30] sm:$0xff] }
 0x461   :  { %5141 = vmatpush3.msra.mxu1 %v4663_v11  ;;  %5160 = vmatprep.mubr.msk.f32.mxu1 %vm5466_vm8, %v5465_v18  ;;  %v2088_v11 = vld [vmem:[%s7802_s11 + $0x20] sm:$0xff] }
 0x462   :  { %5142 = vmatprep.subr.mxu1 %v5465_v18 }
 0x463   :  { %5143 = vmatpush3.msra.mxu1 %v4662_v13  ;;  %v2087_v13 = vld [vmem:[%s7802_s11 + $0x18] sm:$0xff] }
 0x464   :  { %5144 = vmatprep.subr.mxu1 %v5465_v18 }
 0x465   :  { %5145 = vmatpush3.msra.mxu1 %v4661_v14  ;;  %v2086_v14 = vld [vmem:[%s7802_s11 + $0x10] sm:$0xff] }
 0x466   :  { %5146 = vmatprep.subr.mxu1 %v5465_v18 }
 0x467   :  { %5147 = vmatpush3.msra.mxu1 %v4660_v15  ;;  %v2085_v15 = vld [vmem:[%s7802_s11 + $0x8] sm:$0xff] }
 0x468   :  { %5148 = vmatprep.subr.mxu1 %v5465_v18 }
 0x469   :  { %5149 = vmatpush3.msra.mxu1 %v4659_v19  ;;  %v2084_v19 = vld [vmem:[%s7802_s11] sm:$0xff] }
 0x46a   :  { %5150 = vmatprep.subr.mxu1 %v5465_v18 }
 0x46b   :  { %5151 = vmatpush3.msra.mxu1 %v4658_v20  ;;  %v2185_v20 = vld [vmem:[%s7804_s13 + $0x50] sm:$0xf] }
 0x46c   :  { %5152 = vmatprep.subr.mxu1 %v5465_v18 }
 0x46d   :  { %5153 = vmatpush3.msra.mxu1 %v4657_v17  ;;  %v4705_v17 = vld [vmem:[%s7792_s1 + $0x78] sm:$0xff] }
 0x46e   :  { %5154 = vmatprep.subr.mxu1 %v5465_v18 }
 0x46f   :  { %5155 = vmatpush3.msra.mxu1 %v4656_v22  ;;  %v2182_v22 = vld [vmem:[%s7804_s13 + $0x38] sm:$0xff] }
 0x470   :  { %5156 = vmatprep.subr.mxu1 %v5465_v18 }
 0x471   :  { %5157 = vmatpush3.msra.mxu1 %v4655_v24  ;;  %v2180_v24 = vld [vmem:[%s7804_s13 + $0x28] sm:$0xff] }
 0x472   :  { %5158 = vmatprep.subr.mxu1 %v5465_v18 }
 0x473   :  { %5159 = vmatpush3.msra.mxu1 %v4654_v26  ;;  %v2178_v26 = vld [vmem:[%s7804_s13 + $0x18] sm:$0xff] }
 0x474   :  { %5186 = vmatprep.subr.mxu1 %v5465_v18 }
 0x520   :  { %v1646_v27 = vpop.f32.mrf.mxu1 }
 0x521   :  { %1651 = vst.msk [vmem:[#allocation3] sm:$0x1f] %vm1650_vm9, %v1646_v27  ;;  %v2177_v27 = vld [vmem:[%s7804_s13 + $0x10] sm:$0xff] }
 0x522   :  { %v1648_v28 = vpop.f32.mrf.mxu1 }
 0x528   :  { %v1653_v31 = vld [vmem:[#allocation3] sm:$0x1]  ;;  %v1825_v32 = vld [vmem:[#allocation3 + $0x2] sm:$0x1]  ;;  %v1739_v52 = vld [vmem:[#allocation3 + $0x1] sm:$0x1] }
 0x529   :  { %5115 = vmatmul.mubr.msk.f32.vlgmr.msra.gmra.mxu0 %vm1664_vm10, %v1653_v31  ;;  %5161 = vmatmul.mubr.msk.f32.vlgmr.msra.gmra.mxu1 %vm1664_vm10, %v1825_v32  ;;  %v1997_v53 = vld [vmem:[#allocation3 + $0x4] sm:$0x1]  ;;  %v1911_v63 = vld [vmem:[#allocation3 + $0x3] sm:$0x1] }
 0x52a   :  { %5118 = vmatpush3.msra.mxu0 %v4652_v29  ;;  %5187 = vmatpush3.msra.mxu1 %v4685_v30 }
 0x52b   :  { %5119 = vmatprep.subr.mxu0 %v5465_v18  ;;  %5188 = vmatprep.subr.mxu1 %v5465_v18 }
 0x52c   :  { %5120 = vmatpush3.msra.mxu0 %v4651_v33  ;;  %5189 = vmatpush3.msra.mxu1 %v4684_v35 }
 0x52d   :  { %5121 = vmatprep.subr.mxu0 %v5465_v18  ;;  %5190 = vmatprep.subr.mxu1 %v5465_v18 }
 0x52e   :  { %5122 = vmatpush3.msra.mxu0 %v4650_v37  ;;  %5191 = vmatpush3.msra.mxu1 %v4683_v38  ;;  %v1652_v38 = vld [vmem:[%s7801_s10] sm:$0x1] }
 0x52f   :  { %5123 = vmatprep.subr.mxu0 %v5465_v18  ;;  %5192 = vmatprep.subr.mxu1 %v5465_v18 }
 0x530   :  { %5124 = vmatpush3.msra.mxu0 %v4649_v40  ;;  %5193 = vmatpush3.msra.mxu1 %v4682_v39 }
 0x531   :  { %5125 = vmatprep.subr.mxu0 %v5465_v18  ;;  %5194 = vmatprep.subr.mxu1 %v5465_v18 }
 0x532   :  { %5126 = vmatpush3.msra.mxu0 %v4648_v41  ;;  %5195 = vmatpush3.msra.mxu1 %v4681_v42 }
 0x533   :  { %5127 = vmatprep.subr.mxu0 %v5465_v18  ;;  %5196 = vmatprep.subr.mxu1 %v5465_v18 }
 0x534   :  { %5128 = vmatpush3.msra.mxu0 %v4647_v43  ;;  %5197 = vmatpush3.msra.mxu1 %v4680_v44 }
 0x535   :  { %5129 = vmatprep.subr.mxu0 %v5465_v18  ;;  %5198 = vmatprep.subr.mxu1 %v5465_v18 }
 0x536   :  { %5130 = vmatpush3.msra.mxu0 %v4646_v36  ;;  %5199 = vmatpush3.msra.mxu1 %v4679_v45 }
 0x537   :  { %5131 = vmatprep.subr.mxu0 %v5465_v18  ;;  %5200 = vmatprep.subr.mxu1 %v5465_v18 }
 0x538   :  { %5132 = vmatpush3.msra.mxu0 %v4645_v34  ;;  %5201 = vmatpush3.msra.mxu1 %v4678_v47  ;;  %v4704_v34 = vld [vmem:[%s7792_s1 + $0x70] sm:$0xff]  ;;  %v4703_v47 = vld [vmem:[%s7792_s1 + $0x68] sm:$0xff] }
 0x539   :  { %5133 = vmatprep.subr.mxu0 %v5465_v18  ;;  %5202 = vmatprep.subr.mxu1 %v5465_v18 }
 0x53a   :  { %5134 = vmatpush3.msra.mxu0 %v4644_v48  ;;  %5203 = vmatpush3.msra.mxu1 %v4677_v46  ;;  %v4702_v48 = vld [vmem:[%s7792_s1 + $0x60] sm:$0xff]  ;;  %v4701_v46 = vld [vmem:[%s7792_s1 + $0x58] sm:$0xff] }
 0x53b   :  { %5135 = vmatprep.subr.mxu0 %v5465_v18  ;;  %5204 = vmatprep.subr.mxu1 %v5465_v18 }
 0x53c   :  { %5136 = vmatpush3.msra.mxu0 %v4643_v49  ;;  %5137 = vmatprep.mubr.msk.f32.mxu0 %vm5466_vm8, %v5465_v18  ;;  %v4700_v49 = vld [vmem:[%s7792_s1 + $0x50] sm:$0xff] }
 0x53d   :  { %5205 = vmatpush3.msra.mxu1 %v4676_v50  ;;  %5206 = vmatprep.mubr.msk.f32.mxu1 %vm5466_vm8, %v5465_v18  ;;  %v4699_v50 = vld [vmem:[%s7792_s1 + $0x48] sm:$0xff] }
 0x53e   :  { %5138 = vmatmul.mubr.msk.f32.vlgmr.msra.gmra.mxu0 %vm1664_vm10, %v1739_v52  ;;  %5163 = vmatprep.subr.mxu0 %v5465_v18  ;;  %v4694_v52 = vld [vmem:[%s7791_s0 + $0x21] sm:$0xff] }
 0x53f   :  { %5207 = vmatmul.mubr.msk.f32.vlgmr.msra.gmra.mxu1 %vm1664_vm10, %v1997_v53  ;;  %5164 = vmatpush3.msra.mxu0 %v4674_v51  ;;  %v4698_v51 = vld [vmem:[%s7792_s1 + $0x40] sm:$0xff]  ;;  %v4695_v53 = vld [vmem:[%s7791_s0 + $0x29] sm:$0xff] }
 0x540   :  { %5165 = vmatprep.subr.mxu0 %v5465_v18  ;;  %5183 = vmatprep.mubr.msk.f32.mxu0 %vm5466_vm8, %v5465_v18 }
 0x541   :  { %5166 = vmatpush3.msra.mxu0 %v4673_v54  ;;  %5242 = vmatprep.subr.mxu1 %v5465_v18  ;;  %v2176_v54 = vld [vmem:[%s7804_s13 + $0x8] sm:$0xff] }
 0x542   :  { %5167 = vmatprep.subr.mxu0 %v5465_v18  ;;  %5264 = vmatprep.mubr.msk.f32.mxu1 %vm5466_vm8, %v5465_v18 }
 0x543   :  { %5168 = vmatpush3.msra.mxu0 %v4672_v55  ;;  %5243 = vmatpush3.msk.msra.mxu1 %vm682_vm1, %v2185_v20  ;;  %v2175_v55 = vld [vmem:[%s7804_s13] sm:$0xff] }
 0x544   :  { %5169 = vmatprep.subr.mxu0 %v5465_v18  ;;  %5244 = vmatprep.subr.mxu1 %v5465_v18  ;;  %v4746_v20 = vld [vmem:[%s7791_s0 + $0x24] sm:$0xff] }
 0x545   :  { %5170 = vmatpush3.msra.mxu0 %v4671_v56  ;;  %5245 = vmatpush3.msra.mxu1 %v2184_v16  ;;  %v4696_v56 = vld [vmem:[%s7791_s0 + $0x31] sm:$0xff] }
 0x546   :  { %5171 = vmatprep.subr.mxu0 %v5465_v18  ;;  %5246 = vmatprep.subr.mxu1 %v5465_v18  ;;  %v4747_v16 = vld [vmem:[%s7791_s0 + $0x2c] sm:$0xff] }
 0x547   :  { %5172 = vmatpush3.msra.mxu0 %v4670_v57  ;;  %5247 = vmatpush3.msra.mxu1 %v2183_v21  ;;  %v2277_v57 = vld [vmem:[%s7792_s1 + $0x38] sm:$0xff] }
 0x548   :  { %5173 = vmatprep.subr.mxu0 %v5465_v18  ;;  %5248 = vmatprep.subr.mxu1 %v5465_v18  ;;  %v4749_v21 = vld [vmem:[%s7791_s0 + $0x3c] sm:$0xf] }
 0x549   :  { %5174 = vmatpush3.msra.mxu0 %v4669_v58  ;;  %5249 = vmatpush3.msra.mxu1 %v2182_v22  ;;  %v4725_v58 = vld [vmem:[%s7792_s1 + $0xb8] sm:$0xff]  ;;  %v2099_v22 = vld [vmem:[%s7803_s12] sm:$0x1] }
 0x54a   :  { %5175 = vmatprep.subr.mxu0 %v5465_v18  ;;  %5250 = vmatprep.subr.mxu1 %v5465_v18 }
 0x54b   :  { %5176 = vmatpush3.msra.mxu0 %v4668_v59  ;;  %5251 = vmatpush3.msra.mxu1 %v2181_v23  ;;  %v4724_v59 = vld [vmem:[%s7792_s1 + $0xb0] sm:$0xff] }
 0x54c   :  { %5177 = vmatprep.subr.mxu0 %v5465_v18  ;;  %5252 = vmatprep.subr.mxu1 %v5465_v18 }
 0x54d   :  { %5178 = vmatpush3.msra.mxu0 %v4667_v60  ;;  %5253 = vmatpush3.msra.mxu1 %v2180_v24  ;;  %v4723_v60 = vld [vmem:[%s7792_s1 + $0xa8] sm:$0xff] }
 0x54e   :  { %5179 = vmatprep.subr.mxu0 %v5465_v18  ;;  %5254 = vmatprep.subr.mxu1 %v5465_v18 }
 0x54f   :  { %5180 = vmatpush3.msra.mxu0 %v4666_v61  ;;  %5255 = vmatpush3.msra.mxu1 %v2179_v25  ;;  %v4722_v61 = vld [vmem:[%s7792_s1 + $0xa0] sm:$0xff] }
 0x550   :  { %5181 = vmatprep.subr.mxu0 %v5465_v18  ;;  %5256 = vmatprep.subr.mxu1 %v5465_v18 }
 0x551   :  { %5182 = vmatpush3.msra.mxu0 %v4665_v62  ;;  %5257 = vmatpush3.msra.mxu1 %v2178_v26  ;;  %v4697_v62 = vld [vmem:[%s7791_s0 + $0x39] sm:$0xf] }
 0x552   :  { %5184 = vmatmul.mubr.msk.f32.vlgmr.msra.gmra.mxu0 %vm1664_vm10, %v1911_v63  ;;  %5209 = vmatprep.subr.mxu0 %v5465_v18  ;;  %v4721_v63 = vld [vmem:[%s7792_s1 + $0x98] sm:$0xff] }
 0x553   :  { %5239 = vmatprep.mubr.msk.f32.mxu0 %vm5466_vm8, %v5465_v18  ;;  %5210 = vmatpush3.msra.mxu0 %v2098_v0  ;;  %v4720_v0 = vld [vmem:[%s7792_s1 + $0x90] sm:$0xff] }
 0x554   :  { %5211 = vmatprep.subr.mxu0 %v5465_v18  ;;  %5258 = vmatprep.subr.mxu1 %v5465_v18 }
 0x555   :  { %5212 = vmatpush3.msra.mxu0 %v2097_v1  ;;  %5259 = vmatpush3.msra.mxu1 %v2177_v27  ;;  %v4719_v1 = vld [vmem:[%s7792_s1 + $0x88] sm:$0xff]  ;;  %v2276_v27 = vld [vmem:[%s7792_s1 + $0x30] sm:$0xff] }
 0x556   :  { %5213 = vmatprep.subr.mxu0 %v5465_v18  ;;  %5260 = vmatprep.subr.mxu1 %v5465_v18 }
 0x557   :  { %5214 = vmatpush3.msra.mxu0 %v2096_v2  ;;  %5261 = vmatpush3.msra.mxu1 %v2176_v54  ;;  %v4718_v2 = vld [vmem:[%s7792_s1 + $0x80] sm:$0xff]  ;;  %v2985_v54 = vld [vmem:[%s7795_s4 + $0x58] sm:$0xff] }
 0x558   :  { %5215 = vmatprep.subr.mxu0 %v5465_v18  ;;  %5262 = vmatprep.subr.mxu1 %v5465_v18 }
 0x559   :  { %5216 = vmatpush3.msra.mxu0 %v2095_v3  ;;  %5263 = vmatpush3.msra.mxu1 %v2175_v55  ;;  %v4714_v3 = vld [vmem:[%s7791_s0 + $0x22] sm:$0xff]  ;;  %v2984_v55 = vld [vmem:[%s7795_s4 + $0x50] sm:$0xff] }
 0x55a   :  { %5217 = vmatprep.subr.mxu0 %v5465_v18  ;;  %2427 = vmatprep.subr.mxu1 %v2277_v57  ;;  %v2982_v57 = vld [vmem:[%s7795_s4 + $0x40] sm:$0xff] }
 0x55b   :  { %5218 = vmatpush3.msra.mxu0 %v2094_v4  ;;  %v4715_v4 = vld [vmem:[%s7791_s0 + $0x2a] sm:$0xff] }
 0x55c   :  { %5219 = vmatprep.subr.mxu0 %v5465_v18 }
 0x55d   :  { %5220 = vmatpush3.msra.mxu0 %v2093_v5  ;;  %v4716_v5 = vld [vmem:[%s7791_s0 + $0x32] sm:$0xff] }
 0x55e   :  { %5221 = vmatprep.subr.mxu0 %v5465_v18 }
 0x55f   :  { %5222 = vmatpush3.msra.mxu0 %v2092_v7  ;;  %v4757_v7 = vld [vmem:[%s7792_s1 + $0x138] sm:$0xff] }
 0x560   :  { %5223 = vmatprep.subr.mxu0 %v5465_v18 }
 0x561   :  { %5224 = vmatpush3.msra.mxu0 %v2091_v8  ;;  %v4756_v8 = vld [vmem:[%s7792_s1 + $0x130] sm:$0xff] }
 0x562   :  { %5225 = vmatprep.subr.mxu0 %v5465_v18 }
 0x563   :  { %5226 = vmatpush3.msra.mxu0 %v2090_v9  ;;  %v4755_v9 = vld [vmem:[%s7792_s1 + $0x128] sm:$0xff] }
 0x564   :  { %5227 = vmatprep.subr.mxu0 %v5465_v18 }
 0x565   :  { %5228 = vmatpush3.msra.mxu0 %v2089_v10  ;;  %v4754_v10 = vld [vmem:[%s7792_s1 + $0x120] sm:$0xff] }
 0x566   :  { %5229 = vmatprep.subr.mxu0 %v5465_v18 }
 0x567   :  { %5230 = vmatpush3.msra.mxu0 %v2088_v11  ;;  %v4717_v11 = vld [vmem:[%s7791_s0 + $0x3a] sm:$0xf] }
 0x568   :  { %5231 = vmatprep.subr.mxu0 %v5465_v18 }
 0x569   :  { %5232 = vmatpush3.msra.mxu0 %v2087_v13  ;;  %v4753_v13 = vld [vmem:[%s7792_s1 + $0x118] sm:$0xff] }
 0x56a   :  { %5233 = vmatprep.subr.mxu0 %v5465_v18 }
 0x56b   :  { %5234 = vmatpush3.msra.mxu0 %v2086_v14  ;;  %v4752_v14 = vld [vmem:[%s7792_s1 + $0x110] sm:$0xff] }
 0x56c   :  { %5235 = vmatprep.subr.mxu0 %v5465_v18 }
 0x56d   :  { %5236 = vmatpush3.msra.mxu0 %v2085_v15  ;;  %v4751_v15 = vld [vmem:[%s7792_s1 + $0x108] sm:$0xff] }
 0x56e   :  { %5237 = vmatprep.subr.mxu0 %v5465_v18 }
 0x56f   :  { %5238 = vmatpush3.msra.mxu0 %v2084_v19  ;;  %v4750_v19 = vld [vmem:[%s7792_s1 + $0x100] sm:$0xff] }
 0x570   :  { %2326 = vmatprep.subr.mxu0 %v4705_v17  ;;  %v4748_v17 = vld [vmem:[%s7791_s0 + $0x34] sm:$0xff] }
 0x5e9   :  { %v1734_v28 = vpop.f32.mrf.mxu0  ;;  %v1906_v29 = vpop.f32.mrf.mxu1 }
 0x5ea   :  { %v1738_v40 = vadd.f32 %v1734_v28, %v1652_v38  ;;  %v2275_v28 = vld [vmem:[%s7792_s1 + $0x28] sm:$0xff]  ;;  %v4740_v38 = vld [vmem:[%s7792_s1 + $0xf0] sm:$0xff] }
 0x5eb   :  { %v5116_v30 = vpop.f32.mrf.mxu0  ;;  %v5162_v31 = vpop.f32.mrf.mxu1 }
 0x5ec   :  { %v2273_v30 = vld [vmem:[%s7792_s1 + $0x18] sm:$0xff]  ;;  %v2272_v31 = vld [vmem:[%s7792_s1 + $0x10] sm:$0xff] }
 0x5fe   :  { %v1820_v32 = vpop.f32.mrf.mxu0 }
 0x5ff   :  { %v2078_v33 = vpop.f32.mrf.mxu1  ;;  %v1824_v39 = vadd.f32 %v1820_v32, %v1738_v40  ;;  %v2271_v32 = vld [vmem:[%s7792_s1 + $0x8] sm:$0xff] }
 0x600   :  { %v5139_v35 = vpop.f32.mrf.mxu0  ;;  %v4739_v40 = vld [vmem:[%s7792_s1 + $0xe8] sm:$0xff] }
 0x601   :  { %v5208_v37 = vpop.f32.mrf.mxu1  ;;  %v1910_v41 = vadd.f32 %v1906_v29, %v1824_v39  ;;  %v2274_v29 = vld [vmem:[%s7792_s1 + $0x20] sm:$0xff] }
 0x602   :  { %v4690_v35 = vld [vmem:[%s7791_s0 + $0x20] sm:$0xff]  ;;  %v4741_v37 = vld [vmem:[%s7792_s1 + $0xf8] sm:$0xff] }
 0x603   :  { %v4738_v39 = vld [vmem:[%s7792_s1 + $0xe0] sm:$0xff] }
 0x612   :  { %v1992_v42 = vpop.f32.mrf.mxu0 }
 0x613   :  { %v1996_v43 = vadd.f32 %v1992_v42, %v1910_v41  ;;  %v4691_v41 = vld [vmem:[%s7791_s0 + $0x28] sm:$0xff]  ;;  %v4737_v42 = vld [vmem:[%s7792_s1 + $0xd8] sm:$0xff] }
 0x614   :  { %v5185_v44 = vpop.f32.mrf.mxu0 }
 0x615   :  { %v2082_v36 = vadd.f32 %v2078_v33, %v1996_v43  ;;  %v2270_v33 = vld [vmem:[%s7792_s1] sm:$0xff]  ;;  %v4736_v43 = vld [vmem:[%s7792_s1 + $0xd0] sm:$0xff]  ;;  %v4735_v44 = vld [vmem:[%s7792_s1 + $0xc8] sm:$0xff] }
 0x617   :  { %v2083_v45 = vmax.f32 %v2082_v36, 0.0  ;;  %v4734_v36 = vld [vmem:[%s7792_s1 + $0xc0] sm:$0xff] }
 0x619   :  { %5240 = vmatmul.mubr.msk.f32.vlgmr.msra.gmra.mxu0 %vm2100_vm11, %v2083_v45  ;;  %v4692_v45 = vld [vmem:[%s7791_s0 + $0x30] sm:$0xff] }
 0x61a   :  { %2327 = vmatpush1.msra.mxu0 %v4704_v34  ;;  %2366 = vmatprep.mubr.f32.mxu0 %v5465_v18  ;;  %v4693_v34 = vld [vmem:[%s7791_s0 + $0x38] sm:$0xf] }
 0x61b   :  { %2328 = vmatprep.subr.mxu0 %v4703_v47  ;;  %v4730_v47 = vld [vmem:[%s7791_s0 + $0x23] sm:$0xff] }
 0x61c   :  { %2329 = vmatpush1.msra.mxu0 %v4702_v48  ;;  %v4731_v48 = vld [vmem:[%s7791_s0 + $0x2b] sm:$0xff] }
 0x61d   :  { %2330 = vmatprep.subr.mxu0 %v4701_v46  ;;  %v4732_v46 = vld [vmem:[%s7791_s0 + $0x33] sm:$0xff] }
 0x61e   :  { %2331 = vmatpush1.msra.mxu0 %v4700_v49  ;;  %v4733_v49 = vld [vmem:[%s7791_s0 + $0x3b] sm:$0xf] }
 0x61f   :  { %2332 = vmatprep.subr.mxu0 %v4699_v50  ;;  %v2989_v50 = vld [vmem:[%s7795_s4 + $0x78] sm:$0xff] }
 0x620   :  { %2333 = vmatpush1.msra.mxu0 %v4698_v51  ;;  %v2988_v51 = vld [vmem:[%s7795_s4 + $0x70] sm:$0xff] }
 0x621   :  { %4706 = vmatmul.mubr.msk.f32.vlgmr.msra.gmra.mxu0 %vm76_vm0, %v4694_v52  ;;  %2540 = vmatprep.subr.mxu0 %v4725_v58  ;;  %v2987_v52 = vld [vmem:[%s7795_s4 + $0x68] sm:$0xff]  ;;  %v2981_v58 = vld [vmem:[%s7795_s4 + $0x38] sm:$0xff] }
 0x622   :  { %2372 = vmatprep.mubr.f32.mxu0 %v5465_v18  ;;  %2541 = vmatpush1.msra.mxu0 %v4724_v59  ;;  %v2980_v59 = vld [vmem:[%s7795_s4 + $0x30] sm:$0xff] }
 0x623   :  { %2542 = vmatprep.subr.mxu0 %v4723_v60 }
 0x624   :  { %2543 = vmatpush1.msra.mxu0 %v4722_v61  ;;  %v2979_v61 = vld [vmem:[%s7795_s4 + $0x28] sm:$0xff] }
 0x625   :  { %4707 = vmatmul.mubr.msk.f32.gmra.mxu0 %vm76_vm0, %v4695_v53  ;;  %2544 = vmatprep.subr.mxu0 %v4721_v63  ;;  %v2986_v53 = vld [vmem:[%s7795_s4 + $0x60] sm:$0xff] }
 0x626   :  { %2378 = vmatprep.mubr.f32.mxu0 %v5465_v18  ;;  %2545 = vmatpush1.msra.mxu0 %v4720_v0  ;;  %v2977_v0 = vld [vmem:[%s7795_s4 + $0x18] sm:$0xff] }
 0x627   :  { %2546 = vmatprep.subr.mxu0 %v4719_v1  ;;  %v2976_v1 = vld [vmem:[%s7795_s4 + $0x10] sm:$0xff] }
 0x628   :  { %2547 = vmatpush1.msra.mxu0 %v4718_v2 }
 0x629   :  { %4708 = vmatmul.mubr.msk.f32.gmra.mxu0 %vm76_vm0, %v4696_v56  ;;  %2782 = vmatprep.subr.mxu0 %v4757_v7  ;;  %v2983_v56 = vld [vmem:[%s7795_s4 + $0x48] sm:$0xff]  ;;  %v2994_v7 = vld [vmem:[%s7795_s4 + $0xa0] sm:$0xff] }
 0x62a   :  { %2384 = vmatprep.mubr.f32.mxu0 %v5465_v18 }
 0x62d   :  { %4709 = vmatmul.mubr.msk.f32.gmra.mxu0 %vm76_vm0, %v4697_v62  ;;  %v2978_v62 = vld [vmem:[%s7795_s4 + $0x20] sm:$0xff] }
 0x62e   :  { %2580 = vmatprep.mubr.f32.mxu0 %v5465_v18 }
 0x631   :  { %4726 = vmatmul.mubr.msk.f32.vlgmr.msra.gmra.mxu0 %vm76_vm0, %v4714_v3  ;;  %v2975_v3 = vld [vmem:[%s7795_s4 + $0x8] sm:$0xff] }
 0x632   :  { %2586 = vmatprep.mubr.f32.mxu0 %v5465_v18  ;;  %2783 = vmatpush1.msra.mxu0 %v4756_v8  ;;  %v2993_v8 = vld [vmem:[%s7795_s4 + $0x98] sm:$0xff] }
 0x633   :  { %2784 = vmatprep.subr.mxu0 %v4755_v9 }
 0x634   :  { %2785 = vmatpush1.msra.mxu0 %v4754_v10  ;;  %v2992_v10 = vld [vmem:[%s7795_s4 + $0x90] sm:$0xff] }
 0x635   :  { %4727 = vmatmul.mubr.msk.f32.gmra.mxu0 %vm76_vm0, %v4715_v4  ;;  %2786 = vmatprep.subr.mxu0 %v4753_v13  ;;  %v2974_v4 = vld [vmem:[%s7795_s4] sm:$0xff] }
 0x636   :  { %2592 = vmatprep.mubr.f32.mxu0 %v5465_v18  ;;  %2787 = vmatpush1.msra.mxu0 %v4752_v14 }
 0x637   :  { %2788 = vmatprep.subr.mxu0 %v4751_v15 }
 0x638   :  { %2789 = vmatpush1.msra.mxu0 %v4750_v19 }
 0x639   :  { %4728 = vmatmul.mubr.msk.f32.gmra.mxu0 %vm76_vm0, %v4716_v5  ;;  %3001 = vmatprep.subr.mxu0 %v5465_v18 }
 0x63a   :  { %2598 = vmatprep.mubr.f32.mxu0 %v5465_v18 }
 0x63d   :  { %4729 = vmatmul.mubr.msk.f32.gmra.mxu0 %vm76_vm0, %v4717_v11 }
 0x63e   :  { %2822 = vmatprep.mubr.f32.mxu0 %v5465_v18 }
 0x641   :  { %4758 = vmatmul.mubr.msk.f32.vlgmr.msra.gmra.mxu0 %vm76_vm0, %v4746_v20 }
 0x642   :  { %2828 = vmatprep.mubr.f32.mxu0 %v5465_v18  ;;  %3002 = vmatpush1.msra.mxu0 %v2989_v50 }
 0x643   :  { %3003 = vmatprep.subr.mxu0 %v5465_v18 }
 0x644   :  { %3004 = vmatpush1.msra.mxu0 %v2988_v51 }
 0x645   :  { %4759 = vmatmul.mubr.msk.f32.gmra.mxu0 %vm76_vm0, %v4747_v16  ;;  %3005 = vmatprep.subr.mxu0 %v5465_v18 }
 0x646   :  { %2834 = vmatprep.mubr.f32.mxu0 %v5465_v18  ;;  %3006 = vmatpush1.msra.mxu0 %v2987_v52 }
 0x647   :  { %3007 = vmatprep.subr.mxu0 %v5465_v18 }
 0x648   :  { %3008 = vmatpush1.msra.mxu0 %v2986_v53 }
 0x649   :  { %4760 = vmatmul.mubr.msk.f32.gmra.mxu0 %vm76_vm0, %v4748_v17  ;;  %3009 = vmatprep.subr.mxu0 %v5465_v18 }
 0x64a   :  { %2840 = vmatprep.mubr.f32.mxu0 %v5465_v18  ;;  %3010 = vmatpush1.msra.mxu0 %v2985_v54 }
 0x64b   :  { %3011 = vmatprep.subr.mxu0 %v5465_v18 }
 0x64c   :  { %3012 = vmatpush1.msra.mxu0 %v2984_v55 }
 0x64d   :  { %4761 = vmatmul.mubr.msk.f32.gmra.mxu0 %vm76_vm0, %v4749_v21  ;;  %3013 = vmatprep.subr.mxu0 %v5465_v18  ;;  %v2186_v21 = vld [vmem:[%s7805_s14] sm:$0x1] }
 0x64e   :  { %3014 = vmatpush1.msra.mxu0 %v2983_v56 }
 0x64f   :  { %3015 = vmatprep.subr.mxu0 %v5465_v18 }
 0x650   :  { %3016 = vmatpush1.msra.mxu0 %v2982_v57 }
 0x651   :  { %3017 = vmatprep.subr.mxu0 %v5465_v18 }
 0x652   :  { %3018 = vmatpush1.msra.mxu0 %v2981_v58 }
 0x653   :  { %3019 = vmatprep.subr.mxu0 %v5465_v18 }
 0x654   :  { %3020 = vmatpush1.msra.mxu0 %v2980_v59 }
 0x655   :  { %3021 = vmatprep.subr.mxu0 %v5465_v18 }
 0x656   :  { %3022 = vmatpush1.msra.mxu0 %v2979_v61 }
 0x657   :  { %3023 = vmatprep.subr.mxu0 %v5465_v18 }
 0x658   :  { %3024 = vmatpush1.msra.mxu0 %v2978_v62 }
 0x659   :  { %3025 = vmatprep.subr.mxu0 %v5465_v18 }
 0x65a   :  { %3026 = vmatpush1.msra.mxu0 %v2977_v0 }
 0x65b   :  { %3027 = vmatprep.subr.mxu0 %v5465_v18 }
 0x65c   :  { %3028 = vmatpush1.msra.mxu0 %v2976_v1 }
 0x65d   :  { %3029 = vmatprep.subr.mxu0 %v5465_v18 }
 0x65e   :  { %3030 = vmatpush1.msra.mxu0 %v2975_v3 }
 0x65f   :  { %3031 = vmatprep.subr.mxu0 %v5465_v18 }
 0x660   :  { %3032 = vmatpush1.msra.mxu0 %v2974_v4 }
 0x661   :  { %3055 = vmatprep.subr.mxu0 %v5465_v18 }
 0x662   :  { %3056 = vmatpush2.msra.mxu0 %v2994_v7 }
 0x663   :  { %3057 = vmatprep.subr.mxu0 %v5465_v18 }
 0x664   :  { %3058 = vmatpush2.msra.mxu0 %v2993_v8 }
 0x665   :  { %3059 = vmatprep.subr.mxu0 %v5465_v18 }
 0x666   :  { %3060 = vmatpush2.msra.mxu0 %v2992_v10 }
 0x667   :  { %3061 = vmatprep.subr.mxu0 %v5465_v18 }
 0x6d9   :  { %v2170_v23 = vpop.f32.mrf.mxu0 }
 0x6da   :  { %v2171_v24 = vadd.f32 %v2170_v23, %v2099_v22 }
 0x6db   :  { %v5241_v25 = vpop.f32.mrf.mxu0 }
 0x6dc   :  { %v2174_v26 = vmax.f32 %v2171_v24, 0.0 }
 0x6de   :  { %5265 = vmatmul.mubr.msk.f32.vlgmr.msra.gmra.mxu1 %vm869_vm4, %v2174_v26 }
 0x6df   :  { %2428 = vmatpush1.msra.mxu1 %v2276_v27  ;;  %2467 = vmatprep.mubr.f32.mxu1 %v5465_v18 }
 0x6e0   :  { %2429 = vmatprep.subr.mxu1 %v2275_v28 }
 0x6e1   :  { %2430 = vmatpush1.msra.mxu1 %v2274_v29  ;;  %v6923_v60 = vpop.f32.mrf.mxu0 }
 0x6e2   :  { %2431 = vmatprep.subr.mxu1 %v2273_v30 }
 0x6e3   :  { %2432 = vmatpush1.msra.mxu1 %v2272_v31  ;;  %v6933_v63 = vpop.f32.mrf.mxu0 }
 0x6e4   :  { %2433 = vmatprep.subr.mxu1 %v2271_v32 }
 0x6e5   :  { %2434 = vmatpush1.msra.mxu1 %v2270_v33  ;;  %v2374_v2 = vpop.f32.mrf.mxu0 }
 0x6e6   :  { %4710 = vmatmul.mubr.msk.f32.vlgmr.msra.gmra.mxu1 %vm76_vm0, %v4690_v35  ;;  %2661 = vmatprep.subr.mxu1 %v4741_v37 }
 0x6e7   :  { %2473 = vmatprep.mubr.f32.mxu1 %v5465_v18  ;;  %2662 = vmatpush1.msra.mxu1 %v4740_v38  ;;  %v2376_v5 = vpop.f32.mrf.mxu0 }
 0x6e8   :  { %2663 = vmatprep.subr.mxu1 %v4739_v40 }
 0x6e9   :  { %2664 = vmatpush1.msra.mxu1 %v4738_v39  ;;  %v2380_v9 = vpop.f32.mrf.mxu0 }
 0x6ea   :  { %4711 = vmatmul.mubr.msk.f32.gmra.mxu1 %vm76_vm0, %v4691_v41  ;;  %2665 = vmatprep.subr.mxu1 %v4737_v42 }
 0x6eb   :  { %2479 = vmatprep.mubr.f32.mxu1 %v5465_v18  ;;  %2666 = vmatpush1.msra.mxu1 %v4736_v43  ;;  %v2382_v11 = vpop.f32.mrf.mxu0 }
 0x6ec   :  { %2667 = vmatprep.subr.mxu1 %v4735_v44 }
 0x6ed   :  { %2668 = vmatpush1.msra.mxu1 %v4734_v36  ;;  %v2386_v13 = vpop.f32.mrf.mxu0 }
 0x6ee   :  { %4712 = vmatmul.mubr.msk.f32.gmra.mxu1 %vm76_vm0, %v4692_v45 }
 0x6ef   :  { %2485 = vmatprep.mubr.f32.mxu1 %v5465_v18  ;;  %v2388_v14 = vpop.f32.mrf.mxu0 }
 0x6f1   :  { %v2582_v15 = vpop.f32.mrf.mxu0 }
 0x6f2   :  { %4713 = vmatmul.mubr.msk.f32.gmra.mxu1 %vm76_vm0, %v4693_v34 }
 0x6f3   :  { %2701 = vmatprep.mubr.f32.mxu1 %v5465_v18  ;;  %v2584_v19 = vpop.f32.mrf.mxu0 }
 0x6f5   :  { %v2588_v20 = vpop.f32.mrf.mxu0 }
 0x6f6   :  { %4742 = vmatmul.mubr.msk.f32.vlgmr.msra.gmra.mxu1 %vm76_vm0, %v4730_v47 }
 0x6f7   :  { %2707 = vmatprep.mubr.f32.mxu1 %v5465_v18  ;;  %v2590_v16 = vpop.f32.mrf.mxu0 }
 0x6f9   :  { %v2594_v17 = vpop.f32.mrf.mxu0 }
 0x6fa   :  { %4743 = vmatmul.mubr.msk.f32.gmra.mxu1 %vm76_vm0, %v4731_v48 }
 0x6fb   :  { %2713 = vmatprep.mubr.f32.mxu1 %v5465_v18  ;;  %v2596_v23 = vpop.f32.mrf.mxu0 }
 0x6fd   :  { %v2600_v26 = vpop.f32.mrf.mxu0 }
 0x6fe   :  { %4744 = vmatmul.mubr.msk.f32.gmra.mxu1 %vm76_vm0, %v4732_v46 }
 0x6ff   :  { %2719 = vmatprep.mubr.f32.mxu1 %v5465_v18  ;;  %v2602_v28 = vpop.f32.mrf.mxu0 }
 0x701   :  { %v2824_v31 = vpop.f32.mrf.mxu0 }
 0x702   :  { %4745 = vmatmul.mubr.msk.f32.gmra.mxu1 %vm76_vm0, %v4733_v49 }
 0x703   :  { %2961 = vmatprep.mubr.f32.mxu1 %v5465_v18  ;;  %v2826_v35 = vpop.f32.mrf.mxu0 }
 0x705   :  { %v2830_v40 = vpop.f32.mrf.mxu0 }
 0x707   :  { %v2832_v42 = vpop.f32.mrf.mxu0 }
 0x709   :  { %v2836_v36 = vpop.f32.mrf.mxu0 }
 0x70b   :  { %v2838_v51 = vpop.f32.mrf.mxu0 }
 0x70d   :  { %v2842_v3 = vpop.f32.mrf.mxu0 }
 0x79e   :  { %v2259_v22 = vpop.f32.mrf.mxu1 }
 0x79f   :  { %v2260_v24 = vadd.f32 %v2259_v22, %v2186_v21  ;;  %v2844_v21 = vpop.f32.mrf.mxu0 }
 0x7a0   :  { %v5266_v25 = vpop.f32.mrf.mxu1 }
 0x7a1   :  { %2264 = vst.msk [vmem:[#allocation4] sm:$0x1] %vm2263_vm12, %v2260_v24 }
 0x7a6   :  { %v2469_v27 = vpop.f32.mrf.mxu1 }
 0x7a7   :  { %v2470_v55 = vadd.f32 %v2469_v27, %v6923_v60 }
 0x7a8   :  { %v2471_v29 = vpop.f32.mrf.mxu1 }
 0x7a9   :  { %v2472_v52 = vadd.f32 %v2471_v29, %v6933_v63  ;;  %v2605_v8 = vadd.f32 %v2582_v15, %v2470_v55  ;;  %v4781_v55 = vld [vmem:[%s7796_s5 + $0x118] sm:$0xff] }
 0x7aa   :  { %v2475_v30 = vpop.f32.mrf.mxu1 }
 0x7ab   :  { %v2476_v49 = vadd.f32 %v2475_v30, %v2374_v2  ;;  %v2606_v4 = vadd.f32 %v2584_v19, %v2472_v52  ;;  %v2855_v2 = vld [vmem:[%s7793_s2] sm:$0x3]  ;;  %v4784_v52 = vld [vmem:[%s7796_s5 + $0x130] sm:$0xff] }
 0x7ac   :  { %v2477_v32 = vpop.f32.mrf.mxu1  ;;  %v2864_v19 = vrot.slane %v2855_v2, %v5851_v12 }
 0x7ad   :  { %v2478_v48 = vadd.f32 %v2477_v32, %v2376_v5  ;;  %v2607_v62 = vadd.f32 %v2588_v20, %v2476_v49  ;;  %v2860_v20 = vrot.slane %v2855_v2, %v5846_v6  ;;  %v4787_v49 = vld [vmem:[%s7796_s5 + $0x148] sm:$0xff]  ;;  %v4812_v2 = vld [vmem:[%s7796_s5 + $0x1d0] sm:$0xff] }
 0x7ae   :  { %v2481_v33 = vpop.f32.mrf.mxu1 }
 0x7af   :  { %v2482_v34 = vadd.f32 %v2481_v33, %v2380_v9  ;;  %v2608_v58 = vadd.f32 %v2590_v16, %v2478_v48  ;;  %v4819_v48 = vld [vmem:[%s7796_s5 + $0x208] sm:$0xf] }
 0x7b0   :  { %v2483_v37 = vpop.f32.mrf.mxu1 }
 0x7b1   :  { %v2484_v45 = vadd.f32 %v2483_v37, %v2382_v11  ;;  %v2609_v56 = vadd.f32 %v2594_v17, %v2482_v34  ;;  %v2990_v34 = vld [vmem:[%s7795_s4 + $0x80] sm:$0xff] }
 0x7b2   :  { %v2487_v38 = vpop.f32.mrf.mxu1 }
 0x7b3   :  { %v2488_v46 = vadd.f32 %v2487_v38, %v2386_v13  ;;  %v2610_v53 = vadd.f32 %v2596_v23, %v2484_v45  ;;  %v2991_v45 = vld [vmem:[%s7795_s4 + $0x88] sm:$0xff] }
 0x7b4   :  { %v2489_v39 = vpop.f32.mrf.mxu1  ;;  %3062 = vmatpush2.msra.mxu0 %v2991_v45  ;;  %v4869_v45 = vld [vmem:[%s7796_s5 + $0x358] sm:$0xff] }
 0x7b5   :  { %v2490_v54 = vadd.f32 %v2489_v39, %v2388_v14  ;;  %v2611_v59 = vadd.f32 %v2600_v26, %v2488_v46  ;;  %3063 = vmatprep.subr.mxu0 %v5465_v18  ;;  %v4788_v46 = vld [vmem:[%s7796_s5 + $0x150] sm:$0xf] }
 0x7b6   :  { %v2703_v41 = vpop.f32.mrf.mxu1  ;;  %3064 = vmatpush2.msra.mxu0 %v2990_v34  ;;  %v3099_v34 = vld [vmem:[%s7796_s5 + $0x90] sm:$0xff] }
 0x7b7   :  { %v2612_v5 = vadd.f32 %v2602_v28, %v2490_v54  ;;  %v2726_v16 = vadd.f32 %v2703_v41, %v2605_v8  ;;  %4820 = vmatprep.subr.msk.mxu0 %vm682_vm1, %v4819_v48  ;;  %v4782_v54 = vld [vmem:[%s7796_s5 + $0x120] sm:$0xff]  ;;  %v4779_v8 = vld [vmem:[%s7796_s5 + $0x108] sm:$0xff] }
 0x7b8   :  { %v2705_v43 = vpop.f32.mrf.mxu1  ;;  %v3098_v48 = vld [vmem:[%s7796_s5 + $0x88] sm:$0xff] }
 0x7b9   :  { %v2727_v10 = vadd.f32 %v2705_v43, %v2606_v4  ;;  %v2847_v28 = vadd.f32 %v2824_v31, %v2726_v16  ;;  %v4814_v4 = vld [vmem:[%s7796_s5 + $0x1e0] sm:$0xff] }
 0x7ba   :  { %v2709_v44 = vpop.f32.mrf.mxu1  ;;  %v4806_v16 = vld [vmem:[%s7796_s5 + $0x1a0] sm:$0xff] }
 0x7bb   :  { %v2728_v9 = vadd.f32 %v2709_v44, %v2607_v62  ;;  %v2848_v26 = vadd.f32 %v2826_v35, %v2727_v10  ;;  %v2867_v41 = vadd.f32 %v2860_v20, %v2847_v28  ;;  %v2883_v44 = vld [vmem:[%s7794_s3] sm:$0xff]  ;;  %v4808_v10 = vld [vmem:[%s7796_s5 + $0x1b0] sm:$0xff] }
 0x7bc   :  { %v2711_v47 = vpop.f32.mrf.mxu1  ;;  %v4800_v28 = vld [vmem:[%s7796_s5 + $0x170] sm:$0xff] }
 0x7bd   :  { %v2729_v63 = vadd.f32 %v2711_v47, %v2608_v58  ;;  %v2849_v24 = vadd.f32 %v2830_v40, %v2728_v9  ;;  %v2868_v38 = vadd.f32 %v2864_v19, %v2848_v26  ;;  %v2875_v31 = vmax.f32 %v2867_v41, 0.0  ;;  %v4789_v47 = vld [vmem:[%s7796_s5 + $0x158] sm:$0xf]  ;;  %v4771_v26 = vld [vmem:[%s7796_s5 + $0xc8] sm:$0xff] }
 0x7be   :  { %v2715_v50 = vpop.f32.mrf.mxu1  ;;  %v4809_v9 = vld [vmem:[%s7796_s5 + $0x1b8] sm:$0xff] }
 0x7bf   :  { %v2730_v0 = vadd.f32 %v2715_v50, %v2609_v56  ;;  %v2850_v22 = vadd.f32 %v2832_v42, %v2729_v63  ;;  %v2869_v33 = vadd.f32 %v2860_v20, %v2849_v24  ;;  %v2876_v35 = vmax.f32 %v2868_v38, 0.0  ;;  %v4786_v50 = vld [vmem:[%s7796_s5 + $0x140] sm:$0xff]  ;;  %v4780_v56 = vld [vmem:[%s7796_s5 + $0x110] sm:$0xff]  ;;  %v4811_v63 = vld [vmem:[%s7796_s5 + $0x1c8] sm:$0xff] }
 0x7c0   :  { %v2717_v57 = vpop.f32.mrf.mxu1  ;;  %v4772_v24 = vld [vmem:[%s7796_s5 + $0xd0] sm:$0xff]  ;;  %v4871_v38 = vld [vmem:[%s7796_s5 + $0x368] sm:$0xf] }
 0x7c1   :  { %v2731_v61 = vadd.f32 %v2717_v57, %v2610_v53  ;;  %v2851_v17 = vadd.f32 %v2836_v36, %v2730_v0  ;;  %v2870_v30 = vadd.f32 %v2864_v19, %v2850_v22  ;;  %v2877_v40 = vmax.f32 %v2869_v33, 0.0  ;;  %v2884_v36 = vld [vmem:[%s7794_s3 + $0x8] sm:$0x3f]  ;;  %v4816_v0 = vld [vmem:[%s7796_s5 + $0x1f0] sm:$0xff]  ;;  %v4773_v22 = vld [vmem:[%s7796_s5 + $0xd8] sm:$0xff] }
 0x7c2   :  { %v2721_v1 = vpop.f32.mrf.mxu1  ;;  %v4783_v53 = vld [vmem:[%s7796_s5 + $0x128] sm:$0xff]  ;;  %v4798_v33 = vld [vmem:[%s7796_s5 + $0x160] sm:$0xff] }
 0x7c3   :  { %v2732_v7 = vadd.f32 %v2721_v1, %v2611_v59  ;;  %v2852_v11 = vadd.f32 %v2838_v51, %v2731_v61  ;;  %v2871_v29 = vadd.f32 %v2860_v20, %v2851_v17  ;;  %v2878_v42 = vmax.f32 %v2870_v30, 0.0  ;;  %v4785_v51 = vld [vmem:[%s7796_s5 + $0x138] sm:$0xff]  ;;  %v4818_v59 = vld [vmem:[%s7796_s5 + $0x200] sm:$0xf]  ;;  %v4815_v1 = vld [vmem:[%s7796_s5 + $0x1e8] sm:$0xff] }
 0x7c4   :  { %v2723_v60 = vpop.f32.mrf.mxu1  ;;  %v4817_v61 = vld [vmem:[%s7796_s5 + $0x1f8] sm:$0xff]  ;;  %v4799_v30 = vld [vmem:[%s7796_s5 + $0x168] sm:$0xff] }
 0x7c5   :  { %v2853_v13 = vadd.f32 %v2842_v3, %v2732_v7  ;;  %v2733_v14 = vadd.f32 %v2723_v60, %v2612_v5  ;;  %v2872_v27 = vadd.f32 %v2864_v19, %v2852_v11  ;;  %v2879_v43 = vmax.f32 %v2871_v29, 0.0  ;;  %v4813_v5 = vld [vmem:[%s7796_s5 + $0x1d8] sm:$0xff]  ;;  %v4810_v7 = vld [vmem:[%s7796_s5 + $0x1c0] sm:$0xff] }
 0x7c6   :  { %v4778_v60 = vld [vmem:[%s7796_s5 + $0x100] sm:$0xff]  ;;  %v4777_v11 = vld [vmem:[%s7796_s5 + $0xf8] sm:$0xff] }
 0x7c7   :  { %v2854_v23 = vadd.f32 %v2844_v21, %v2733_v14  ;;  %v2873_v25 = vadd.f32 %v2860_v20, %v2853_v13  ;;  %v2880_v39 = vmax.f32 %v2872_v27, 0.0  ;;  %v4807_v13 = vld [vmem:[%s7796_s5 + $0x1a8] sm:$0xff]  ;;  %v4776_v14 = vld [vmem:[%s7796_s5 + $0xf0] sm:$0xff]  ;;  %v4805_v17 = vld [vmem:[%s7796_s5 + $0x198] sm:$0xff] }
 0x7c8   :  { %v4775_v20 = vld [vmem:[%s7796_s5 + $0xe8] sm:$0xff]  ;;  %v4774_v21 = vld [vmem:[%s7796_s5 + $0xe0] sm:$0xff]  ;;  %v4801_v27 = vld [vmem:[%s7796_s5 + $0x178] sm:$0xff] }
 0x7c9   :  { %v2874_v15 = vadd.f32 %v2864_v19, %v2854_v23  ;;  %v2881_v37 = vmax.f32 %v2873_v25, 0.0  ;;  %v4804_v19 = vld [vmem:[%s7796_s5 + $0x190] sm:$0xff]  ;;  %v4803_v23 = vld [vmem:[%s7796_s5 + $0x188] sm:$0xff]  ;;  %v4802_v25 = vld [vmem:[%s7796_s5 + $0x180] sm:$0xff] }
 0x7ca   :  { %v4769_v29 = vld [vmem:[%s7796_s5 + $0xb8] sm:$0xff] }
 0x7cb   :  { %v2882_v32 = vmax.f32 %v2874_v15, 0.0  ;;  %v4770_v15 = vld [vmem:[%s7796_s5 + $0xc0] sm:$0xff] }
 0x7cd   :  { %4762 = vmatprep.subr.msk.mxu1 %vm682_vm1, %v2882_v32  ;;  %v4768_v32 = vld [vmem:[%s7796_s5 + $0xb0] sm:$0xff] }
 0x7ce   :  { %4763 = vmatpush1.msk.msra.mxu1 %vm682_vm1, %v2881_v37  ;;  %v3102_v37 = vld [vmem:[%s7796_s5 + $0xa8] sm:$0xf] }
 0x7cf   :  { %2923 = vmatprep.subr.mxu1 %v2880_v39 }
 0x7d0   :  { %2924 = vmatpush1.msra.mxu1 %v2879_v43 }
 0x7d1   :  { %2925 = vmatprep.subr.mxu1 %v2878_v42 }
 0x7d2   :  { %2926 = vmatpush1.msra.mxu1 %v2877_v40  ;;  %v3101_v40 = vld [vmem:[%s7796_s5 + $0xa0] sm:$0xf] }
 0x7d3   :  { %2927 = vmatprep.subr.mxu1 %v2876_v35  ;;  %v4870_v35 = vld [vmem:[%s7796_s5 + $0x360] sm:$0xf] }
 0x7d4   :  { %2928 = vmatpush1.msra.mxu1 %v2875_v31  ;;  %v3100_v31 = vld [vmem:[%s7796_s5 + $0x98] sm:$0xff] }
 0x7d5   :  { %4764 = vmatmul.mubr.msk.f32.vlgmr.msra.gmra.mxu1 %vm675_vm2, %v2883_v44  ;;  %4790 = vmatprep.subr.msk.mxu1 %vm682_vm1, %v4789_v47  ;;  %v4868_v47 = vld [vmem:[%s7796_s5 + $0x350] sm:$0xff] }
 0x7d6   :  { %2967 = vmatprep.mubr.f32.mxu1 %v5465_v18  ;;  %4791 = vmatpush1.msk.msra.mxu1 %vm682_vm1, %v4788_v46  ;;  %v4867_v46 = vld [vmem:[%s7796_s5 + $0x348] sm:$0xff] }
 0x7d7   :  { %3151 = vmatprep.subr.mxu1 %v4787_v49  ;;  %v3097_v49 = vld [vmem:[%s7796_s5 + $0x80] sm:$0xff] }
 0x7d8   :  { %3152 = vmatpush1.msra.mxu1 %v4786_v50  ;;  %v4866_v50 = vld [vmem:[%s7796_s5 + $0x340] sm:$0xff] }
 0x7d9   :  { %4765 = vmatmul.mubr.msk.f32.gmra.mxu1 %vm675_vm2, %v2884_v36  ;;  %3153 = vmatprep.subr.mxu1 %v4785_v51  ;;  %v3096_v51 = vld [vmem:[%s7796_s5 + $0x78] sm:$0xff] }
 0x7da   :  { %3203 = vmatprep.mubr.f32.mxu1 %v5465_v18  ;;  %3154 = vmatpush1.msra.mxu1 %v4784_v52 }
 0x7db   :  { %3155 = vmatprep.subr.mxu1 %v4783_v53 }
 0x7dc   :  { %3156 = vmatpush1.msra.mxu1 %v4782_v54  ;;  %v4865_v54 = vld [vmem:[%s7796_s5 + $0x338] sm:$0xff] }
 0x7dd   :  { %3157 = vmatprep.subr.mxu1 %v4781_v55  ;;  %v3095_v55 = vld [vmem:[%s7796_s5 + $0x70] sm:$0xff] }
 0x7de   :  { %3158 = vmatpush1.msra.mxu1 %v4780_v56  ;;  %v4864_v56 = vld [vmem:[%s7796_s5 + $0x330] sm:$0xff] }
 0x7df   :  { %3159 = vmatprep.subr.mxu1 %v4779_v8  ;;  %v4857_v8 = vld [vmem:[%s7796_s5 + $0x2f8] sm:$0xff] }
 0x7e0   :  { %3160 = vmatpush1.msra.mxu1 %v4778_v60  ;;  %v4856_v60 = vld [vmem:[%s7796_s5 + $0x2f0] sm:$0xff] }
 0x7e1   :  { %3161 = vmatprep.subr.mxu1 %v4777_v11  ;;  %v4855_v11 = vld [vmem:[%s7796_s5 + $0x2e8] sm:$0xff] }
 0x7e2   :  { %3162 = vmatpush1.msra.mxu1 %v4776_v14  ;;  %v4854_v14 = vld [vmem:[%s7796_s5 + $0x2e0] sm:$0xff] }
 0x7e3   :  { %3163 = vmatprep.subr.mxu1 %v4775_v20  ;;  %v4853_v20 = vld [vmem:[%s7796_s5 + $0x2d8] sm:$0xff] }
 0x7e4   :  { %3164 = vmatpush1.msra.mxu1 %v4774_v21  ;;  %v4852_v21 = vld [vmem:[%s7796_s5 + $0x2d0] sm:$0xff] }
 0x7e5   :  { %3165 = vmatprep.subr.mxu1 %v4773_v22  ;;  %v4851_v22 = vld [vmem:[%s7796_s5 + $0x2c8] sm:$0xff] }
 0x7e6   :  { %3166 = vmatpush1.msra.mxu1 %v4772_v24  ;;  %v4850_v24 = vld [vmem:[%s7796_s5 + $0x2c0] sm:$0xff] }
 0x7e7   :  { %3167 = vmatprep.subr.mxu1 %v4771_v26  ;;  %v4844_v26 = vld [vmem:[%s7796_s5 + $0x2b0] sm:$0xf] }
 0x7e8   :  { %3168 = vmatpush1.msra.mxu1 %v4770_v15  ;;  %v4843_v15 = vld [vmem:[%s7796_s5 + $0x2a8] sm:$0xff] }
 0x7e9   :  { %3169 = vmatprep.subr.mxu1 %v4769_v29  ;;  %v4842_v29 = vld [vmem:[%s7796_s5 + $0x2a0] sm:$0xff] }
 0x7ea   :  { %3170 = vmatpush1.msra.mxu1 %v4768_v32  ;;  %v4840_v32 = vld [vmem:[%s7796_s5 + $0x290] sm:$0xff] }
 0x7eb   :  { %4794 = vmatprep.subr.msk.mxu1 %vm682_vm1, %v3102_v37  ;;  %v4839_v37 = vld [vmem:[%s7796_s5 + $0x288] sm:$0xff] }
 0x895   :  { %v2963_v57 = vpop.f32.mrf.mxu1 }
 0x897   :  { %v2965_v58 = vpop.f32.mrf.mxu1 }
 0x898   :  { %4766 = vmatprep.mubr.msk.f32.mxu0 %vm787_vm3, %v2965_v58  ;;  %v4863_v58 = vld [vmem:[%s7796_s5 + $0x328] sm:$0xff] }
 0x899   :  { %v2969_v62 = vpop.f32.mrf.mxu1  ;;  %3066 = vmatmul.mubr.f32.vlgmr.msra.gmra.mxu0 %v2963_v57  ;;  %v3094_v57 = vld [vmem:[%s7796_s5 + $0x68] sm:$0xff] }
 0x89a   :  { %4821 = vmatpush1.msk.msra.mxu0 %vm682_vm1, %v4818_v59  ;;  %v3093_v59 = vld [vmem:[%s7796_s5 + $0x60] sm:$0xff] }
 0x89b   :  { %v2971_v3 = vpop.f32.mrf.mxu1  ;;  %3353 = vmatprep.subr.mxu0 %v4817_v61  ;;  %v4862_v61 = vld [vmem:[%s7796_s5 + $0x320] sm:$0xff] }
 0x89c   :  { %4767 = vmatprep.mubr.msk.f32.mxu0 %vm787_vm3, %v2971_v3  ;;  %3354 = vmatpush1.msra.mxu0 %v4816_v0  ;;  %v4861_v0 = vld [vmem:[%s7796_s5 + $0x318] sm:$0xff]  ;;  %v4860_v3 = vld [vmem:[%s7796_s5 + $0x310] sm:$0xff] }
 0x89d   :  { %3071 = vmatmul.mubr.f32.gmra.mxu0 %v2969_v62  ;;  %3355 = vmatprep.subr.mxu0 %v4815_v1  ;;  %v3092_v62 = vld [vmem:[%s7796_s5 + $0x58] sm:$0xff]  ;;  %v3091_v1 = vld [vmem:[%s7796_s5 + $0x50] sm:$0xff] }
 0x89e   :  { %3356 = vmatpush1.msra.mxu0 %v4814_v4  ;;  %3405 = vmatprep.mubr.f32.mxu0 %v5465_v18  ;;  %v3090_v4 = vld [vmem:[%s7796_s5 + $0x48] sm:$0xff] }
 0x89f   :  { %3357 = vmatprep.subr.mxu0 %v4813_v5  ;;  %v4859_v5 = vld [vmem:[%s7796_s5 + $0x308] sm:$0xff] }
 0x8a0   :  { %3358 = vmatpush1.msra.mxu0 %v4812_v2  ;;  %v3089_v2 = vld [vmem:[%s7796_s5 + $0x40] sm:$0xff] }
 0x8a1   :  { %3359 = vmatprep.subr.mxu0 %v4811_v63  ;;  %v4858_v63 = vld [vmem:[%s7796_s5 + $0x300] sm:$0xff] }
 0x8a2   :  { %3360 = vmatpush1.msra.mxu0 %v4810_v7  ;;  %v3088_v7 = vld [vmem:[%s7796_s5 + $0x38] sm:$0xff] }
 0x8a3   :  { %3361 = vmatprep.subr.mxu0 %v4809_v9  ;;  %v3087_v9 = vld [vmem:[%s7796_s5 + $0x30] sm:$0xff] }
 0x8a4   :  { %3362 = vmatpush1.msra.mxu0 %v4808_v10  ;;  %v3086_v10 = vld [vmem:[%s7796_s5 + $0x28] sm:$0xff] }
 0x8a5   :  { %3363 = vmatprep.subr.mxu0 %v4807_v13  ;;  %v3085_v13 = vld [vmem:[%s7796_s5 + $0x20] sm:$0xff] }
 0x8a6   :  { %3364 = vmatpush1.msra.mxu0 %v4806_v16  ;;  %v3084_v16 = vld [vmem:[%s7796_s5 + $0x18] sm:$0xff] }
 0x8a7   :  { %3365 = vmatprep.subr.mxu0 %v4805_v17  ;;  %v3083_v17 = vld [vmem:[%s7796_s5 + $0x10] sm:$0xff] }
 0x8a8   :  { %3366 = vmatpush1.msra.mxu0 %v4804_v19  ;;  %v3082_v19 = vld [vmem:[%s7796_s5 + $0x8] sm:$0xff] }
 0x8a9   :  { %3367 = vmatprep.subr.mxu0 %v4803_v23  ;;  %v3081_v23 = vld [vmem:[%s7796_s5] sm:$0xff] }
 0x8aa   :  { %3368 = vmatpush1.msra.mxu0 %v4802_v25  ;;  %v4845_v25 = vld [vmem:[%s7796_s5 + $0x2b8] sm:$0xf] }
 0x8ab   :  { %3369 = vmatprep.subr.mxu0 %v4801_v27 }
 0x8ac   :  { %3370 = vmatpush1.msra.mxu0 %v4800_v28 }
 0x8ad   :  { %3371 = vmatprep.subr.mxu0 %v4799_v30  ;;  %v4841_v30 = vld [vmem:[%s7796_s5 + $0x298] sm:$0xff] }
 0x8ae   :  { %3372 = vmatpush1.msra.mxu0 %v4798_v33 }
 0x8af   :  { %4872 = vmatprep.subr.msk.mxu0 %vm682_vm1, %v4871_v38 }
 0x959   :  { %v3067_v39 = vpop.f32.mrf.mxu0 }
 0x95a   :  { %3077 = vst.msk [vmem:[#allocation2 + $0x10] sm:$0xff] %vm869_vm4, %v3067_v39  ;;  %v4838_v39 = vld [vmem:[%s7796_s5 + $0x280] sm:$0xff] }
 0x95b   :  { %v3069_v41 = vpop.f32.mrf.mxu0 }
 0x95c   :  { %v4837_v41 = vld [vmem:[%s7796_s5 + $0x278] sm:$0xff] }
 0x95d   :  { %v3072_v43 = vpop.f32.mrf.mxu0 }
 0x95e   :  { %3078 = vst.msk [vmem:[#allocation2 + $0x18] sm:$0x3f] %vm871_vm5, %v3072_v43  ;;  %v4836_v43 = vld [vmem:[%s7796_s5 + $0x270] sm:$0xff] }
 0x95f   :  { %v3074_v42 = vpop.f32.mrf.mxu0 }
 0x960   :  { %v4835_v42 = vld [vmem:[%s7796_s5 + $0x268] sm:$0xff] }
 0x961   :  { %v3079_v27 = vld [vmem:[#allocation2 + $0x10] sm:$0xff] }
 0x965   :  { %v3103_v44 = vld [vmem:[#allocation2 + $0x11] sm:$0xff]  ;;  %v3104_v52 = vld [vmem:[#allocation2 + $0x19] sm:$0x3]  ;;  %v3540_v38 = vld [vmem:[#allocation2 + $0x1c] sm:$0x3] }
 0x966   :  { %v3305_v36 = vld [vmem:[#allocation2 + $0x12] sm:$0xff]  ;;  %4792 = vmatmul.mubr.msk.f32.vlgmr.msra.gmra.mxu1 %vm869_vm4, %v3103_v44  ;;  %v3306_v53 = vld [vmem:[#allocation2 + $0x1a] sm:$0x3]  ;;  %v4831_v44 = vld [vmem:[%s7796_s5 + $0x248] sm:$0xff] }
 0x967   :  { %4822 = vmatmul.mubr.msk.f32.vlgmr.msra.gmra.mxu0 %vm869_vm4, %v3305_v36  ;;  %4795 = vmatpush1.msk.msra.mxu1 %vm682_vm1, %v3101_v40  ;;  %v3539_v28 = vld [vmem:[#allocation2 + $0x14] sm:$0xff]  ;;  %v4834_v40 = vld [vmem:[%s7796_s5 + $0x260] sm:$0xff] }
 0x968   :  { %4873 = vmatpush1.msk.msra.mxu0 %vm682_vm1, %v4870_v35  ;;  %3240 = vmatprep.subr.mxu1 %v3100_v31  ;;  %v3080_v33 = vld [vmem:[#allocation2 + $0x18] sm:$0x3]  ;;  %v4832_v31 = vld [vmem:[%s7796_s5 + $0x250] sm:$0xff]  ;;  %v4830_v36 = vld [vmem:[%s7796_s5 + $0x240] sm:$0xff] }
 0x969   :  { %3587 = vmatprep.subr.mxu0 %v4869_v45  ;;  %3241 = vmatpush1.msra.mxu1 %v3099_v34  ;;  %v4833_v35 = vld [vmem:[%s7796_s5 + $0x258] sm:$0xff]  ;;  %v4828_v34 = vld [vmem:[%s7796_s5 + $0x230] sm:$0xff] }
 0x96a   :  { %3588 = vmatpush1.msra.mxu0 %v4868_v47  ;;  %3209 = vmatprep.mubr.f32.mxu1 %v5465_v18  ;;  %v4829_v45 = vld [vmem:[%s7796_s5 + $0x238] sm:$0xff]  ;;  %v4827_v47 = vld [vmem:[%s7796_s5 + $0x228] sm:$0xff] }
 0x96b   :  { %3242 = vmatprep.subr.mxu1 %v3098_v48  ;;  %3411 = vmatprep.mubr.f32.mxu0 %v5465_v18  ;;  %v4826_v48 = vld [vmem:[%s7796_s5 + $0x220] sm:$0xff] }
 0x96c   :  { %3589 = vmatprep.subr.mxu0 %v4867_v46  ;;  %4793 = vmatmul.mubr.msk.f32.gmra.mxu1 %vm869_vm4, %v3104_v52  ;;  %v4825_v46 = vld [vmem:[%s7796_s5 + $0x218] sm:$0xff] }
 0x96d   :  { %4823 = vmatmul.mubr.msk.f32.gmra.mxu0 %vm869_vm4, %v3306_v53  ;;  %3243 = vmatpush1.msra.mxu1 %v3097_v49  ;;  %v4824_v49 = vld [vmem:[%s7796_s5 + $0x210] sm:$0xff] }
 0x96e   :  { %3590 = vmatpush1.msra.mxu0 %v4866_v50  ;;  %3244 = vmatprep.subr.mxu1 %v3096_v51  ;;  %v3422_v50 = vld [vmem:[#allocation2 + $0x13] sm:$0xff]  ;;  %v3423_v51 = vld [vmem:[#allocation2 + $0x1b] sm:$0x3] }
 0x96f   :  { %3591 = vmatprep.subr.mxu0 %v4865_v54  ;;  %3245 = vmatpush1.msra.mxu1 %v3095_v55 }
 0x970   :  { %3592 = vmatpush1.msra.mxu0 %v4864_v56  ;;  %3246 = vmatprep.subr.mxu1 %v3094_v57 }
 0x971   :  { %3593 = vmatprep.subr.mxu0 %v4863_v58  ;;  %3247 = vmatpush1.msra.mxu1 %v3093_v59 }
 0x972   :  { %3594 = vmatpush1.msra.mxu0 %v4862_v61  ;;  %3248 = vmatprep.subr.mxu1 %v3092_v62 }
 0x973   :  { %3595 = vmatprep.subr.mxu0 %v4861_v0  ;;  %3249 = vmatpush1.msra.mxu1 %v3091_v1 }
 0x974   :  { %3596 = vmatpush1.msra.mxu0 %v4860_v3  ;;  %3250 = vmatprep.subr.mxu1 %v3090_v4 }
 0x975   :  { %3597 = vmatprep.subr.mxu0 %v4859_v5  ;;  %3251 = vmatpush1.msra.mxu1 %v3089_v2 }
 0x976   :  { %3598 = vmatpush1.msra.mxu0 %v4858_v63  ;;  %3252 = vmatprep.subr.mxu1 %v3088_v7 }
 0x977   :  { %3599 = vmatprep.subr.mxu0 %v4857_v8  ;;  %3253 = vmatpush1.msra.mxu1 %v3087_v9 }
 0x978   :  { %3600 = vmatpush1.msra.mxu0 %v4856_v60  ;;  %3254 = vmatprep.subr.mxu1 %v3086_v10 }
 0x979   :  { %3601 = vmatprep.subr.mxu0 %v4855_v11  ;;  %3255 = vmatpush1.msra.mxu1 %v3085_v13 }
 0x97a   :  { %3602 = vmatpush1.msra.mxu0 %v4854_v14  ;;  %3256 = vmatprep.subr.mxu1 %v3084_v16 }
 0x97b   :  { %3603 = vmatprep.subr.mxu0 %v4853_v20  ;;  %3257 = vmatpush1.msra.mxu1 %v3083_v17  ;;  %v3656_v17 = vld [vmem:[%s7797_s6] sm:$0x3] }
 0x97c   :  { %3604 = vmatpush1.msra.mxu0 %v4852_v21  ;;  %3258 = vmatprep.subr.mxu1 %v3082_v19 }
 0x97d   :  { %3605 = vmatprep.subr.mxu0 %v4851_v22  ;;  %3259 = vmatpush1.msra.mxu1 %v3081_v23 }
 0x97e   :  { %3292 = vmatprep.mubr.f32.mxu1 %v5465_v18  ;;  %3606 = vmatpush1.msra.mxu0 %v4850_v24 }
 0x97f   :  { %3639 = vmatprep.mubr.f32.mxu0 %v5465_v18  ;;  %4796 = vmatmul.mubr.msk.f32.vlgmr.msra.gmra.mxu1 %vm869_vm4, %v3079_v27 }
 0x980   :  { %4846 = vmatprep.subr.msk.mxu1 %vm682_vm1, %v4845_v25  ;;  %4874 = vmatmul.mubr.msk.f32.vlgmr.msra.gmra.mxu0 %vm869_vm4, %v3539_v28  ;;  %v3661_v28 = vrot.slane %v3656_v17, %v5846_v6  ;;  %v3772_v6 = vld [vmem:[%s7799_s8 + $0x78] sm:$0xff] }
 0x981   :  { %4847 = vmatpush1.msk.msra.mxu1 %vm682_vm1, %v4844_v26  ;;  %3298 = vmatprep.mubr.f32.mxu1 %v5465_v18  ;;  %v3665_v26 = vrot.slane %v3656_v17, %v5851_v12  ;;  %v3676_v12 = vld [vmem:[%s7798_s7] sm:$0x1f] }
 0x982   :  { %3470 = vmatprep.subr.mxu1 %v4843_v15  ;;  %3645 = vmatprep.mubr.f32.mxu0 %v5465_v18 }
 0x983   :  { %3471 = vmatpush1.msra.mxu1 %v4842_v29  ;;  %5267 = vmatprep.subr.mxu0 %v5465_v18 }
 0x984   :  { %4797 = vmatmul.mubr.msk.f32.gmra.mxu1 %vm869_vm4, %v3080_v33  ;;  %3472 = vmatprep.subr.mxu1 %v4841_v30 }
 0x985   :  { %4875 = vmatmul.mubr.msk.f32.gmra.mxu0 %vm869_vm4, %v3540_v38  ;;  %3473 = vmatpush1.msra.mxu1 %v4840_v32 }
 0x986   :  { %3474 = vmatprep.subr.mxu1 %v4839_v37  ;;  %3522 = vmatprep.mubr.f32.mxu1 %v5465_v18 }
 0x987   :  { %3475 = vmatpush1.msra.mxu1 %v4838_v39  ;;  %5287 = vmatprep.mubr.msk.f32.mxu0 %vm5466_vm8, %v5465_v18 }
 0x988   :  { %3476 = vmatprep.subr.mxu1 %v4837_v41 }
 0x989   :  { %3477 = vmatpush1.msra.mxu1 %v4836_v43 }
 0x98a   :  { %3478 = vmatprep.subr.mxu1 %v4835_v42  ;;  %v3771_v42 = vld [vmem:[%s7799_s8 + $0x70] sm:$0xff] }
 0x98b   :  { %3479 = vmatpush1.msra.mxu1 %v4834_v40  ;;  %v3770_v40 = vld [vmem:[%s7799_s8 + $0x68] sm:$0xff] }
 0x98c   :  { %3480 = vmatprep.subr.mxu1 %v4833_v35  ;;  %v3769_v35 = vld [vmem:[%s7799_s8 + $0x60] sm:$0xff] }
 0x98d   :  { %3481 = vmatpush1.msra.mxu1 %v4832_v31  ;;  %v3768_v31 = vld [vmem:[%s7799_s8 + $0x58] sm:$0xff] }
 0x98e   :  { %3482 = vmatprep.subr.mxu1 %v4831_v44  ;;  %v3767_v44 = vld [vmem:[%s7799_s8 + $0x50] sm:$0xff] }
 0x98f   :  { %3483 = vmatpush1.msra.mxu1 %v4830_v36  ;;  %v3766_v36 = vld [vmem:[%s7799_s8 + $0x48] sm:$0xff] }
 0x990   :  { %3484 = vmatprep.subr.mxu1 %v4829_v45  ;;  %v3765_v45 = vld [vmem:[%s7799_s8 + $0x40] sm:$0xff] }
 0x991   :  { %3485 = vmatpush1.msra.mxu1 %v4828_v34  ;;  %v3764_v34 = vld [vmem:[%s7799_s8 + $0x38] sm:$0xff] }
 0x992   :  { %3486 = vmatprep.subr.mxu1 %v4827_v47  ;;  %v3763_v47 = vld [vmem:[%s7799_s8 + $0x30] sm:$0xff] }
 0x993   :  { %3487 = vmatpush1.msra.mxu1 %v4826_v48  ;;  %v3762_v48 = vld [vmem:[%s7799_s8 + $0x28] sm:$0xff] }
 0x994   :  { %3488 = vmatprep.subr.mxu1 %v4825_v46  ;;  %v3761_v46 = vld [vmem:[%s7799_s8 + $0x20] sm:$0xff] }
 0x995   :  { %3489 = vmatpush1.msra.mxu1 %v4824_v49  ;;  %v3760_v49 = vld [vmem:[%s7799_s8 + $0x18] sm:$0xff] }
 0x996   :  { %4848 = vmatmul.mubr.msk.f32.vlgmr.msra.gmra.mxu1 %vm869_vm4, %v3422_v50  ;;  %v3759_v50 = vld [vmem:[%s7799_s8 + $0x10] sm:$0xff] }
 0x997   :  { %3528 = vmatprep.mubr.f32.mxu1 %v5465_v18 }
 0x99a   :  { %4849 = vmatmul.mubr.msk.f32.gmra.mxu1 %vm869_vm4, %v3423_v51  ;;  %v3758_v51 = vld [vmem:[%s7799_s8 + $0x8] sm:$0xff] }
 0x99b   :  { %3750 = vmatprep.mubr.f32.mxu1 %v5465_v18 }
 0xa26   :  { %v3205_v52 = vpop.f32.mrf.mxu1 }
 0xa27   :  { %v3407_v55 = vpop.f32.mrf.mxu0 }
 0xa28   :  { %v3207_v53 = vpop.f32.mrf.mxu1 }
 0xa29   :  { %v3409_v57 = vpop.f32.mrf.mxu0 }
 0xa2c   :  { %v3211_v54 = vpop.f32.mrf.mxu1 }
 0xa2d   :  { %v3413_v59 = vpop.f32.mrf.mxu0 }
 0xa2e   :  { %v3213_v56 = vpop.f32.mrf.mxu1 }
 0xa2f   :  { %v3415_v62 = vpop.f32.mrf.mxu0 }
 0xa3f   :  { %v3294_v58 = vpop.f32.mrf.mxu1 }
 0xa40   :  { %v3641_v1 = vpop.f32.mrf.mxu0  ;;  %v3295_v4 = vadd.f32 %v3294_v58, %v3205_v52  ;;  %v3757_v52 = vld [vmem:[%s7799_s8] sm:$0xff] }
 0xa41   :  { %v3296_v61 = vpop.f32.mrf.mxu1  ;;  %v3862_v58 = vld [vmem:[%s7800_s9 + $0x40] sm:$0xff] }
 0xa42   :  { %v3297_v3 = vadd.f32 %v3296_v61, %v3207_v53  ;;  %v3643_v63 = vpop.f32.mrf.mxu0  ;;  %v3418_v60 = vadd.f32 %v3407_v55, %v3295_v4  ;;  %v3776_v53 = vld [vmem:[%s7799_s8 + $0x98] sm:$0xff]  ;;  %v3774_v55 = vld [vmem:[%s7799_s8 + $0x88] sm:$0xff]  ;;  %v3860_v61 = vld [vmem:[%s7800_s9 + $0x30] sm:$0xff] }
 0xa43   :  { %v4901_v4 = vld [vmem:[%s7800_s9 + $0xe8] sm:$0xff] }
 0xa44   :  { %v3300_v0 = vpop.f32.mrf.mxu1  ;;  %v3419_v9 = vadd.f32 %v3409_v57, %v3297_v3  ;;  %v3863_v57 = vld [vmem:[%s7800_s9 + $0x48] sm:$0xff] }
 0xa45   :  { %v3301_v2 = vadd.f32 %v3300_v0, %v3211_v54  ;;  %v3647_v14 = vpop.f32.mrf.mxu0  ;;  %v3775_v54 = vld [vmem:[%s7799_s8 + $0x90] sm:$0xff]  ;;  %5268 = vmatpush3.msra.mxu0 %v3863_v57  ;;  %v3858_v0 = vld [vmem:[%s7800_s9 + $0x20] sm:$0xff] }
 0xa46   :  { %v3302_v5 = vpop.f32.mrf.mxu1  ;;  %5269 = vmatprep.subr.mxu0 %v5465_v18  ;;  %v4289_v57 = vld [vmem:[%s7802_s11 + $0x50] sm:$0xff] }
 0xa47   :  { %v3303_v8 = vadd.f32 %v3302_v5, %v3213_v56  ;;  %v3420_v13 = vadd.f32 %v3413_v59, %v3301_v2  ;;  %v3649_v27 = vpop.f32.mrf.mxu0  ;;  %v3773_v56 = vld [vmem:[%s7799_s8 + $0x80] sm:$0xff]  ;;  %5270 = vmatpush3.msra.mxu0 %v3862_v58  ;;  %v3861_v59 = vld [vmem:[%s7800_s9 + $0x38] sm:$0xff]  ;;  %v4288_v58 = vld [vmem:[%s7802_s11 + $0x48] sm:$0xff] }
 0xa48   :  { %5271 = vmatprep.subr.mxu0 %v5465_v18  ;;  %v4900_v5 = vld [vmem:[%s7800_s9 + $0xe0] sm:$0xff]  ;;  %v4899_v2 = vld [vmem:[%s7800_s9 + $0xd8] sm:$0xff] }
 0xa49   :  { %v3421_v19 = vadd.f32 %v3415_v62, %v3303_v8  ;;  %5272 = vmatpush3.msra.mxu0 %v3861_v59  ;;  %v3859_v62 = vld [vmem:[%s7800_s9 + $0x28] sm:$0xff]  ;;  %v4896_v8 = vld [vmem:[%s7800_s9 + $0xc0] sm:$0xff] }
 0xa4a   :  { %5273 = vmatprep.subr.mxu0 %v5465_v18  ;;  %v4287_v59 = vld [vmem:[%s7802_s11 + $0x40] sm:$0xff] }
 0xa4b   :  { %5274 = vmatpush3.msra.mxu0 %v3860_v61  ;;  %v4286_v61 = vld [vmem:[%s7802_s11 + $0x38] sm:$0xff] }
 0xa4c   :  { %5275 = vmatprep.subr.mxu0 %v5465_v18 }
 0xa4d   :  { %5276 = vmatpush3.msra.mxu0 %v3859_v62  ;;  %v4285_v62 = vld [vmem:[%s7802_s11 + $0x30] sm:$0xff] }
 0xa4e   :  { %5277 = vmatprep.subr.mxu0 %v5465_v18 }
 0xa4f   :  { %5278 = vmatpush3.msra.mxu0 %v3858_v0  ;;  %v4284_v0 = vld [vmem:[%s7802_s11 + $0x28] sm:$0xff] }
 0xa50   :  { %5279 = vmatprep.subr.mxu0 %v5465_v18 }
 0xa56   :  { %v3524_v7 = vpop.f32.mrf.mxu1 }
 0xa57   :  { %v3535_v16 = vadd.f32 %v3524_v7, %v3418_v60  ;;  %v4897_v7 = vld [vmem:[%s7800_s9 + $0xc8] sm:$0xff]  ;;  %v4895_v60 = vld [vmem:[%s7800_s9 + $0xb8] sm:$0xff] }
 0xa58   :  { %v3526_v10 = vpop.f32.mrf.mxu1 }
 0xa59   :  { %v3536_v11 = vadd.f32 %v3526_v10, %v3419_v9  ;;  %v3652_v15 = vadd.f32 %v3641_v1, %v3535_v16  ;;  %v3857_v9 = vld [vmem:[%s7800_s9 + $0x18] sm:$0xff]  ;;  %v3856_v10 = vld [vmem:[%s7800_s9 + $0x10] sm:$0xff]  ;;  %v3854_v16 = vld [vmem:[%s7800_s9] sm:$0xff] }
 0xa5a   :  { %v3530_v20 = vpop.f32.mrf.mxu1  ;;  %5280 = vmatpush3.msra.mxu0 %v3857_v9  ;;  %v4376_v9 = vld [vmem:[%s7804_s13 + $0x38] sm:$0xff] }
 0xa5b   :  { %v3537_v21 = vadd.f32 %v3530_v20, %v3420_v13  ;;  %v3653_v23 = vadd.f32 %v3643_v63, %v3536_v11  ;;  %v3668_v37 = vadd.f32 %v3661_v28, %v3652_v15  ;;  %v4898_v63 = vld [vmem:[%s7800_s9 + $0xd0] sm:$0xff]  ;;  %5281 = vmatprep.subr.mxu0 %v5465_v18  ;;  %v3855_v13 = vld [vmem:[%s7800_s9 + $0x8] sm:$0xff]  ;;  %v4892_v20 = vld [vmem:[%s7800_s9 + $0xa0] sm:$0xff] }
 0xa5c   :  { %v3532_v22 = vpop.f32.mrf.mxu1  ;;  %v4894_v11 = vld [vmem:[%s7800_s9 + $0xb0] sm:$0xff]  ;;  %5282 = vmatpush3.msra.mxu0 %v3856_v10  ;;  %v4921_v15 = vld [vmem:[%s7800_s9 + $0x178] sm:$0xff]  ;;  %v4374_v10 = vld [vmem:[%s7804_s13 + $0x28] sm:$0xff] }
 0xa5d   :  { %v3654_v24 = vadd.f32 %v3647_v14, %v3537_v21  ;;  %v3538_v25 = vadd.f32 %v3532_v22, %v3421_v19  ;;  %v3669_v33 = vadd.f32 %v3665_v26, %v3653_v23  ;;  %v3672_v43 = vmax.f32 %v3668_v37, 0.0  ;;  %v4893_v14 = vld [vmem:[%s7800_s9 + $0xa8] sm:$0xff]  ;;  %5283 = vmatprep.subr.mxu0 %v5465_v18  ;;  %v4890_v19 = vld [vmem:[%s7800_s9 + $0x98] sm:$0xff]  ;;  %v4918_v37 = vld [vmem:[%s7800_s9 + $0x160] sm:$0xff] }
 0xa5e   :  { %5284 = vmatpush3.msra.mxu0 %v3855_v13  ;;  %v4923_v22 = vld [vmem:[%s7800_s9 + $0x188] sm:$0xff]  ;;  %v4372_v13 = vld [vmem:[%s7804_s13 + $0x18] sm:$0xff] }
 0xa5f   :  { %v3655_v29 = vadd.f32 %v3649_v27, %v3538_v25  ;;  %v3670_v30 = vadd.f32 %v3661_v28, %v3654_v24  ;;  %v3673_v41 = vmax.f32 %v3669_v33, 0.0  ;;  %5285 = vmatprep.subr.mxu0 %v5465_v18  ;;  %v4889_v25 = vld [vmem:[%s7800_s9 + $0x90] sm:$0xff]  ;;  %v4888_v27 = vld [vmem:[%s7800_s9 + $0x88] sm:$0xff]  ;;  %v4887_v28 = vld [vmem:[%s7800_s9 + $0x80] sm:$0xff] }
 0xa60   :  { %5286 = vmatpush3.msra.mxu0 %v3854_v16  ;;  %v4885_v33 = vld [vmem:[%s7800_s9 + $0x70] sm:$0xff] }
 0xa61   :  { %v3671_v32 = vadd.f32 %v3665_v26, %v3655_v29  ;;  %v3674_v39 = vmax.f32 %v3670_v30, 0.0  ;;  %5290 = vmatprep.subr.mxu0 %v5465_v18  ;;  %v4922_v26 = vld [vmem:[%s7800_s9 + $0x180] sm:$0xff]  ;;  %v4920_v29 = vld [vmem:[%s7800_s9 + $0x170] sm:$0xff]  ;;  %v4886_v30 = vld [vmem:[%s7800_s9 + $0x78] sm:$0xff] }
 0xa63   :  { %v3675_v38 = vmax.f32 %v3671_v32, 0.0  ;;  %v4919_v32 = vld [vmem:[%s7800_s9 + $0x168] sm:$0xff] }
 0xa65   :  { %4876 = vmatprep.subr.msk.mxu1 %vm1479_vm6, %v3675_v38  ;;  %v4884_v38 = vld [vmem:[%s7800_s9 + $0x68] sm:$0xff] }
 0xa66   :  { %4877 = vmatpush1.msk.msra.mxu1 %vm1479_vm6, %v3674_v39  ;;  %v4917_v39 = vld [vmem:[%s7800_s9 + $0x158] sm:$0xff] }
 0xa67   :  { %3716 = vmatprep.subr.mxu1 %v3673_v41  ;;  %v4883_v41 = vld [vmem:[%s7800_s9 + $0x60] sm:$0xff] }
 0xa68   :  { %3717 = vmatpush1.msra.mxu1 %v3672_v43  ;;  %v4916_v43 = vld [vmem:[%s7800_s9 + $0x150] sm:$0xff] }
 0xa69   :  { %4878 = vmatmul.mubr.msk.f32.vlgmr.msra.gmra.mxu1 %vm1475_vm7, %v3676_v12  ;;  %3780 = vmatprep.subr.mxu1 %v5465_v18  ;;  %v4882_v12 = vld [vmem:[%s7800_s9 + $0x58] sm:$0xff] }
 0xa6a   :  { %3781 = vmatpush1.msra.mxu1 %v3772_v6  ;;  %v4915_v6 = vld [vmem:[%s7800_s9 + $0x148] sm:$0xff] }
 0xa6b   :  { %3782 = vmatprep.subr.mxu1 %v5465_v18 }
 0xa6c   :  { %3783 = vmatpush1.msra.mxu1 %v3771_v42  ;;  %v4881_v42 = vld [vmem:[%s7800_s9 + $0x50] sm:$0xff] }
 0xa6d   :  { %3784 = vmatprep.subr.mxu1 %v5465_v18 }
 0xa6e   :  { %3785 = vmatpush1.msra.mxu1 %v3770_v40  ;;  %v4914_v40 = vld [vmem:[%s7800_s9 + $0x140] sm:$0xff] }
 0xa6f   :  { %3786 = vmatprep.subr.mxu1 %v5465_v18 }
 0xa70   :  { %3787 = vmatpush1.msra.mxu1 %v3769_v35  ;;  %v4912_v35 = vld [vmem:[%s7800_s9 + $0x138] sm:$0xff] }
 0xa71   :  { %3788 = vmatprep.subr.mxu1 %v5465_v18 }
 0xa72   :  { %3789 = vmatpush1.msra.mxu1 %v3768_v31 }
 0xa73   :  { %3790 = vmatprep.subr.mxu1 %v5465_v18 }
 0xa74   :  { %3791 = vmatpush1.msra.mxu1 %v3767_v44 }
 0xa75   :  { %3792 = vmatprep.subr.mxu1 %v5465_v18 }
 0xa76   :  { %3793 = vmatpush1.msra.mxu1 %v3766_v36  ;;  %v4911_v36 = vld [vmem:[%s7800_s9 + $0x130] sm:$0xff] }
 0xa77   :  { %3794 = vmatprep.subr.mxu1 %v5465_v18 }
 0xa78   :  { %3795 = vmatpush1.msra.mxu1 %v3765_v45  ;;  %v4910_v45 = vld [vmem:[%s7800_s9 + $0x128] sm:$0xff] }
 0xa79   :  { %3796 = vmatprep.subr.mxu1 %v5465_v18 }
 0xa7a   :  { %3797 = vmatpush1.msra.mxu1 %v3764_v34  ;;  %v4909_v34 = vld [vmem:[%s7800_s9 + $0x120] sm:$0xff] }
 0xa7b   :  { %3798 = vmatprep.subr.mxu1 %v5465_v18 }
 0xa7c   :  { %3799 = vmatpush1.msra.mxu1 %v3763_v47  ;;  %v4908_v47 = vld [vmem:[%s7800_s9 + $0x118] sm:$0xff] }
 0xa7d   :  { %3800 = vmatprep.subr.mxu1 %v5465_v18 }
 0xa7e   :  { %3801 = vmatpush1.msra.mxu1 %v3762_v48  ;;  %v4907_v48 = vld [vmem:[%s7800_s9 + $0x110] sm:$0xff] }
 0xa7f   :  { %3802 = vmatprep.subr.mxu1 %v5465_v18 }
 0xa80   :  { %3803 = vmatpush1.msra.mxu1 %v3761_v46  ;;  %v4906_v46 = vld [vmem:[%s7800_s9 + $0x108] sm:$0xff] }
 0xa81   :  { %3804 = vmatprep.subr.mxu1 %v5465_v18 }
 0xa82   :  { %3805 = vmatpush1.msra.mxu1 %v3760_v49  ;;  %v4905_v49 = vld [vmem:[%s7800_s9 + $0x100] sm:$0xff] }
 0xa83   :  { %3806 = vmatprep.subr.mxu1 %v5465_v18 }
 0xa84   :  { %3807 = vmatpush1.msra.mxu1 %v3759_v50  ;;  %v4904_v50 = vld [vmem:[%s7800_s9 + $0xf8] sm:$0xff] }
 0xa85   :  { %3808 = vmatprep.subr.mxu1 %v5465_v18 }
 0xa86   :  { %3809 = vmatpush1.msra.mxu1 %v3758_v51  ;;  %v4903_v51 = vld [vmem:[%s7800_s9 + $0xf0] sm:$0xff] }
 0xa87   :  { %3810 = vmatprep.subr.mxu1 %v5465_v18 }
 0xa88   :  { %3811 = vmatpush1.msra.mxu1 %v3757_v52 }
 0xa89   :  { %3836 = vmatprep.subr.mxu1 %v5465_v18 }
 0xa8a   :  { %3837 = vmatpush2.msra.mxu1 %v3776_v53  ;;  %v4293_v53 = vld [vmem:[%s7802_s11 + $0x70] sm:$0xff] }
 0xa8b   :  { %3838 = vmatprep.subr.mxu1 %v5465_v18 }
 0xa8c   :  { %3839 = vmatpush2.msra.mxu1 %v3775_v54  ;;  %v4292_v54 = vld [vmem:[%s7802_s11 + $0x68] sm:$0xff] }
 0xa8d   :  { %3840 = vmatprep.subr.mxu1 %v5465_v18 }
 0xa8e   :  { %3841 = vmatpush2.msra.mxu1 %v3774_v55  ;;  %v4291_v55 = vld [vmem:[%s7802_s11 + $0x60] sm:$0xff] }
 0xa8f   :  { %3842 = vmatprep.subr.mxu1 %v5465_v18 }
 0xa90   :  { %3843 = vmatpush2.msra.mxu1 %v3773_v56  ;;  %v4290_v56 = vld [vmem:[%s7802_s11 + $0x58] sm:$0xff] }
 0xa91   :  { %5313 = vmatprep.subr.mxu1 %v5465_v18 }
 0xb29   :  { %v3752_v1 = vpop.f32.mrf.mxu1 }
 0xb2b   :  { %v3754_v3 = vpop.f32.mrf.mxu1 }
 0xb2c   :  { %4879 = vmatprep.mubr.msk.f32.mxu1 %vm76_vm0, %v3754_v3  ;;  %v4282_v3 = vld [vmem:[%s7802_s11 + $0x18] sm:$0xff] }
 0xb2d   :  { %3845 = vmatmul.mubr.f32.vlgmr.msra.gmra.mxu1 %v3752_v1  ;;  %v4283_v1 = vld [vmem:[%s7802_s11 + $0x20] sm:$0xff] }
 0xb2e   :  { %5314 = vmatpush3.msra.mxu1 %v4901_v4  ;;  %5333 = vmatprep.mubr.msk.f32.mxu1 %vm5466_vm8, %v5465_v18  ;;  %v4281_v4 = vld [vmem:[%s7802_s11 + $0x10] sm:$0xff] }
 0xb2f   :  { %5315 = vmatprep.subr.mxu1 %v5465_v18 }
 0xb30   :  { %5316 = vmatpush3.msra.mxu1 %v4900_v5  ;;  %v4280_v5 = vld [vmem:[%s7802_s11 + $0x8] sm:$0xff] }
 0xb31   :  { %5317 = vmatprep.subr.mxu1 %v5465_v18 }
 0xb32   :  { %5318 = vmatpush3.msra.mxu1 %v4899_v2  ;;  %v4279_v2 = vld [vmem:[%s7802_s11] sm:$0xff] }
 0xb33   :  { %5319 = vmatprep.subr.mxu1 %v5465_v18 }
 0xb34   :  { %5320 = vmatpush3.msra.mxu1 %v4898_v63  ;;  %v4379_v63 = vld [vmem:[%s7804_s13 + $0x50] sm:$0xf] }
 0xb35   :  { %5321 = vmatprep.subr.mxu1 %v5465_v18 }
 0xb36   :  { %5322 = vmatpush3.msra.mxu1 %v4897_v7  ;;  %v4378_v7 = vld [vmem:[%s7804_s13 + $0x48] sm:$0xff] }
 0xb37   :  { %5323 = vmatprep.subr.mxu1 %v5465_v18 }
 0xb38   :  { %5324 = vmatpush3.msra.mxu1 %v4896_v8  ;;  %v4377_v8 = vld [vmem:[%s7804_s13 + $0x40] sm:$0xff] }
 0xb39   :  { %5325 = vmatprep.subr.mxu1 %v5465_v18 }
 0xb3a   :  { %5326 = vmatpush3.msra.mxu1 %v4895_v60  ;;  %v4375_v60 = vld [vmem:[%s7804_s13 + $0x30] sm:$0xff] }
 0xb3b   :  { %5327 = vmatprep.subr.mxu1 %v5465_v18 }
 0xb3c   :  { %5328 = vmatpush3.msra.mxu1 %v4894_v11  ;;  %v4373_v11 = vld [vmem:[%s7804_s13 + $0x20] sm:$0xff] }
 0xb3d   :  { %5329 = vmatprep.subr.mxu1 %v5465_v18 }
 0xb3e   :  { %5330 = vmatpush3.msra.mxu1 %v4893_v14 }
 0xb3f   :  { %5331 = vmatprep.subr.mxu1 %v5465_v18 }
 0xb40   :  { %5332 = vmatpush3.msra.mxu1 %v4892_v20 }
 0xb41   :  { %5359 = vmatprep.subr.mxu1 %v5465_v18 }
 0xbed   :  { %v3846_v17 = vpop.f32.mrf.mxu1 }
 0xbee   :  { %3851 = vst.msk [vmem:[#allocation3 + $0x8] sm:$0x1f] %vm1650_vm9, %v3846_v17 }
 0xbef   :  { %v3848_v21 = vpop.f32.mrf.mxu1 }
 0xbf5   :  { %v3853_v23 = vld [vmem:[#allocation3 + $0x8] sm:$0x1]  ;;  %v4023_v24 = vld [vmem:[#allocation3 + $0xa] sm:$0x1]  ;;  %v3938_v31 = vld [vmem:[#allocation3 + $0x9] sm:$0x1] }
 0xbf6   :  { %5288 = vmatmul.mubr.msk.f32.vlgmr.msra.gmra.mxu0 %vm1664_vm10, %v3853_v23  ;;  %5334 = vmatmul.mubr.msk.f32.vlgmr.msra.gmra.mxu1 %vm1664_vm10, %v4023_v24  ;;  %v4193_v44 = vld [vmem:[#allocation3 + $0xc] sm:$0x1]  ;;  %v4108_v52 = vld [vmem:[#allocation3 + $0xb] sm:$0x1]  ;;  %v3852_v24 = vld [vmem:[%s7801_s10] sm:$0x1] }
 0xbf7   :  { %5291 = vmatpush3.msra.mxu0 %v4890_v19  ;;  %5360 = vmatpush3.msra.mxu1 %v4923_v22 }
 0xbf8   :  { %5292 = vmatprep.subr.mxu0 %v5465_v18  ;;  %5361 = vmatprep.subr.mxu1 %v5465_v18 }
 0xbf9   :  { %5293 = vmatpush3.msra.mxu0 %v4889_v25  ;;  %5362 = vmatpush3.msra.mxu1 %v4922_v26 }
 0xbfa   :  { %5294 = vmatprep.subr.mxu0 %v5465_v18  ;;  %5363 = vmatprep.subr.mxu1 %v5465_v18 }
 0xbfb   :  { %5295 = vmatpush3.msra.mxu0 %v4888_v27  ;;  %5364 = vmatpush3.msra.mxu1 %v4921_v15 }
 0xbfc   :  { %5296 = vmatprep.subr.mxu0 %v5465_v18  ;;  %5365 = vmatprep.subr.mxu1 %v5465_v18 }
 0xbfd   :  { %5297 = vmatpush3.msra.mxu0 %v4887_v28  ;;  %5366 = vmatpush3.msra.mxu1 %v4920_v29 }
 0xbfe   :  { %5298 = vmatprep.subr.mxu0 %v5465_v18  ;;  %5367 = vmatprep.subr.mxu1 %v5465_v18 }
 0xbff   :  { %5299 = vmatpush3.msra.mxu0 %v4886_v30  ;;  %5368 = vmatpush3.msra.mxu1 %v4919_v32 }
 0xc00   :  { %5300 = vmatprep.subr.mxu0 %v5465_v18  ;;  %5369 = vmatprep.subr.mxu1 %v5465_v18 }
 0xc01   :  { %5301 = vmatpush3.msra.mxu0 %v4885_v33  ;;  %5370 = vmatpush3.msra.mxu1 %v4918_v37  ;;  %v4371_v33 = vld [vmem:[%s7804_s13 + $0x10] sm:$0xff]  ;;  %v4370_v37 = vld [vmem:[%s7804_s13 + $0x8] sm:$0xff] }
 0xc02   :  { %5302 = vmatprep.subr.mxu0 %v5465_v18  ;;  %5371 = vmatprep.subr.mxu1 %v5465_v18 }
 0xc03   :  { %5303 = vmatpush3.msra.mxu0 %v4884_v38  ;;  %5372 = vmatpush3.msra.mxu1 %v4917_v39  ;;  %v4369_v38 = vld [vmem:[%s7804_s13] sm:$0xff]  ;;  %s5443_s13 = scalar_lea.vmem %s4465_s22, 32 }
 0xc04   :  { %5304 = vmatprep.subr.mxu0 %v5465_v18  ;;  %5373 = vmatprep.subr.mxu1 %v5465_v18  ;;  %v4294_v39 = vld [vmem:[%s7803_s12] sm:$0x1]  ;;  %p5444_p0 = scmp.ne.s32.totalorder %s4465_s22, %s5443_s13  ;;  %p5449_p2 = scmp.lt.s32.totalorder %s5443_s13, %s5443_s13 }
 0xc05   :  { %5305 = vmatpush3.msra.mxu0 %v4883_v41  ;;  %5374 = vmatpush3.msra.mxu1 %v4916_v43 }
 0xc06   :  { %5306 = vmatprep.subr.mxu0 %v5465_v18  ;;  %5375 = vmatprep.subr.mxu1 %v5465_v18  ;;  %p5450_p3 = por %p5449_p2, %p5448_p1 }
 0xc07   :  { %5307 = vmatpush3.msra.mxu0 %v4882_v12  ;;  %5376 = vmatpush3.msra.mxu1 %v4915_v6 }
 0xc08   :  { %5308 = vmatprep.subr.mxu0 %v5465_v18  ;;  %5377 = vmatprep.subr.mxu1 %v5465_v18  ;;  %p5451_p4 = pnand %p5450_p3, %p5444_p0 }
 0xc09   :  { %5309 = vmatpush3.msra.mxu0 %v4881_v42  ;;  %5310 = vmatprep.mubr.msk.f32.mxu0 %vm5466_vm8, %v5465_v18  ;;  %v4380_v42 = vld [vmem:[%s7805_s14] sm:$0x1] }
 0xc0a   :  { %5378 = vmatpush3.msra.mxu1 %v4914_v40  ;;  %5379 = vmatprep.mubr.msk.f32.mxu1 %vm5466_vm8, %v5465_v18 }
 0xc0b   :  { %5311 = vmatmul.mubr.msk.f32.vlgmr.msra.gmra.mxu0 %vm1664_vm10, %v3938_v31  ;;  %5336 = vmatprep.subr.mxu0 %v5465_v18 }
 0xc0c   :  { %5380 = vmatmul.mubr.msk.f32.vlgmr.msra.gmra.mxu1 %vm1664_vm10, %v4193_v44  ;;  %5337 = vmatpush3.msra.mxu0 %v4912_v35 }
 0xc0d   :  { %5338 = vmatprep.subr.mxu0 %v5465_v18  ;;  %5356 = vmatprep.mubr.msk.f32.mxu0 %vm5466_vm8, %v5465_v18 }
 0xc0e   :  { %5339 = vmatpush3.msra.mxu0 %v4911_v36  ;;  %5415 = vmatprep.subr.mxu1 %v5465_v18 }
 0xc0f   :  { %5340 = vmatprep.subr.mxu0 %v5465_v18  ;;  %5437 = vmatprep.mubr.msk.f32.mxu1 %vm5466_vm8, %v5465_v18 }
 0xc10   :  { %5341 = vmatpush3.msra.mxu0 %v4910_v45  ;;  %5416 = vmatpush3.msk.msra.mxu1 %vm682_vm1, %v4379_v63 }
 0xc11   :  { %5342 = vmatprep.subr.mxu0 %v5465_v18  ;;  %5417 = vmatprep.subr.mxu1 %v5465_v18 }
 0xc12   :  { %5343 = vmatpush3.msra.mxu0 %v4909_v34  ;;  %5418 = vmatpush3.msra.mxu1 %v4378_v7 }
 0xc13   :  { %5344 = vmatprep.subr.mxu0 %v5465_v18  ;;  %5419 = vmatprep.subr.mxu1 %v5465_v18 }
 0xc14   :  { %5345 = vmatpush3.msra.mxu0 %v4908_v47  ;;  %5420 = vmatpush3.msra.mxu1 %v4377_v8 }
 0xc15   :  { %5346 = vmatprep.subr.mxu0 %v5465_v18  ;;  %5421 = vmatprep.subr.mxu1 %v5465_v18 }
 0xc16   :  { %5347 = vmatpush3.msra.mxu0 %v4907_v48  ;;  %5422 = vmatpush3.msra.mxu1 %v4376_v9 }
 0xc17   :  { %5348 = vmatprep.subr.mxu0 %v5465_v18  ;;  %5423 = vmatprep.subr.mxu1 %v5465_v18 }
 0xc18   :  { %5349 = vmatpush3.msra.mxu0 %v4906_v46  ;;  %5424 = vmatpush3.msra.mxu1 %v4375_v60 }
 0xc19   :  { %5350 = vmatprep.subr.mxu0 %v5465_v18  ;;  %5425 = vmatprep.subr.mxu1 %v5465_v18 }
 0xc1a   :  { %5351 = vmatpush3.msra.mxu0 %v4905_v49  ;;  %5426 = vmatpush3.msra.mxu1 %v4374_v10 }
 0xc1b   :  { %5352 = vmatprep.subr.mxu0 %v5465_v18  ;;  %5427 = vmatprep.subr.mxu1 %v5465_v18 }
 0xc1c   :  { %5353 = vmatpush3.msra.mxu0 %v4904_v50  ;;  %5428 = vmatpush3.msra.mxu1 %v4373_v11 }
 0xc1d   :  { %5354 = vmatprep.subr.mxu0 %v5465_v18  ;;  %5429 = vmatprep.subr.mxu1 %v5465_v18 }
 0xc1e   :  { %5355 = vmatpush3.msra.mxu0 %v4903_v51  ;;  %5430 = vmatpush3.msra.mxu1 %v4372_v13 }
 0xc1f   :  { %5357 = vmatmul.mubr.msk.f32.vlgmr.msra.gmra.mxu0 %vm1664_vm10, %v4108_v52  ;;  %5382 = vmatprep.subr.mxu0 %v5465_v18 }
 0xc20   :  { %5412 = vmatprep.mubr.msk.f32.mxu0 %vm5466_vm8, %v5465_v18  ;;  %5383 = vmatpush3.msra.mxu0 %v4293_v53 }
 0xc21   :  { %5384 = vmatprep.subr.mxu0 %v5465_v18  ;;  %5431 = vmatprep.subr.mxu1 %v5465_v18 }
 0xc22   :  { %5385 = vmatpush3.msra.mxu0 %v4292_v54  ;;  %5432 = vmatpush3.msra.mxu1 %v4371_v33 }
 0xc23   :  { %5386 = vmatprep.subr.mxu0 %v5465_v18  ;;  %5433 = vmatprep.subr.mxu1 %v5465_v18 }
 0xc24   :  { %5387 = vmatpush3.msra.mxu0 %v4291_v55  ;;  %5434 = vmatpush3.msra.mxu1 %v4370_v37 }
 0xc25   :  { %5388 = vmatprep.subr.mxu0 %v5465_v18  ;;  %5435 = vmatprep.subr.mxu1 %v5465_v18 }
 0xc26   :  { %5389 = vmatpush3.msra.mxu0 %v4290_v56  ;;  %5436 = vmatpush3.msra.mxu1 %v4369_v38 }
 0xc27   :  { %5390 = vmatprep.subr.mxu0 %v5465_v18 }
 0xc28   :  { %5391 = vmatpush3.msra.mxu0 %v4289_v57 }
 0xc29   :  { %5392 = vmatprep.subr.mxu0 %v5465_v18 }
 0xc2a   :  { %5393 = vmatpush3.msra.mxu0 %v4288_v58 }
 0xc2b   :  { %5394 = vmatprep.subr.mxu0 %v5465_v18 }
 0xc2c   :  { %5395 = vmatpush3.msra.mxu0 %v4287_v59 }
 0xc2d   :  { %5396 = vmatprep.subr.mxu0 %v5465_v18 }
 0xc2e   :  { %5397 = vmatpush3.msra.mxu0 %v4286_v61 }
 0xc2f   :  { %5398 = vmatprep.subr.mxu0 %v5465_v18 }
 0xc30   :  { %5399 = vmatpush3.msra.mxu0 %v4285_v62 }
 0xc31   :  { %5400 = vmatprep.subr.mxu0 %v5465_v18 }
 0xc32   :  { %5401 = vmatpush3.msra.mxu0 %v4284_v0 }
 0xc33   :  { %5402 = vmatprep.subr.mxu0 %v5465_v18 }
 0xc34   :  { %5403 = vmatpush3.msra.mxu0 %v4283_v1 }
 0xc35   :  { %5404 = vmatprep.subr.mxu0 %v5465_v18 }
 0xc36   :  { %5405 = vmatpush3.msra.mxu0 %v4282_v3 }
 0xc37   :  { %5406 = vmatprep.subr.mxu0 %v5465_v18 }
 0xc38   :  { %5407 = vmatpush3.msra.mxu0 %v4281_v4 }
 0xc39   :  { %5408 = vmatprep.subr.mxu0 %v5465_v18 }
 0xc3a   :  { %5409 = vmatpush3.msra.mxu0 %v4280_v5 }
 0xc3b   :  { %5410 = vmatprep.subr.mxu0 %v5465_v18 }
 0xc3c   :  { %5411 = vmatpush3.msra.mxu0 %v4279_v2 }
 0xcb6   :  { %v3933_v14 = vpop.f32.mrf.mxu0  ;;  %v4103_v16 = vpop.f32.mrf.mxu1 }
 0xcb7   :  { %v3937_v25 = vadd.f32 %v3933_v14, %v3852_v24 }
 0xcb8   :  { %v5289_v20 = vpop.f32.mrf.mxu0  ;;  %v5335_v17 = vpop.f32.mrf.mxu1 }
 0xccb   :  { %v4018_v21 = vpop.f32.mrf.mxu0 }
 0xccc   :  { %v4273_v19 = vpop.f32.mrf.mxu1  ;;  %v4022_v26 = vadd.f32 %v4018_v21, %v3937_v25 }
 0xccd   :  { %v5312_v22 = vpop.f32.mrf.mxu0 }
 0xcce   :  { %v5381_v23 = vpop.f32.mrf.mxu1  ;;  %v4107_v27 = vadd.f32 %v4103_v16, %v4022_v26 }
 0xcdf   :  { %v4188_v15 = vpop.f32.mrf.mxu0 }
 0xce0   :  { %v4192_v28 = vadd.f32 %v4188_v15, %v4107_v27 }
 0xce1   :  { %v5358_v29 = vpop.f32.mrf.mxu0 }
 0xce2   :  { %v4277_v30 = vadd.f32 %v4273_v19, %v4192_v28 }
 0xce4   :  { %v4278_v32 = vmax.f32 %v4277_v30, 0.0 }
 0xce6   :  { %5413 = vmatmul.mubr.msk.f32.vlgmr.msra.gmra.mxu0 %vm2100_vm11, %v4278_v32 }
 0xda6   :  { %v4364_v41 = vpop.f32.mrf.mxu0 }
 0xda7   :  { %v4365_v43 = vadd.f32 %v4364_v41, %v4294_v39 }
 0xda8   :  { %v5414_v12 = vpop.f32.mrf.mxu0 }
 0xda9   :  { %v4368_v6 = vmax.f32 %v4365_v43, 0.0 }
 0xdab   :  { %5438 = vmatmul.mubr.msk.f32.vlgmr.msra.gmra.mxu1 %vm869_vm4, %v4368_v6 }
 0xe6b   :  { %v4453_v40 = vpop.f32.mrf.mxu1 }
 0xe6c   :  { %v4454_v35 = vadd.f32 %v4453_v40, %v4380_v42 }
 0xe6d   :  { %v5439_v18 = vpop.f32.mrf.mxu1 }
 0xe6e   :  { %4457 = vst.msk [vmem:[#allocation4 + $0x1] sm:$0x1] %vm2263_vm12, %v4454_v35 }
 0xe6f   :  { %5454 = shalt.err (!%p5451_p4)
}
 0xe70   :  { %4467 = dma.vmem_to_hbm [thread:$0]  %s4465_s22, 32, %s7806_s15, [#allocation5]  }
 0xe71   :  { %5463 = dma.done.wait [#allocation5], 32  }
 0xe72   :  { %5464 = vsyncadd [#allocation5], 4294967264 }
 0xe73   :  { %4471 = vsyncpa [#allocation5], 1 }

</bundles_post_ra>
